<compile_context>
chip_gen: v6e
topology: v6e:2x2x1
jax: 0.10.0
libtpu: 0.0.40
codegen_flags: <defaults>
</compile_context>

<pallas_src>
import functools
import math

import jax
import jax.numpy as jnp
from jax import lax
from jax.experimental import pallas as pl
from jax.experimental.pallas import tpu as pltpu


# ----------------------------------------------------------------------------
# Fused kernel: attention -> (hoisted-ih) multi-layer GRU -> decoder
# ----------------------------------------------------------------------------
def _fused_lm_kernel(emb_ref, attn_w_ref, attn_b_ref, *rest,
                     nlayers, nhid, inv_sqrt_nsql, use_linear, use_mask):
    # Parse refs: [gru weights]*4*nlayers, dec_w, dec_b, decoded_out, hidden_out, cur_scratch
    gru_refs = rest[:4 * nlayers]
    dec_w_ref = rest[4 * nlayers + 0]
    dec_b_ref = rest[4 * nlayers + 1]
    decoded_ref = rest[4 * nlayers + 2]   # (batch, seq, nvoc)
    hidden_ref = rest[4 * nlayers + 3]    # (batch, nlayers, nhid)
    cur_ref = rest[4 * nlayers + 4]       # VMEM scratch (seq, nhid): per-layer output buffer

    batch, seq, _ = emb_ref.shape

    # Hoist all weight loads out of the loops (they stay in vregs / cheap VMEM reloads).
    w_attn = attn_w_ref[...]              # (nin, nin)   (pre-transposed: x @ W^T == x @ w_attn)
    b_attn = attn_b_ref[...]              # (1, nin)
    gru_w = [(gru_refs[4 * l + 0][...],   # w_ih_t: (in_dim, 3*nhid), columns [r | z | n]
              gru_refs[4 * l + 1][...],   # w_hh_t: (nhid, 3*nhid)
              gru_refs[4 * l + 2][...],   # b_ih:   (1, 3*nhid)
              gru_refs[4 * l + 3][...])   # b_hh:   (1, 3*nhid)
             for l in range(nlayers)]
    w_dec = dec_w_ref[...]                # (nhid, nvoc)
    b_dec = dec_b_ref[...]                # (1, nvoc)

    # batch is tiny (2) and every batch element is independent -> static unrolled loop.
    # (For large batch, make this a "parallel" grid axis instead: v7x 2-TC sharding.)
    for b in range(batch):
        # ----------------- self-attention over the embeddings -----------------
        e = emb_ref[b]                                            # (seq, nin)
        if use_linear:
            mid = jnp.dot(e, w_attn, preferred_element_type=jnp.float32) + b_attn
        else:
            mid = e
        # mid @ e.T without materializing a transpose: contract the last dims.
        s = lax.dot_general(mid, e, (((1,), (1,)), ((), ())),
                            preferred_element_type=jnp.float32) * inv_sqrt_nsql  # (i, j)
        if use_mask:
            row = lax.broadcasted_iota(jnp.int32, (seq, seq), 0)  # i (query)
            col = lax.broadcasted_iota(jnp.int32, (seq, seq), 1)  # j (key)
            s = jnp.where(col > row, jnp.float32(-1e30), s)       # triu(diagonal=1) -> -inf
        # F.softmax(attention_score, dim=1): normalize over the *query* axis (axis 0). Faithful.
        m = jnp.max(s, axis=0, keepdims=True)
        p = jnp.exp(s - m)
        attn = p / jnp.sum(p, axis=0, keepdims=True)
        new_in = jnp.dot(attn, e, preferred_element_type=jnp.float32)     # (seq, nin)

        # ----------------------- multi-layer GRU (fused) ----------------------
        x_seq = new_in                       # current layer's input over all timesteps
        h_lasts = []
        for l in range(nlayers):
            w_ih_t, w_hh_t, b_ih, b_hh = gru_w[l]

            # Hoisted input-to-hidden gates: ONE (seq, in_dim) @ (in_dim, 3*nhid) matmul,
            # outside the serial recurrence (cuDNN-style GRU split).
            gx = jnp.dot(x_seq, w_ih_t, preferred_element_type=jnp.float32) + b_ih  # (seq, 3*nhid)

            h = jnp.zeros((1, nhid), jnp.float32)                 # GRU default h0 = 0
            for t in range(seq):                                  # short seq -> fully unrolled
                gx_t = gx[t:t + 1, :]                             # (1, 3*nhid)
                gh = jnp.dot(h, w_hh_t, preferred_element_type=jnp.float32) + b_hh
                r = jax.nn.sigmoid(gx_t[:, 0:nhid] + gh[:, 0:nhid])
                z = jax.nn.sigmoid(gx_t[:, nhid:2 * nhid] + gh[:, nhid:2 * nhid])
                # n = tanh(ih_n + r * (hh_n + b_hn)):  b_hh is already folded into gh -> correct.
                n = jnp.tanh(gx_t[:, 2 * nhid:3 * nhid] + r * gh[:, 2 * nhid:3 * nhid])
                h = (1.0 - z) * n + z * h
                cur_ref[pl.ds(t, 1), :] = h                       # collect layer output
            h_lasts.append(h)
            x_seq = cur_ref[...]                                  # (seq, nhid): next layer input

        # ------------------------------ decoder --------------------------------
        # (At realistic nvoc/nhid this would be a tiled matmul kernel with bf16 operands and
        #  lane-dense (multiple-of-128) output blocks; nvoc=32 fits in one vreg slab here.)
        dec = jnp.dot(x_seq, w_dec, preferred_element_type=jnp.float32) + b_dec     # (seq, nvoc)
        decoded_ref[b] = dec
        hidden_ref[b] = jnp.concatenate(h_lasts, axis=0)          # (nlayers, nhid)


def fused_lm_forward(emb_bsd, attn_w_t, attn_b, gru_flat, dec_w_t, dec_b, *,
                     nsql, nlayers, nhid, use_linear=True, use_mask=True):
    batch, seq, nin = emb_bsd.shape
    nvoc = dec_w_t.shape[1]

    kernel = functools.partial(
        _fused_lm_kernel,
        nlayers=nlayers, nhid=nhid,
        inv_sqrt_nsql=1.0 / math.sqrt(nsql),
        use_linear=use_linear, use_mask=use_mask,
    )

    def full(shape):
        nd = len(shape)
        return pl.BlockSpec(shape, lambda i, _nd=nd: (0,) * _nd)

    in_specs = [full((batch, seq, nin)), full((nin, nin)), full((1, nin))]
    for l in range(nlayers):
        in_dim = nin if l == 0 else nhid
        in_specs += [full((in_dim, 3 * nhid)), full((nhid, 3 * nhid)),
                     full((1, 3 * nhid)), full((1, 3 * nhid))]
    in_specs += [full((nhid, nvoc)), full((1, nvoc))]

    out_specs = (full((batch, seq, nvoc)), full((batch, nlayers, nhid)))
    out_shape = (jax.ShapeDtypeStruct((batch, seq, nvoc), jnp.float32),
                 jax.ShapeDtypeStruct((batch, nlayers, nhid), jnp.float32))

    return pl.pallas_call(
        kernel,
        grid=(1,),                        # whole forward in a single grid step, weights resident
        in_specs=in_specs,
        out_specs=out_specs,
        out_shape=out_shape,
        scratch_shapes=[pltpu.VMEM((seq, nhid), jnp.float32)],
        compiler_params=pltpu.CompilerParams(dimension_semantics=("arbitrary",)),
    )(emb_bsd, attn_w_t, attn_b, *gru_flat, dec_w_t, dec_b)


# ----------------------------------------------------------------------------
# Forward pass wrapper (only the data-dependent embedding gather stays in JAX)
# ----------------------------------------------------------------------------
def lm_model_forward(params, tokens, *, nsql, use_linear=True, use_mask=True):
    # Gather batch-major directly (transposes the tiny int token matrix, not activations).
    # Dropout(0.5) -> identity in the deterministic (eval) forward.
    emb_bsd = params["encoder_weight"][tokens.T]                  # (batch, seq, ninput)

    decoded_bm, hidden_bm = fused_lm_forward(
        emb_bsd, params["attn_w_t"], params["attn_b"], params["gru_flat"],
        params["dec_w_t"], params["dec_b"],
        nsql=nsql, nlayers=params["nlayers"], nhid=params["nhid"],
        use_linear=use_linear, use_mask=use_mask,
    )
    # O(KB) layout fixups to match the module's (seq, batch, nvoc)/(nlayers, batch, nhid) outputs.
    decoded = jnp.transpose(decoded_bm, (1, 0, 2))
    hidden = jnp.transpose(hidden_bm, (1, 0, 2))
    return decoded, hidden


# ----------------------------------------------------------------------------
# Deterministic parameter init (shapes / init scheme of the nn.Module),
# pre-laid-out for the kernel (transposed weights, fused 3-gate columns [r|z|n]).
# ----------------------------------------------------------------------------
def init_params(key, nvoc, ninput, nhid, nlayers):
    keys = jax.random.split(key, 3 + 4 * nlayers)
    enc = jax.random.uniform(keys[0], (nvoc, ninput), jnp.float32, -0.1, 0.1)
    attn_w = jax.random.uniform(keys[1], (ninput, ninput), jnp.float32, -0.1, 0.1)
    dec_w = jax.random.uniform(keys[2], (nvoc, nhid), jnp.float32, -0.1, 0.1)

    stdv = 1.0 / math.sqrt(nhid)   # PyTorch GRU default init
    gru_flat = []
    kidx = 3
    for l in range(nlayers):
        in_dim = ninput if l == 0 else nhid
        w_ih = jax.random.uniform(keys[kidx + 0], (3 * nhid, in_dim), jnp.float32, -stdv, stdv)
        w_hh = jax.random.uniform(keys[kidx + 1], (3 * nhid, nhid), jnp.float32, -stdv, stdv)
        b_ih = jax.random.uniform(keys[kidx + 2], (3 * nhid,), jnp.float32, -stdv, stdv)
        b_hh = jax.random.uniform(keys[kidx + 3], (3 * nhid,), jnp.float32, -stdv, stdv)
        kidx += 4
        # Transposed so the kernel does one fused (in_dim, 3*nhid) matmul; columns are [r | z | n].
        gru_flat.extend([w_ih.T, w_hh.T,
                         b_ih.reshape(1, 3 * nhid), b_hh.reshape(1, 3 * nhid)])

    return dict(
        encoder_weight=enc,
        attn_w_t=attn_w.T,                 # x @ W^T  ==  x @ attn_w_t
        attn_b=jnp.zeros((1, ninput), jnp.float32),
        dec_w_t=dec_w.T,
        dec_b=jnp.zeros((1, nvoc), jnp.float32),
        gru_flat=gru_flat,
        nhid=nhid,
        nlayers=nlayers,
    )


if __name__ == "__main__":
    # Small shapes consistent with the module: nvoc=32, ninput=16, nhid=32, nlayers=2, nsql=8, batch=2
    nvoc, ninput, nhid, nlayers, nsql, batch = 32, 16, 32, 2, 8, 2

    key = jax.random.PRNGKey(0)
    pkey, tkey = jax.random.split(key)
    params = init_params(pkey, nvoc, ninput, nhid, nlayers)
    tokens = jax.random.randint(tkey, (nsql, batch), 0, nvoc, dtype=jnp.int32)

    decoded, hidden = lm_model_forward(params, tokens, nsql=nsql,
                                       use_linear=True, use_mask=True)
    jax.block_until_ready((decoded, hidden))

    assert decoded.shape == (nsql, batch, nvoc), decoded.shape
    assert hidden.shape == (nlayers, batch, nhid), hidden.shape
    assert bool(jnp.all(jnp.isfinite(decoded))) and bool(jnp.all(jnp.isfinite(hidden)))
    print("KERNEL_OK")
</pallas_src>

<mosaic_0001>
module attributes {stable_mosaic.version = 11 : i64} {
  func.func @_fused_lm_kernel(%arg0: i32, %arg1: memref<2x8x16xf32, #tpu.memory_space<vmem>>, %arg2: memref<16x16xf32, #tpu.memory_space<vmem>>, %arg3: memref<1x16xf32, #tpu.memory_space<vmem>>, %arg4: memref<16x96xf32, #tpu.memory_space<vmem>>, %arg5: memref<32x96xf32, #tpu.memory_space<vmem>>, %arg6: memref<1x96xf32, #tpu.memory_space<vmem>>, %arg7: memref<1x96xf32, #tpu.memory_space<vmem>>, %arg8: memref<32x96xf32, #tpu.memory_space<vmem>>, %arg9: memref<32x96xf32, #tpu.memory_space<vmem>>, %arg10: memref<1x96xf32, #tpu.memory_space<vmem>>, %arg11: memref<1x96xf32, #tpu.memory_space<vmem>>, %arg12: memref<32x32xf32, #tpu.memory_space<vmem>>, %arg13: memref<1x32xf32, #tpu.memory_space<vmem>>, %arg14: memref<2x8x32xf32, #tpu.memory_space<vmem>>, %arg15: memref<2x2x32xf32, #tpu.memory_space<vmem>>, %arg16: memref<8x32xf32, #tpu.memory_space<vmem>>) attributes {dimension_semantics = [#tpu.dimension_semantics<arbitrary>], iteration_bounds = array<i64: 1>, scalar_prefetch = 0 : i64, scratch_operands = 1 : i64, tpu.core_type = #tpu.core_type<tc>, window_params = [{pipeline_mode = #tpu.pipeline_mode<synchronous>, transform_indices = @transform_0, window_bounds = array<i64: 2, 8, 16>}, {pipeline_mode = #tpu.pipeline_mode<synchronous>, transform_indices = @transform_1, window_bounds = array<i64: 16, 16>}, {pipeline_mode = #tpu.pipeline_mode<synchronous>, transform_indices = @transform_2, window_bounds = array<i64: 1, 16>}, {pipeline_mode = #tpu.pipeline_mode<synchronous>, transform_indices = @transform_3, window_bounds = array<i64: 16, 96>}, {pipeline_mode = #tpu.pipeline_mode<synchronous>, transform_indices = @transform_4, window_bounds = array<i64: 32, 96>}, {pipeline_mode = #tpu.pipeline_mode<synchronous>, transform_indices = @transform_5, window_bounds = array<i64: 1, 96>}, {pipeline_mode = #tpu.pipeline_mode<synchronous>, transform_indices = @transform_6, window_bounds = array<i64: 1, 96>}, {pipeline_mode = #tpu.pipeline_mode<synchronous>, transform_indices = @transform_7, window_bounds = array<i64: 32, 96>}, {pipeline_mode = #tpu.pipeline_mode<synchronous>, transform_indices = @transform_8, window_bounds = array<i64: 32, 96>}, {pipeline_mode = #tpu.pipeline_mode<synchronous>, transform_indices = @transform_9, window_bounds = array<i64: 1, 96>}, {pipeline_mode = #tpu.pipeline_mode<synchronous>, transform_indices = @transform_10, window_bounds = array<i64: 1, 96>}, {pipeline_mode = #tpu.pipeline_mode<synchronous>, transform_indices = @transform_11, window_bounds = array<i64: 32, 32>}, {pipeline_mode = #tpu.pipeline_mode<synchronous>, transform_indices = @transform_12, window_bounds = array<i64: 1, 32>}, {pipeline_mode = #tpu.pipeline_mode<synchronous>, transform_indices = @transform_13, window_bounds = array<i64: 2, 8, 32>}, {pipeline_mode = #tpu.pipeline_mode<synchronous>, transform_indices = @transform_14, window_bounds = array<i64: 2, 2, 32>}]} {
    %c0 = arith.constant 0 : index
    %c0_0 = arith.constant 0 : index
    %0 = vector.load %arg2[%c0, %c0_0] : memref<16x16xf32, #tpu.memory_space<vmem>>, vector<16x16xf32>
    %c0_1 = arith.constant 0 : index
    %c0_2 = arith.constant 0 : index
    %1 = vector.load %arg3[%c0_1, %c0_2] : memref<1x16xf32, #tpu.memory_space<vmem>>, vector<1x16xf32>
    %c0_3 = arith.constant 0 : index
    %c0_4 = arith.constant 0 : index
    %2 = vector.load %arg4[%c0_3, %c0_4] : memref<16x96xf32, #tpu.memory_space<vmem>>, vector<16x96xf32>
    %c0_5 = arith.constant 0 : index
    %c0_6 = arith.constant 0 : index
    %3 = vector.load %arg5[%c0_5, %c0_6] : memref<32x96xf32, #tpu.memory_space<vmem>>, vector<32x96xf32>
    %c0_7 = arith.constant 0 : index
    %c0_8 = arith.constant 0 : index
    %4 = vector.load %arg6[%c0_7, %c0_8] : memref<1x96xf32, #tpu.memory_space<vmem>>, vector<1x96xf32>
    %c0_9 = arith.constant 0 : index
    %c0_10 = arith.constant 0 : index
    %5 = vector.load %arg7[%c0_9, %c0_10] : memref<1x96xf32, #tpu.memory_space<vmem>>, vector<1x96xf32>
    %c0_11 = arith.constant 0 : index
    %c0_12 = arith.constant 0 : index
    %6 = vector.load %arg8[%c0_11, %c0_12] : memref<32x96xf32, #tpu.memory_space<vmem>>, vector<32x96xf32>
    %c0_13 = arith.constant 0 : index
    %c0_14 = arith.constant 0 : index
    %7 = vector.load %arg9[%c0_13, %c0_14] : memref<32x96xf32, #tpu.memory_space<vmem>>, vector<32x96xf32>
    %c0_15 = arith.constant 0 : index
    %c0_16 = arith.constant 0 : index
    %8 = vector.load %arg10[%c0_15, %c0_16] : memref<1x96xf32, #tpu.memory_space<vmem>>, vector<1x96xf32>
    %c0_17 = arith.constant 0 : index
    %c0_18 = arith.constant 0 : index
    %9 = vector.load %arg11[%c0_17, %c0_18] : memref<1x96xf32, #tpu.memory_space<vmem>>, vector<1x96xf32>
    %c0_19 = arith.constant 0 : index
    %c0_20 = arith.constant 0 : index
    %10 = vector.load %arg12[%c0_19, %c0_20] : memref<32x32xf32, #tpu.memory_space<vmem>>, vector<32x32xf32>
    %c0_21 = arith.constant 0 : index
    %c0_22 = arith.constant 0 : index
    %11 = vector.load %arg13[%c0_21, %c0_22] : memref<1x32xf32, #tpu.memory_space<vmem>>, vector<1x32xf32>
    %c0_23 = arith.constant 0 : index
    %c0_24 = arith.constant 0 : index
    %c0_25 = arith.constant 0 : index
    %12 = vector.load %arg1[%c0_23, %c0_24, %c0_25] : memref<2x8x16xf32, #tpu.memory_space<vmem>>, vector<1x8x16xf32>
    %13 = vector.shape_cast %12 : vector<1x8x16xf32> to vector<8x16xf32>
    %cst = arith.constant dense<0.000000e+00> : vector<8x16xf32>
    %14 = tpu.matmul %13, %0, %cst {dimension_numbers = #tpu.dot_dimension_numbers<[1], [0], [0], [1], [0, 0, 1, 1], [], []>} : vector<8x16xf32>, vector<16x16xf32>, vector<8x16xf32> -> vector<8x16xf32>
    %15 = vector.broadcast %1 : vector<1x16xf32> to vector<8x16xf32>
    %16 = arith.addf %14, %15 : vector<8x16xf32>
    %cst_26 = arith.constant dense<0.000000e+00> : vector<8x8xf32>
    %17 = tpu.matmul %16, %13, %cst_26 {dimension_numbers = #tpu.dot_dimension_numbers<[1], [1], [0], [0], [0, 0, 1, 0], [], []>} : vector<8x16xf32>, vector<8x16xf32>, vector<8x8xf32> -> vector<8x8xf32>
    %cst_27 = arith.constant 0.353553385 : f32
    %18 = vector.broadcast %cst_27 : f32 to vector<8x8xf32>
    %19 = arith.mulf %17, %18 : vector<8x8xf32>
    %20 = tpu.iota {dimensions = array<i32: 0>} : vector<8x8xi32>
    %21 = tpu.iota {dimensions = array<i32: 1>} : vector<8x8xi32>
    %22 = arith.cmpi sgt, %21, %20 : vector<8x8xi32>
    %cst_28 = arith.constant -1.000000e+30 : f32
    %23 = vector.broadcast %cst_28 : f32 to vector<8x8xf32>
    %24 = arith.select %22, %23, %19 : vector<8x8xi1>, vector<8x8xf32>
    %cst_29 = arith.constant dense<0xFF800000> : vector<8xf32>
    %25 = vector.multi_reduction <maximumf>, %24, %cst_29 [0] : vector<8x8xf32> to vector<8xf32>
    %26 = vector.shape_cast %25 : vector<8xf32> to vector<1x8xf32>
    %27 = vector.broadcast %26 : vector<1x8xf32> to vector<8x8xf32>
    %28 = arith.subf %24, %27 : vector<8x8xf32>
    %29 = math.exp %28 : vector<8x8xf32>
    %cst_30 = arith.constant dense<0.000000e+00> : vector<8xf32>
    %30 = vector.multi_reduction <add>, %29, %cst_30 [0] : vector<8x8xf32> to vector<8xf32>
    %31 = vector.shape_cast %30 : vector<8xf32> to vector<1x8xf32>
    %32 = vector.broadcast %31 : vector<1x8xf32> to vector<8x8xf32>
    %33 = arith.divf %29, %32 : vector<8x8xf32>
    %cst_31 = arith.constant dense<0.000000e+00> : vector<8x16xf32>
    %34 = tpu.matmul %33, %13, %cst_31 {dimension_numbers = #tpu.dot_dimension_numbers<[1], [0], [0], [1], [0, 0, 1, 1], [], []>} : vector<8x8xf32>, vector<8x16xf32>, vector<8x16xf32> -> vector<8x16xf32>
    %cst_32 = arith.constant dense<0.000000e+00> : vector<8x96xf32>
    %35 = tpu.matmul %34, %2, %cst_32 {dimension_numbers = #tpu.dot_dimension_numbers<[1], [0], [0], [1], [0, 0, 1, 1], [], []>} : vector<8x16xf32>, vector<16x96xf32>, vector<8x96xf32> -> vector<8x96xf32>
    %36 = vector.broadcast %4 : vector<1x96xf32> to vector<8x96xf32>
    %37 = arith.addf %35, %36 : vector<8x96xf32>
    %cst_33 = arith.constant 0.000000e+00 : f32
    %38 = vector.broadcast %cst_33 : f32 to vector<1x32xf32>
    %39 = vector.extract_strided_slice %37 {offsets = [0, 0], sizes = [1, 96], strides = [1, 1]} : vector<8x96xf32> to vector<1x96xf32>
    %cst_34 = arith.constant dense<0.000000e+00> : vector<1x96xf32>
    %40 = tpu.matmul %38, %3, %cst_34 {dimension_numbers = #tpu.dot_dimension_numbers<[1], [0], [0], [1], [0, 0, 1, 1], [], []>} : vector<1x32xf32>, vector<32x96xf32>, vector<1x96xf32> -> vector<1x96xf32>
    %41 = arith.addf %40, %5 : vector<1x96xf32>
    %42 = vector.extract_strided_slice %39 {offsets = [0, 0], sizes = [1, 32], strides = [1, 1]} : vector<1x96xf32> to vector<1x32xf32>
    %43 = vector.extract_strided_slice %41 {offsets = [0, 0], sizes = [1, 32], strides = [1, 1]} : vector<1x96xf32> to vector<1x32xf32>
    %44 = arith.addf %42, %43 : vector<1x32xf32>
    %45 = arith.negf %44 : vector<1x32xf32>
    %46 = math.exp %45 : vector<1x32xf32>
    %cst_35 = arith.constant 1.000000e+00 : f32
    %47 = vector.broadcast %cst_35 : f32 to vector<1x32xf32>
    %48 = arith.addf %47, %46 : vector<1x32xf32>
    %49 = arith.divf %47, %48 : vector<1x32xf32>
    %50 = vector.extract_strided_slice %39 {offsets = [0, 32], sizes = [1, 32], strides = [1, 1]} : vector<1x96xf32> to vector<1x32xf32>
    %51 = vector.extract_strided_slice %41 {offsets = [0, 32], sizes = [1, 32], strides = [1, 1]} : vector<1x96xf32> to vector<1x32xf32>
    %52 = arith.addf %50, %51 : vector<1x32xf32>
    %53 = arith.negf %52 : vector<1x32xf32>
    %54 = math.exp %53 : vector<1x32xf32>
    %cst_36 = arith.constant 1.000000e+00 : f32
    %55 = vector.broadcast %cst_36 : f32 to vector<1x32xf32>
    %56 = arith.addf %55, %54 : vector<1x32xf32>
    %57 = arith.divf %55, %56 : vector<1x32xf32>
    %58 = vector.extract_strided_slice %39 {offsets = [0, 64], sizes = [1, 32], strides = [1, 1]} : vector<1x96xf32> to vector<1x32xf32>
    %59 = vector.extract_strided_slice %41 {offsets = [0, 64], sizes = [1, 32], strides = [1, 1]} : vector<1x96xf32> to vector<1x32xf32>
    %60 = arith.mulf %49, %59 : vector<1x32xf32>
    %61 = arith.addf %58, %60 : vector<1x32xf32>
    %62 = math.tanh %61 : vector<1x32xf32>
    %cst_37 = arith.constant 1.000000e+00 : f32
    %63 = vector.broadcast %cst_37 : f32 to vector<1x32xf32>
    %64 = arith.subf %63, %57 : vector<1x32xf32>
    %65 = arith.mulf %64, %62 : vector<1x32xf32>
    %66 = arith.mulf %57, %38 : vector<1x32xf32>
    %67 = arith.addf %65, %66 : vector<1x32xf32>
    %c0_38 = arith.constant 0 : index
    %c0_39 = arith.constant 0 : index
    %68 = vector.load %arg16[%c0_38, %c0_39] : memref<8x32xf32, #tpu.memory_space<vmem>>, vector<1x32xf32>
    tpu.vector_store %arg16[%c0_38, %c0_39], %67 {strides = array<i32>} : memref<8x32xf32, #tpu.memory_space<vmem>>, vector<1x32xf32>,
    %69 = vector.extract_strided_slice %37 {offsets = [1, 0], sizes = [1, 96], strides = [1, 1]} : vector<8x96xf32> to vector<1x96xf32>
    %cst_40 = arith.constant dense<0.000000e+00> : vector<1x96xf32>
    %70 = tpu.matmul %67, %3, %cst_40 {dimension_numbers = #tpu.dot_dimension_numbers<[1], [0], [0], [1], [0, 0, 1, 1], [], []>} : vector<1x32xf32>, vector<32x96xf32>, vector<1x96xf32> -> vector<1x96xf32>
    %71 = arith.addf %70, %5 : vector<1x96xf32>
    %72 = vector.extract_strided_slice %69 {offsets = [0, 0], sizes = [1, 32], strides = [1, 1]} : vector<1x96xf32> to vector<1x32xf32>
    %73 = vector.extract_strided_slice %71 {offsets = [0, 0], sizes = [1, 32], strides = [1, 1]} : vector<1x96xf32> to vector<1x32xf32>
    %74 = arith.addf %72, %73 : vector<1x32xf32>
    %75 = arith.negf %74 : vector<1x32xf32>
    %76 = math.exp %75 : vector<1x32xf32>
    %cst_41 = arith.constant 1.000000e+00 : f32
    %77 = vector.broadcast %cst_41 : f32 to vector<1x32xf32>
    %78 = arith.addf %77, %76 : vector<1x32xf32>
    %79 = arith.divf %77, %78 : vector<1x32xf32>
    %80 = vector.extract_strided_slice %69 {offsets = [0, 32], sizes = [1, 32], strides = [1, 1]} : vector<1x96xf32> to vector<1x32xf32>
    %81 = vector.extract_strided_slice %71 {offsets = [0, 32], sizes = [1, 32], strides = [1, 1]} : vector<1x96xf32> to vector<1x32xf32>
    %82 = arith.addf %80, %81 : vector<1x32xf32>
    %83 = arith.negf %82 : vector<1x32xf32>
    %84 = math.exp %83 : vector<1x32xf32>
    %cst_42 = arith.constant 1.000000e+00 : f32
    %85 = vector.broadcast %cst_42 : f32 to vector<1x32xf32>
    %86 = arith.addf %85, %84 : vector<1x32xf32>
    %87 = arith.divf %85, %86 : vector<1x32xf32>
    %88 = vector.extract_strided_slice %69 {offsets = [0, 64], sizes = [1, 32], strides = [1, 1]} : vector<1x96xf32> to vector<1x32xf32>
    %89 = vector.extract_strided_slice %71 {offsets = [0, 64], sizes = [1, 32], strides = [1, 1]} : vector<1x96xf32> to vector<1x32xf32>
    %90 = arith.mulf %79, %89 : vector<1x32xf32>
    %91 = arith.addf %88, %90 : vector<1x32xf32>
    %92 = math.tanh %91 : vector<1x32xf32>
    %cst_43 = arith.constant 1.000000e+00 : f32
    %93 = vector.broadcast %cst_43 : f32 to vector<1x32xf32>
    %94 = arith.subf %93, %87 : vector<1x32xf32>
    %95 = arith.mulf %94, %92 : vector<1x32xf32>
    %96 = arith.mulf %87, %67 : vector<1x32xf32>
    %97 = arith.addf %95, %96 : vector<1x32xf32>
    %c1 = arith.constant 1 : index
    %c0_44 = arith.constant 0 : index
    %98 = vector.load %arg16[%c1, %c0_44] : memref<8x32xf32, #tpu.memory_space<vmem>>, vector<1x32xf32>
    tpu.vector_store %arg16[%c1, %c0_44], %97 {strides = array<i32>} : memref<8x32xf32, #tpu.memory_space<vmem>>, vector<1x32xf32>,
    %99 = vector.extract_strided_slice %37 {offsets = [2, 0], sizes = [1, 96], strides = [1, 1]} : vector<8x96xf32> to vector<1x96xf32>
    %cst_45 = arith.constant dense<0.000000e+00> : vector<1x96xf32>
    %100 = tpu.matmul %97, %3, %cst_45 {dimension_numbers = #tpu.dot_dimension_numbers<[1], [0], [0], [1], [0, 0, 1, 1], [], []>} : vector<1x32xf32>, vector<32x96xf32>, vector<1x96xf32> -> vector<1x96xf32>
    %101 = arith.addf %100, %5 : vector<1x96xf32>
    %102 = vector.extract_strided_slice %99 {offsets = [0, 0], sizes = [1, 32], strides = [1, 1]} : vector<1x96xf32> to vector<1x32xf32>
    %103 = vector.extract_strided_slice %101 {offsets = [0, 0], sizes = [1, 32], strides = [1, 1]} : vector<1x96xf32> to vector<1x32xf32>
    %104 = arith.addf %102, %103 : vector<1x32xf32>
    %105 = arith.negf %104 : vector<1x32xf32>
    %106 = math.exp %105 : vector<1x32xf32>
    %cst_46 = arith.constant 1.000000e+00 : f32
    %107 = vector.broadcast %cst_46 : f32 to vector<1x32xf32>
    %108 = arith.addf %107, %106 : vector<1x32xf32>
    %109 = arith.divf %107, %108 : vector<1x32xf32>
    %110 = vector.extract_strided_slice %99 {offsets = [0, 32], sizes = [1, 32], strides = [1, 1]} : vector<1x96xf32> to vector<1x32xf32>
    %111 = vector.extract_strided_slice %101 {offsets = [0, 32], sizes = [1, 32], strides = [1, 1]} : vector<1x96xf32> to vector<1x32xf32>
    %112 = arith.addf %110, %111 : vector<1x32xf32>
    %113 = arith.negf %112 : vector<1x32xf32>
    %114 = math.exp %113 : vector<1x32xf32>
    %cst_47 = arith.constant 1.000000e+00 : f32
    %115 = vector.broadcast %cst_47 : f32 to vector<1x32xf32>
    %116 = arith.addf %115, %114 : vector<1x32xf32>
    %117 = arith.divf %115, %116 : vector<1x32xf32>
    %118 = vector.extract_strided_slice %99 {offsets = [0, 64], sizes = [1, 32], strides = [1, 1]} : vector<1x96xf32> to vector<1x32xf32>
    %119 = vector.extract_strided_slice %101 {offsets = [0, 64], sizes = [1, 32], strides = [1, 1]} : vector<1x96xf32> to vector<1x32xf32>
    %120 = arith.mulf %109, %119 : vector<1x32xf32>
    %121 = arith.addf %118, %120 : vector<1x32xf32>
    %122 = math.tanh %121 : vector<1x32xf32>
    %cst_48 = arith.constant 1.000000e+00 : f32
    %123 = vector.broadcast %cst_48 : f32 to vector<1x32xf32>
    %124 = arith.subf %123, %117 : vector<1x32xf32>
    %125 = arith.mulf %124, %122 : vector<1x32xf32>
    %126 = arith.mulf %117, %97 : vector<1x32xf32>
    %127 = arith.addf %125, %126 : vector<1x32xf32>
    %c2 = arith.constant 2 : index
    %c0_49 = arith.constant 0 : index
    %128 = vector.load %arg16[%c2, %c0_49] : memref<8x32xf32, #tpu.memory_space<vmem>>, vector<1x32xf32>
    tpu.vector_store %arg16[%c2, %c0_49], %127 {strides = array<i32>} : memref<8x32xf32, #tpu.memory_space<vmem>>, vector<1x32xf32>,
    %129 = vector.extract_strided_slice %37 {offsets = [3, 0], sizes = [1, 96], strides = [1, 1]} : vector<8x96xf32> to vector<1x96xf32>
    %cst_50 = arith.constant dense<0.000000e+00> : vector<1x96xf32>
    %130 = tpu.matmul %127, %3, %cst_50 {dimension_numbers = #tpu.dot_dimension_numbers<[1], [0], [0], [1], [0, 0, 1, 1], [], []>} : vector<1x32xf32>, vector<32x96xf32>, vector<1x96xf32> -> vector<1x96xf32>
    %131 = arith.addf %130, %5 : vector<1x96xf32>
    %132 = vector.extract_strided_slice %129 {offsets = [0, 0], sizes = [1, 32], strides = [1, 1]} : vector<1x96xf32> to vector<1x32xf32>
    %133 = vector.extract_strided_slice %131 {offsets = [0, 0], sizes = [1, 32], strides = [1, 1]} : vector<1x96xf32> to vector<1x32xf32>
    %134 = arith.addf %132, %133 : vector<1x32xf32>
    %135 = arith.negf %134 : vector<1x32xf32>
    %136 = math.exp %135 : vector<1x32xf32>
    %cst_51 = arith.constant 1.000000e+00 : f32
    %137 = vector.broadcast %cst_51 : f32 to vector<1x32xf32>
    %138 = arith.addf %137, %136 : vector<1x32xf32>
    %139 = arith.divf %137, %138 : vector<1x32xf32>
    %140 = vector.extract_strided_slice %129 {offsets = [0, 32], sizes = [1, 32], strides = [1, 1]} : vector<1x96xf32> to vector<1x32xf32>
    %141 = vector.extract_strided_slice %131 {offsets = [0, 32], sizes = [1, 32], strides = [1, 1]} : vector<1x96xf32> to vector<1x32xf32>
    %142 = arith.addf %140, %141 : vector<1x32xf32>
    %143 = arith.negf %142 : vector<1x32xf32>
    %144 = math.exp %143 : vector<1x32xf32>
    %cst_52 = arith.constant 1.000000e+00 : f32
    %145 = vector.broadcast %cst_52 : f32 to vector<1x32xf32>
    %146 = arith.addf %145, %144 : vector<1x32xf32>
    %147 = arith.divf %145, %146 : vector<1x32xf32>
    %148 = vector.extract_strided_slice %129 {offsets = [0, 64], sizes = [1, 32], strides = [1, 1]} : vector<1x96xf32> to vector<1x32xf32>
    %149 = vector.extract_strided_slice %131 {offsets = [0, 64], sizes = [1, 32], strides = [1, 1]} : vector<1x96xf32> to vector<1x32xf32>
    %150 = arith.mulf %139, %149 : vector<1x32xf32>
    %151 = arith.addf %148, %150 : vector<1x32xf32>
    %152 = math.tanh %151 : vector<1x32xf32>
    %cst_53 = arith.constant 1.000000e+00 : f32
    %153 = vector.broadcast %cst_53 : f32 to vector<1x32xf32>
    %154 = arith.subf %153, %147 : vector<1x32xf32>
    %155 = arith.mulf %154, %152 : vector<1x32xf32>
    %156 = arith.mulf %147, %127 : vector<1x32xf32>
    %157 = arith.addf %155, %156 : vector<1x32xf32>
    %c3 = arith.constant 3 : index
    %c0_54 = arith.constant 0 : index
    %158 = vector.load %arg16[%c3, %c0_54] : memref<8x32xf32, #tpu.memory_space<vmem>>, vector<1x32xf32>
    tpu.vector_store %arg16[%c3, %c0_54], %157 {strides = array<i32>} : memref<8x32xf32, #tpu.memory_space<vmem>>, vector<1x32xf32>,
    %159 = vector.extract_strided_slice %37 {offsets = [4, 0], sizes = [1, 96], strides = [1, 1]} : vector<8x96xf32> to vector<1x96xf32>
    %cst_55 = arith.constant dense<0.000000e+00> : vector<1x96xf32>
    %160 = tpu.matmul %157, %3, %cst_55 {dimension_numbers = #tpu.dot_dimension_numbers<[1], [0], [0], [1], [0, 0, 1, 1], [], []>} : vector<1x32xf32>, vector<32x96xf32>, vector<1x96xf32> -> vector<1x96xf32>
    %161 = arith.addf %160, %5 : vector<1x96xf32>
    %162 = vector.extract_strided_slice %159 {offsets = [0, 0], sizes = [1, 32], strides = [1, 1]} : vector<1x96xf32> to vector<1x32xf32>
    %163 = vector.extract_strided_slice %161 {offsets = [0, 0], sizes = [1, 32], strides = [1, 1]} : vector<1x96xf32> to vector<1x32xf32>
    %164 = arith.addf %162, %163 : vector<1x32xf32>
    %165 = arith.negf %164 : vector<1x32xf32>
    %166 = math.exp %165 : vector<1x32xf32>
    %cst_56 = arith.constant 1.000000e+00 : f32
    %167 = vector.broadcast %cst_56 : f32 to vector<1x32xf32>
    %168 = arith.addf %167, %166 : vector<1x32xf32>
    %169 = arith.divf %167, %168 : vector<1x32xf32>
    %170 = vector.extract_strided_slice %159 {offsets = [0, 32], sizes = [1, 32], strides = [1, 1]} : vector<1x96xf32> to vector<1x32xf32>
    %171 = vector.extract_strided_slice %161 {offsets = [0, 32], sizes = [1, 32], strides = [1, 1]} : vector<1x96xf32> to vector<1x32xf32>
    %172 = arith.addf %170, %171 : vector<1x32xf32>
    %173 = arith.negf %172 : vector<1x32xf32>
    %174 = math.exp %173 : vector<1x32xf32>
    %cst_57 = arith.constant 1.000000e+00 : f32
    %175 = vector.broadcast %cst_57 : f32 to vector<1x32xf32>
    %176 = arith.addf %175, %174 : vector<1x32xf32>
    %177 = arith.divf %175, %176 : vector<1x32xf32>
    %178 = vector.extract_strided_slice %159 {offsets = [0, 64], sizes = [1, 32], strides = [1, 1]} : vector<1x96xf32> to vector<1x32xf32>
    %179 = vector.extract_strided_slice %161 {offsets = [0, 64], sizes = [1, 32], strides = [1, 1]} : vector<1x96xf32> to vector<1x32xf32>
    %180 = arith.mulf %169, %179 : vector<1x32xf32>
    %181 = arith.addf %178, %180 : vector<1x32xf32>
    %182 = math.tanh %181 : vector<1x32xf32>
    %cst_58 = arith.constant 1.000000e+00 : f32
    %183 = vector.broadcast %cst_58 : f32 to vector<1x32xf32>
    %184 = arith.subf %183, %177 : vector<1x32xf32>
    %185 = arith.mulf %184, %182 : vector<1x32xf32>
    %186 = arith.mulf %177, %157 : vector<1x32xf32>
    %187 = arith.addf %185, %186 : vector<1x32xf32>
    %c4 = arith.constant 4 : index
    %c0_59 = arith.constant 0 : index
    %188 = vector.load %arg16[%c4, %c0_59] : memref<8x32xf32, #tpu.memory_space<vmem>>, vector<1x32xf32>
    tpu.vector_store %arg16[%c4, %c0_59], %187 {strides = array<i32>} : memref<8x32xf32, #tpu.memory_space<vmem>>, vector<1x32xf32>,
    %189 = vector.extract_strided_slice %37 {offsets = [5, 0], sizes = [1, 96], strides = [1, 1]} : vector<8x96xf32> to vector<1x96xf32>
    %cst_60 = arith.constant dense<0.000000e+00> : vector<1x96xf32>
    %190 = tpu.matmul %187, %3, %cst_60 {dimension_numbers = #tpu.dot_dimension_numbers<[1], [0], [0], [1], [0, 0, 1, 1], [], []>} : vector<1x32xf32>, vector<32x96xf32>, vector<1x96xf32> -> vector<1x96xf32>
    %191 = arith.addf %190, %5 : vector<1x96xf32>
    %192 = vector.extract_strided_slice %189 {offsets = [0, 0], sizes = [1, 32], strides = [1, 1]} : vector<1x96xf32> to vector<1x32xf32>
    %193 = vector.extract_strided_slice %191 {offsets = [0, 0], sizes = [1, 32], strides = [1, 1]} : vector<1x96xf32> to vector<1x32xf32>
    %194 = arith.addf %192, %193 : vector<1x32xf32>
    %195 = arith.negf %194 : vector<1x32xf32>
    %196 = math.exp %195 : vector<1x32xf32>
    %cst_61 = arith.constant 1.000000e+00 : f32
    %197 = vector.broadcast %cst_61 : f32 to vector<1x32xf32>
    %198 = arith.addf %197, %196 : vector<1x32xf32>
    %199 = arith.divf %197, %198 : vector<1x32xf32>
    %200 = vector.extract_strided_slice %189 {offsets = [0, 32], sizes = [1, 32], strides = [1, 1]} : vector<1x96xf32> to vector<1x32xf32>
    %201 = vector.extract_strided_slice %191 {offsets = [0, 32], sizes = [1, 32], strides = [1, 1]} : vector<1x96xf32> to vector<1x32xf32>
    %202 = arith.addf %200, %201 : vector<1x32xf32>
    %203 = arith.negf %202 : vector<1x32xf32>
    %204 = math.exp %203 : vector<1x32xf32>
    %cst_62 = arith.constant 1.000000e+00 : f32
    %205 = vector.broadcast %cst_62 : f32 to vector<1x32xf32>
    %206 = arith.addf %205, %204 : vector<1x32xf32>
    %207 = arith.divf %205, %206 : vector<1x32xf32>
    %208 = vector.extract_strided_slice %189 {offsets = [0, 64], sizes = [1, 32], strides = [1, 1]} : vector<1x96xf32> to vector<1x32xf32>
    %209 = vector.extract_strided_slice %191 {offsets = [0, 64], sizes = [1, 32], strides = [1, 1]} : vector<1x96xf32> to vector<1x32xf32>
    %210 = arith.mulf %199, %209 : vector<1x32xf32>
    %211 = arith.addf %208, %210 : vector<1x32xf32>
    %212 = math.tanh %211 : vector<1x32xf32>
    %cst_63 = arith.constant 1.000000e+00 : f32
    %213 = vector.broadcast %cst_63 : f32 to vector<1x32xf32>
    %214 = arith.subf %213, %207 : vector<1x32xf32>
    %215 = arith.mulf %214, %212 : vector<1x32xf32>
    %216 = arith.mulf %207, %187 : vector<1x32xf32>
    %217 = arith.addf %215, %216 : vector<1x32xf32>
    %c5 = arith.constant 5 : index
    %c0_64 = arith.constant 0 : index
    %218 = vector.load %arg16[%c5, %c0_64] : memref<8x32xf32, #tpu.memory_space<vmem>>, vector<1x32xf32>
    tpu.vector_store %arg16[%c5, %c0_64], %217 {strides = array<i32>} : memref<8x32xf32, #tpu.memory_space<vmem>>, vector<1x32xf32>,
    %219 = vector.extract_strided_slice %37 {offsets = [6, 0], sizes = [1, 96], strides = [1, 1]} : vector<8x96xf32> to vector<1x96xf32>
    %cst_65 = arith.constant dense<0.000000e+00> : vector<1x96xf32>
    %220 = tpu.matmul %217, %3, %cst_65 {dimension_numbers = #tpu.dot_dimension_numbers<[1], [0], [0], [1], [0, 0, 1, 1], [], []>} : vector<1x32xf32>, vector<32x96xf32>, vector<1x96xf32> -> vector<1x96xf32>
    %221 = arith.addf %220, %5 : vector<1x96xf32>
    %222 = vector.extract_strided_slice %219 {offsets = [0, 0], sizes = [1, 32], strides = [1, 1]} : vector<1x96xf32> to vector<1x32xf32>
    %223 = vector.extract_strided_slice %221 {offsets = [0, 0], sizes = [1, 32], strides = [1, 1]} : vector<1x96xf32> to vector<1x32xf32>
    %224 = arith.addf %222, %223 : vector<1x32xf32>
    %225 = arith.negf %224 : vector<1x32xf32>
    %226 = math.exp %225 : vector<1x32xf32>
    %cst_66 = arith.constant 1.000000e+00 : f32
    %227 = vector.broadcast %cst_66 : f32 to vector<1x32xf32>
    %228 = arith.addf %227, %226 : vector<1x32xf32>
    %229 = arith.divf %227, %228 : vector<1x32xf32>
    %230 = vector.extract_strided_slice %219 {offsets = [0, 32], sizes = [1, 32], strides = [1, 1]} : vector<1x96xf32> to vector<1x32xf32>
    %231 = vector.extract_strided_slice %221 {offsets = [0, 32], sizes = [1, 32], strides = [1, 1]} : vector<1x96xf32> to vector<1x32xf32>
    %232 = arith.addf %230, %231 : vector<1x32xf32>
    %233 = arith.negf %232 : vector<1x32xf32>
    %234 = math.exp %233 : vector<1x32xf32>
    %cst_67 = arith.constant 1.000000e+00 : f32
    %235 = vector.broadcast %cst_67 : f32 to vector<1x32xf32>
    %236 = arith.addf %235, %234 : vector<1x32xf32>
    %237 = arith.divf %235, %236 : vector<1x32xf32>
    %238 = vector.extract_strided_slice %219 {offsets = [0, 64], sizes = [1, 32], strides = [1, 1]} : vector<1x96xf32> to vector<1x32xf32>
    %239 = vector.extract_strided_slice %221 {offsets = [0, 64], sizes = [1, 32], strides = [1, 1]} : vector<1x96xf32> to vector<1x32xf32>
    %240 = arith.mulf %229, %239 : vector<1x32xf32>
    %241 = arith.addf %238, %240 : vector<1x32xf32>
    %242 = math.tanh %241 : vector<1x32xf32>
    %cst_68 = arith.constant 1.000000e+00 : f32
    %243 = vector.broadcast %cst_68 : f32 to vector<1x32xf32>
    %244 = arith.subf %243, %237 : vector<1x32xf32>
    %245 = arith.mulf %244, %242 : vector<1x32xf32>
    %246 = arith.mulf %237, %217 : vector<1x32xf32>
    %247 = arith.addf %245, %246 : vector<1x32xf32>
    %c6 = arith.constant 6 : index
    %c0_69 = arith.constant 0 : index
    %248 = vector.load %arg16[%c6, %c0_69] : memref<8x32xf32, #tpu.memory_space<vmem>>, vector<1x32xf32>
    tpu.vector_store %arg16[%c6, %c0_69], %247 {strides = array<i32>} : memref<8x32xf32, #tpu.memory_space<vmem>>, vector<1x32xf32>,
    %249 = vector.extract_strided_slice %37 {offsets = [7, 0], sizes = [1, 96], strides = [1, 1]} : vector<8x96xf32> to vector<1x96xf32>
    %cst_70 = arith.constant dense<0.000000e+00> : vector<1x96xf32>
    %250 = tpu.matmul %247, %3, %cst_70 {dimension_numbers = #tpu.dot_dimension_numbers<[1], [0], [0], [1], [0, 0, 1, 1], [], []>} : vector<1x32xf32>, vector<32x96xf32>, vector<1x96xf32> -> vector<1x96xf32>
    %251 = arith.addf %250, %5 : vector<1x96xf32>
    %252 = vector.extract_strided_slice %249 {offsets = [0, 0], sizes = [1, 32], strides = [1, 1]} : vector<1x96xf32> to vector<1x32xf32>
    %253 = vector.extract_strided_slice %251 {offsets = [0, 0], sizes = [1, 32], strides = [1, 1]} : vector<1x96xf32> to vector<1x32xf32>
    %254 = arith.addf %252, %253 : vector<1x32xf32>
    %255 = arith.negf %254 : vector<1x32xf32>
    %256 = math.exp %255 : vector<1x32xf32>
    %cst_71 = arith.constant 1.000000e+00 : f32
    %257 = vector.broadcast %cst_71 : f32 to vector<1x32xf32>
    %258 = arith.addf %257, %256 : vector<1x32xf32>
    %259 = arith.divf %257, %258 : vector<1x32xf32>
    %260 = vector.extract_strided_slice %249 {offsets = [0, 32], sizes = [1, 32], strides = [1, 1]} : vector<1x96xf32> to vector<1x32xf32>
    %261 = vector.extract_strided_slice %251 {offsets = [0, 32], sizes = [1, 32], strides = [1, 1]} : vector<1x96xf32> to vector<1x32xf32>
    %262 = arith.addf %260, %261 : vector<1x32xf32>
    %263 = arith.negf %262 : vector<1x32xf32>
    %264 = math.exp %263 : vector<1x32xf32>
    %cst_72 = arith.constant 1.000000e+00 : f32
    %265 = vector.broadcast %cst_72 : f32 to vector<1x32xf32>
    %266 = arith.addf %265, %264 : vector<1x32xf32>
    %267 = arith.divf %265, %266 : vector<1x32xf32>
    %268 = vector.extract_strided_slice %249 {offsets = [0, 64], sizes = [1, 32], strides = [1, 1]} : vector<1x96xf32> to vector<1x32xf32>
    %269 = vector.extract_strided_slice %251 {offsets = [0, 64], sizes = [1, 32], strides = [1, 1]} : vector<1x96xf32> to vector<1x32xf32>
    %270 = arith.mulf %259, %269 : vector<1x32xf32>
    %271 = arith.addf %268, %270 : vector<1x32xf32>
    %272 = math.tanh %271 : vector<1x32xf32>
    %cst_73 = arith.constant 1.000000e+00 : f32
    %273 = vector.broadcast %cst_73 : f32 to vector<1x32xf32>
    %274 = arith.subf %273, %267 : vector<1x32xf32>
    %275 = arith.mulf %274, %272 : vector<1x32xf32>
    %276 = arith.mulf %267, %247 : vector<1x32xf32>
    %277 = arith.addf %275, %276 : vector<1x32xf32>
    %c7 = arith.constant 7 : index
    %c0_74 = arith.constant 0 : index
    %278 = vector.load %arg16[%c7, %c0_74] : memref<8x32xf32, #tpu.memory_space<vmem>>, vector<1x32xf32>
    tpu.vector_store %arg16[%c7, %c0_74], %277 {strides = array<i32>} : memref<8x32xf32, #tpu.memory_space<vmem>>, vector<1x32xf32>,
    %c0_75 = arith.constant 0 : index
    %c0_76 = arith.constant 0 : index
    %279 = vector.load %arg16[%c0_75, %c0_76] : memref<8x32xf32, #tpu.memory_space<vmem>>, vector<8x32xf32>
    %cst_77 = arith.constant dense<0.000000e+00> : vector<8x96xf32>
    %280 = tpu.matmul %279, %6, %cst_77 {dimension_numbers = #tpu.dot_dimension_numbers<[1], [0], [0], [1], [0, 0, 1, 1], [], []>} : vector<8x32xf32>, vector<32x96xf32>, vector<8x96xf32> -> vector<8x96xf32>
    %281 = vector.broadcast %8 : vector<1x96xf32> to vector<8x96xf32>
    %282 = arith.addf %280, %281 : vector<8x96xf32>
    %cst_78 = arith.constant 0.000000e+00 : f32
    %283 = vector.broadcast %cst_78 : f32 to vector<1x32xf32>
    %284 = vector.extract_strided_slice %282 {offsets = [0, 0], sizes = [1, 96], strides = [1, 1]} : vector<8x96xf32> to vector<1x96xf32>
    %cst_79 = arith.constant dense<0.000000e+00> : vector<1x96xf32>
    %285 = tpu.matmul %283, %7, %cst_79 {dimension_numbers = #tpu.dot_dimension_numbers<[1], [0], [0], [1], [0, 0, 1, 1], [], []>} : vector<1x32xf32>, vector<32x96xf32>, vector<1x96xf32> -> vector<1x96xf32>
    %286 = arith.addf %285, %9 : vector<1x96xf32>
    %287 = vector.extract_strided_slice %284 {offsets = [0, 0], sizes = [1, 32], strides = [1, 1]} : vector<1x96xf32> to vector<1x32xf32>
    %288 = vector.extract_strided_slice %286 {offsets = [0, 0], sizes = [1, 32], strides = [1, 1]} : vector<1x96xf32> to vector<1x32xf32>
    %289 = arith.addf %287, %288 : vector<1x32xf32>
    %290 = arith.negf %289 : vector<1x32xf32>
    %291 = math.exp %290 : vector<1x32xf32>
    %cst_80 = arith.constant 1.000000e+00 : f32
    %292 = vector.broadcast %cst_80 : f32 to vector<1x32xf32>
    %293 = arith.addf %292, %291 : vector<1x32xf32>
    %294 = arith.divf %292, %293 : vector<1x32xf32>
    %295 = vector.extract_strided_slice %284 {offsets = [0, 32], sizes = [1, 32], strides = [1, 1]} : vector<1x96xf32> to vector<1x32xf32>
    %296 = vector.extract_strided_slice %286 {offsets = [0, 32], sizes = [1, 32], strides = [1, 1]} : vector<1x96xf32> to vector<1x32xf32>
    %297 = arith.addf %295, %296 : vector<1x32xf32>
    %298 = arith.negf %297 : vector<1x32xf32>
    %299 = math.exp %298 : vector<1x32xf32>
    %cst_81 = arith.constant 1.000000e+00 : f32
    %300 = vector.broadcast %cst_81 : f32 to vector<1x32xf32>
    %301 = arith.addf %300, %299 : vector<1x32xf32>
    %302 = arith.divf %300, %301 : vector<1x32xf32>
    %303 = vector.extract_strided_slice %284 {offsets = [0, 64], sizes = [1, 32], strides = [1, 1]} : vector<1x96xf32> to vector<1x32xf32>
    %304 = vector.extract_strided_slice %286 {offsets = [0, 64], sizes = [1, 32], strides = [1, 1]} : vector<1x96xf32> to vector<1x32xf32>
    %305 = arith.mulf %294, %304 : vector<1x32xf32>
    %306 = arith.addf %303, %305 : vector<1x32xf32>
    %307 = math.tanh %306 : vector<1x32xf32>
    %cst_82 = arith.constant 1.000000e+00 : f32
    %308 = vector.broadcast %cst_82 : f32 to vector<1x32xf32>
    %309 = arith.subf %308, %302 : vector<1x32xf32>
    %310 = arith.mulf %309, %307 : vector<1x32xf32>
    %311 = arith.mulf %302, %283 : vector<1x32xf32>
    %312 = arith.addf %310, %311 : vector<1x32xf32>
    %c0_83 = arith.constant 0 : index
    %c0_84 = arith.constant 0 : index
    %313 = vector.load %arg16[%c0_83, %c0_84] : memref<8x32xf32, #tpu.memory_space<vmem>>, vector<1x32xf32>
    tpu.vector_store %arg16[%c0_83, %c0_84], %312 {strides = array<i32>} : memref<8x32xf32, #tpu.memory_space<vmem>>, vector<1x32xf32>,
    %314 = vector.extract_strided_slice %282 {offsets = [1, 0], sizes = [1, 96], strides = [1, 1]} : vector<8x96xf32> to vector<1x96xf32>
    %cst_85 = arith.constant dense<0.000000e+00> : vector<1x96xf32>
    %315 = tpu.matmul %312, %7, %cst_85 {dimension_numbers = #tpu.dot_dimension_numbers<[1], [0], [0], [1], [0, 0, 1, 1], [], []>} : vector<1x32xf32>, vector<32x96xf32>, vector<1x96xf32> -> vector<1x96xf32>
    %316 = arith.addf %315, %9 : vector<1x96xf32>
    %317 = vector.extract_strided_slice %314 {offsets = [0, 0], sizes = [1, 32], strides = [1, 1]} : vector<1x96xf32> to vector<1x32xf32>
    %318 = vector.extract_strided_slice %316 {offsets = [0, 0], sizes = [1, 32], strides = [1, 1]} : vector<1x96xf32> to vector<1x32xf32>
    %319 = arith.addf %317, %318 : vector<1x32xf32>
    %320 = arith.negf %319 : vector<1x32xf32>
    %321 = math.exp %320 : vector<1x32xf32>
    %cst_86 = arith.constant 1.000000e+00 : f32
    %322 = vector.broadcast %cst_86 : f32 to vector<1x32xf32>
    %323 = arith.addf %322, %321 : vector<1x32xf32>
    %324 = arith.divf %322, %323 : vector<1x32xf32>
    %325 = vector.extract_strided_slice %314 {offsets = [0, 32], sizes = [1, 32], strides = [1, 1]} : vector<1x96xf32> to vector<1x32xf32>
    %326 = vector.extract_strided_slice %316 {offsets = [0, 32], sizes = [1, 32], strides = [1, 1]} : vector<1x96xf32> to vector<1x32xf32>
    %327 = arith.addf %325, %326 : vector<1x32xf32>
    %328 = arith.negf %327 : vector<1x32xf32>
    %329 = math.exp %328 : vector<1x32xf32>
    %cst_87 = arith.constant 1.000000e+00 : f32
    %330 = vector.broadcast %cst_87 : f32 to vector<1x32xf32>
    %331 = arith.addf %330, %329 : vector<1x32xf32>
    %332 = arith.divf %330, %331 : vector<1x32xf32>
    %333 = vector.extract_strided_slice %314 {offsets = [0, 64], sizes = [1, 32], strides = [1, 1]} : vector<1x96xf32> to vector<1x32xf32>
    %334 = vector.extract_strided_slice %316 {offsets = [0, 64], sizes = [1, 32], strides = [1, 1]} : vector<1x96xf32> to vector<1x32xf32>
    %335 = arith.mulf %324, %334 : vector<1x32xf32>
    %336 = arith.addf %333, %335 : vector<1x32xf32>
    %337 = math.tanh %336 : vector<1x32xf32>
    %cst_88 = arith.constant 1.000000e+00 : f32
    %338 = vector.broadcast %cst_88 : f32 to vector<1x32xf32>
    %339 = arith.subf %338, %332 : vector<1x32xf32>
    %340 = arith.mulf %339, %337 : vector<1x32xf32>
    %341 = arith.mulf %332, %312 : vector<1x32xf32>
    %342 = arith.addf %340, %341 : vector<1x32xf32>
    %c1_89 = arith.constant 1 : index
    %c0_90 = arith.constant 0 : index
    %343 = vector.load %arg16[%c1_89, %c0_90] : memref<8x32xf32, #tpu.memory_space<vmem>>, vector<1x32xf32>
    tpu.vector_store %arg16[%c1_89, %c0_90], %342 {strides = array<i32>} : memref<8x32xf32, #tpu.memory_space<vmem>>, vector<1x32xf32>,
    %344 = vector.extract_strided_slice %282 {offsets = [2, 0], sizes = [1, 96], strides = [1, 1]} : vector<8x96xf32> to vector<1x96xf32>
    %cst_91 = arith.constant dense<0.000000e+00> : vector<1x96xf32>
    %345 = tpu.matmul %342, %7, %cst_91 {dimension_numbers = #tpu.dot_dimension_numbers<[1], [0], [0], [1], [0, 0, 1, 1], [], []>} : vector<1x32xf32>, vector<32x96xf32>, vector<1x96xf32> -> vector<1x96xf32>
    %346 = arith.addf %345, %9 : vector<1x96xf32>
    %347 = vector.extract_strided_slice %344 {offsets = [0, 0], sizes = [1, 32], strides = [1, 1]} : vector<1x96xf32> to vector<1x32xf32>
    %348 = vector.extract_strided_slice %346 {offsets = [0, 0], sizes = [1, 32], strides = [1, 1]} : vector<1x96xf32> to vector<1x32xf32>
    %349 = arith.addf %347, %348 : vector<1x32xf32>
    %350 = arith.negf %349 : vector<1x32xf32>
    %351 = math.exp %350 : vector<1x32xf32>
    %cst_92 = arith.constant 1.000000e+00 : f32
    %352 = vector.broadcast %cst_92 : f32 to vector<1x32xf32>
    %353 = arith.addf %352, %351 : vector<1x32xf32>
    %354 = arith.divf %352, %353 : vector<1x32xf32>
    %355 = vector.extract_strided_slice %344 {offsets = [0, 32], sizes = [1, 32], strides = [1, 1]} : vector<1x96xf32> to vector<1x32xf32>
    %356 = vector.extract_strided_slice %346 {offsets = [0, 32], sizes = [1, 32], strides = [1, 1]} : vector<1x96xf32> to vector<1x32xf32>
    %357 = arith.addf %355, %356 : vector<1x32xf32>
    %358 = arith.negf %357 : vector<1x32xf32>
    %359 = math.exp %358 : vector<1x32xf32>
    %cst_93 = arith.constant 1.000000e+00 : f32
    %360 = vector.broadcast %cst_93 : f32 to vector<1x32xf32>
    %361 = arith.addf %360, %359 : vector<1x32xf32>
    %362 = arith.divf %360, %361 : vector<1x32xf32>
    %363 = vector.extract_strided_slice %344 {offsets = [0, 64], sizes = [1, 32], strides = [1, 1]} : vector<1x96xf32> to vector<1x32xf32>
    %364 = vector.extract_strided_slice %346 {offsets = [0, 64], sizes = [1, 32], strides = [1, 1]} : vector<1x96xf32> to vector<1x32xf32>
    %365 = arith.mulf %354, %364 : vector<1x32xf32>
    %366 = arith.addf %363, %365 : vector<1x32xf32>
    %367 = math.tanh %366 : vector<1x32xf32>
    %cst_94 = arith.constant 1.000000e+00 : f32
    %368 = vector.broadcast %cst_94 : f32 to vector<1x32xf32>
    %369 = arith.subf %368, %362 : vector<1x32xf32>
    %370 = arith.mulf %369, %367 : vector<1x32xf32>
    %371 = arith.mulf %362, %342 : vector<1x32xf32>
    %372 = arith.addf %370, %371 : vector<1x32xf32>
    %c2_95 = arith.constant 2 : index
    %c0_96 = arith.constant 0 : index
    %373 = vector.load %arg16[%c2_95, %c0_96] : memref<8x32xf32, #tpu.memory_space<vmem>>, vector<1x32xf32>
    tpu.vector_store %arg16[%c2_95, %c0_96], %372 {strides = array<i32>} : memref<8x32xf32, #tpu.memory_space<vmem>>, vector<1x32xf32>,
    %374 = vector.extract_strided_slice %282 {offsets = [3, 0], sizes = [1, 96], strides = [1, 1]} : vector<8x96xf32> to vector<1x96xf32>
    %cst_97 = arith.constant dense<0.000000e+00> : vector<1x96xf32>
    %375 = tpu.matmul %372, %7, %cst_97 {dimension_numbers = #tpu.dot_dimension_numbers<[1], [0], [0], [1], [0, 0, 1, 1], [], []>} : vector<1x32xf32>, vector<32x96xf32>, vector<1x96xf32> -> vector<1x96xf32>
    %376 = arith.addf %375, %9 : vector<1x96xf32>
    %377 = vector.extract_strided_slice %374 {offsets = [0, 0], sizes = [1, 32], strides = [1, 1]} : vector<1x96xf32> to vector<1x32xf32>
    %378 = vector.extract_strided_slice %376 {offsets = [0, 0], sizes = [1, 32], strides = [1, 1]} : vector<1x96xf32> to vector<1x32xf32>
    %379 = arith.addf %377, %378 : vector<1x32xf32>
    %380 = arith.negf %379 : vector<1x32xf32>
    %381 = math.exp %380 : vector<1x32xf32>
    %cst_98 = arith.constant 1.000000e+00 : f32
    %382 = vector.broadcast %cst_98 : f32 to vector<1x32xf32>
    %383 = arith.addf %382, %381 : vector<1x32xf32>
    %384 = arith.divf %382, %383 : vector<1x32xf32>
    %385 = vector.extract_strided_slice %374 {offsets = [0, 32], sizes = [1, 32], strides = [1, 1]} : vector<1x96xf32> to vector<1x32xf32>
    %386 = vector.extract_strided_slice %376 {offsets = [0, 32], sizes = [1, 32], strides = [1, 1]} : vector<1x96xf32> to vector<1x32xf32>
    %387 = arith.addf %385, %386 : vector<1x32xf32>
    %388 = arith.negf %387 : vector<1x32xf32>
    %389 = math.exp %388 : vector<1x32xf32>
    %cst_99 = arith.constant 1.000000e+00 : f32
    %390 = vector.broadcast %cst_99 : f32 to vector<1x32xf32>
    %391 = arith.addf %390, %389 : vector<1x32xf32>
    %392 = arith.divf %390, %391 : vector<1x32xf32>
    %393 = vector.extract_strided_slice %374 {offsets = [0, 64], sizes = [1, 32], strides = [1, 1]} : vector<1x96xf32> to vector<1x32xf32>
    %394 = vector.extract_strided_slice %376 {offsets = [0, 64], sizes = [1, 32], strides = [1, 1]} : vector<1x96xf32> to vector<1x32xf32>
    %395 = arith.mulf %384, %394 : vector<1x32xf32>
    %396 = arith.addf %393, %395 : vector<1x32xf32>
    %397 = math.tanh %396 : vector<1x32xf32>
    %cst_100 = arith.constant 1.000000e+00 : f32
    %398 = vector.broadcast %cst_100 : f32 to vector<1x32xf32>
    %399 = arith.subf %398, %392 : vector<1x32xf32>
    %400 = arith.mulf %399, %397 : vector<1x32xf32>
    %401 = arith.mulf %392, %372 : vector<1x32xf32>
    %402 = arith.addf %400, %401 : vector<1x32xf32>
    %c3_101 = arith.constant 3 : index
    %c0_102 = arith.constant 0 : index
    %403 = vector.load %arg16[%c3_101, %c0_102] : memref<8x32xf32, #tpu.memory_space<vmem>>, vector<1x32xf32>
    tpu.vector_store %arg16[%c3_101, %c0_102], %402 {strides = array<i32>} : memref<8x32xf32, #tpu.memory_space<vmem>>, vector<1x32xf32>,
    %404 = vector.extract_strided_slice %282 {offsets = [4, 0], sizes = [1, 96], strides = [1, 1]} : vector<8x96xf32> to vector<1x96xf32>
    %cst_103 = arith.constant dense<0.000000e+00> : vector<1x96xf32>
    %405 = tpu.matmul %402, %7, %cst_103 {dimension_numbers = #tpu.dot_dimension_numbers<[1], [0], [0], [1], [0, 0, 1, 1], [], []>} : vector<1x32xf32>, vector<32x96xf32>, vector<1x96xf32> -> vector<1x96xf32>
    %406 = arith.addf %405, %9 : vector<1x96xf32>
    %407 = vector.extract_strided_slice %404 {offsets = [0, 0], sizes = [1, 32], strides = [1, 1]} : vector<1x96xf32> to vector<1x32xf32>
    %408 = vector.extract_strided_slice %406 {offsets = [0, 0], sizes = [1, 32], strides = [1, 1]} : vector<1x96xf32> to vector<1x32xf32>
    %409 = arith.addf %407, %408 : vector<1x32xf32>
    %410 = arith.negf %409 : vector<1x32xf32>
    %411 = math.exp %410 : vector<1x32xf32>
    %cst_104 = arith.constant 1.000000e+00 : f32
    %412 = vector.broadcast %cst_104 : f32 to vector<1x32xf32>
    %413 = arith.addf %412, %411 : vector<1x32xf32>
    %414 = arith.divf %412, %413 : vector<1x32xf32>
    %415 = vector.extract_strided_slice %404 {offsets = [0, 32], sizes = [1, 32], strides = [1, 1]} : vector<1x96xf32> to vector<1x32xf32>
    %416 = vector.extract_strided_slice %406 {offsets = [0, 32], sizes = [1, 32], strides = [1, 1]} : vector<1x96xf32> to vector<1x32xf32>
    %417 = arith.addf %415, %416 : vector<1x32xf32>
    %418 = arith.negf %417 : vector<1x32xf32>
    %419 = math.exp %418 : vector<1x32xf32>
    %cst_105 = arith.constant 1.000000e+00 : f32
    %420 = vector.broadcast %cst_105 : f32 to vector<1x32xf32>
    %421 = arith.addf %420, %419 : vector<1x32xf32>
    %422 = arith.divf %420, %421 : vector<1x32xf32>
    %423 = vector.extract_strided_slice %404 {offsets = [0, 64], sizes = [1, 32], strides = [1, 1]} : vector<1x96xf32> to vector<1x32xf32>
    %424 = vector.extract_strided_slice %406 {offsets = [0, 64], sizes = [1, 32], strides = [1, 1]} : vector<1x96xf32> to vector<1x32xf32>
    %425 = arith.mulf %414, %424 : vector<1x32xf32>
    %426 = arith.addf %423, %425 : vector<1x32xf32>
    %427 = math.tanh %426 : vector<1x32xf32>
    %cst_106 = arith.constant 1.000000e+00 : f32
    %428 = vector.broadcast %cst_106 : f32 to vector<1x32xf32>
    %429 = arith.subf %428, %422 : vector<1x32xf32>
    %430 = arith.mulf %429, %427 : vector<1x32xf32>
    %431 = arith.mulf %422, %402 : vector<1x32xf32>
    %432 = arith.addf %430, %431 : vector<1x32xf32>
    %c4_107 = arith.constant 4 : index
    %c0_108 = arith.constant 0 : index
    %433 = vector.load %arg16[%c4_107, %c0_108] : memref<8x32xf32, #tpu.memory_space<vmem>>, vector<1x32xf32>
    tpu.vector_store %arg16[%c4_107, %c0_108], %432 {strides = array<i32>} : memref<8x32xf32, #tpu.memory_space<vmem>>, vector<1x32xf32>,
    %434 = vector.extract_strided_slice %282 {offsets = [5, 0], sizes = [1, 96], strides = [1, 1]} : vector<8x96xf32> to vector<1x96xf32>
    %cst_109 = arith.constant dense<0.000000e+00> : vector<1x96xf32>
    %435 = tpu.matmul %432, %7, %cst_109 {dimension_numbers = #tpu.dot_dimension_numbers<[1], [0], [0], [1], [0, 0, 1, 1], [], []>} : vector<1x32xf32>, vector<32x96xf32>, vector<1x96xf32> -> vector<1x96xf32>
    %436 = arith.addf %435, %9 : vector<1x96xf32>
    %437 = vector.extract_strided_slice %434 {offsets = [0, 0], sizes = [1, 32], strides = [1, 1]} : vector<1x96xf32> to vector<1x32xf32>
    %438 = vector.extract_strided_slice %436 {offsets = [0, 0], sizes = [1, 32], strides = [1, 1]} : vector<1x96xf32> to vector<1x32xf32>
    %439 = arith.addf %437, %438 : vector<1x32xf32>
    %440 = arith.negf %439 : vector<1x32xf32>
    %441 = math.exp %440 : vector<1x32xf32>
    %cst_110 = arith.constant 1.000000e+00 : f32
    %442 = vector.broadcast %cst_110 : f32 to vector<1x32xf32>
    %443 = arith.addf %442, %441 : vector<1x32xf32>
    %444 = arith.divf %442, %443 : vector<1x32xf32>
    %445 = vector.extract_strided_slice %434 {offsets = [0, 32], sizes = [1, 32], strides = [1, 1]} : vector<1x96xf32> to vector<1x32xf32>
    %446 = vector.extract_strided_slice %436 {offsets = [0, 32], sizes = [1, 32], strides = [1, 1]} : vector<1x96xf32> to vector<1x32xf32>
    %447 = arith.addf %445, %446 : vector<1x32xf32>
    %448 = arith.negf %447 : vector<1x32xf32>
    %449 = math.exp %448 : vector<1x32xf32>
    %cst_111 = arith.constant 1.000000e+00 : f32
    %450 = vector.broadcast %cst_111 : f32 to vector<1x32xf32>
    %451 = arith.addf %450, %449 : vector<1x32xf32>
    %452 = arith.divf %450, %451 : vector<1x32xf32>
    %453 = vector.extract_strided_slice %434 {offsets = [0, 64], sizes = [1, 32], strides = [1, 1]} : vector<1x96xf32> to vector<1x32xf32>
    %454 = vector.extract_strided_slice %436 {offsets = [0, 64], sizes = [1, 32], strides = [1, 1]} : vector<1x96xf32> to vector<1x32xf32>
    %455 = arith.mulf %444, %454 : vector<1x32xf32>
    %456 = arith.addf %453, %455 : vector<1x32xf32>
    %457 = math.tanh %456 : vector<1x32xf32>
    %cst_112 = arith.constant 1.000000e+00 : f32
    %458 = vector.broadcast %cst_112 : f32 to vector<1x32xf32>
    %459 = arith.subf %458, %452 : vector<1x32xf32>
    %460 = arith.mulf %459, %457 : vector<1x32xf32>
    %461 = arith.mulf %452, %432 : vector<1x32xf32>
    %462 = arith.addf %460, %461 : vector<1x32xf32>
    %c5_113 = arith.constant 5 : index
    %c0_114 = arith.constant 0 : index
    %463 = vector.load %arg16[%c5_113, %c0_114] : memref<8x32xf32, #tpu.memory_space<vmem>>, vector<1x32xf32>
    tpu.vector_store %arg16[%c5_113, %c0_114], %462 {strides = array<i32>} : memref<8x32xf32, #tpu.memory_space<vmem>>, vector<1x32xf32>,
    %464 = vector.extract_strided_slice %282 {offsets = [6, 0], sizes = [1, 96], strides = [1, 1]} : vector<8x96xf32> to vector<1x96xf32>
    %cst_115 = arith.constant dense<0.000000e+00> : vector<1x96xf32>
    %465 = tpu.matmul %462, %7, %cst_115 {dimension_numbers = #tpu.dot_dimension_numbers<[1], [0], [0], [1], [0, 0, 1, 1], [], []>} : vector<1x32xf32>, vector<32x96xf32>, vector<1x96xf32> -> vector<1x96xf32>
    %466 = arith.addf %465, %9 : vector<1x96xf32>
    %467 = vector.extract_strided_slice %464 {offsets = [0, 0], sizes = [1, 32], strides = [1, 1]} : vector<1x96xf32> to vector<1x32xf32>
    %468 = vector.extract_strided_slice %466 {offsets = [0, 0], sizes = [1, 32], strides = [1, 1]} : vector<1x96xf32> to vector<1x32xf32>
    %469 = arith.addf %467, %468 : vector<1x32xf32>
    %470 = arith.negf %469 : vector<1x32xf32>
    %471 = math.exp %470 : vector<1x32xf32>
    %cst_116 = arith.constant 1.000000e+00 : f32
    %472 = vector.broadcast %cst_116 : f32 to vector<1x32xf32>
    %473 = arith.addf %472, %471 : vector<1x32xf32>
    %474 = arith.divf %472, %473 : vector<1x32xf32>
    %475 = vector.extract_strided_slice %464 {offsets = [0, 32], sizes = [1, 32], strides = [1, 1]} : vector<1x96xf32> to vector<1x32xf32>
    %476 = vector.extract_strided_slice %466 {offsets = [0, 32], sizes = [1, 32], strides = [1, 1]} : vector<1x96xf32> to vector<1x32xf32>
    %477 = arith.addf %475, %476 : vector<1x32xf32>
    %478 = arith.negf %477 : vector<1x32xf32>
    %479 = math.exp %478 : vector<1x32xf32>
    %cst_117 = arith.constant 1.000000e+00 : f32
    %480 = vector.broadcast %cst_117 : f32 to vector<1x32xf32>
    %481 = arith.addf %480, %479 : vector<1x32xf32>
    %482 = arith.divf %480, %481 : vector<1x32xf32>
    %483 = vector.extract_strided_slice %464 {offsets = [0, 64], sizes = [1, 32], strides = [1, 1]} : vector<1x96xf32> to vector<1x32xf32>
    %484 = vector.extract_strided_slice %466 {offsets = [0, 64], sizes = [1, 32], strides = [1, 1]} : vector<1x96xf32> to vector<1x32xf32>
    %485 = arith.mulf %474, %484 : vector<1x32xf32>
    %486 = arith.addf %483, %485 : vector<1x32xf32>
    %487 = math.tanh %486 : vector<1x32xf32>
    %cst_118 = arith.constant 1.000000e+00 : f32
    %488 = vector.broadcast %cst_118 : f32 to vector<1x32xf32>
    %489 = arith.subf %488, %482 : vector<1x32xf32>
    %490 = arith.mulf %489, %487 : vector<1x32xf32>
    %491 = arith.mulf %482, %462 : vector<1x32xf32>
    %492 = arith.addf %490, %491 : vector<1x32xf32>
    %c6_119 = arith.constant 6 : index
    %c0_120 = arith.constant 0 : index
    %493 = vector.load %arg16[%c6_119, %c0_120] : memref<8x32xf32, #tpu.memory_space<vmem>>, vector<1x32xf32>
    tpu.vector_store %arg16[%c6_119, %c0_120], %492 {strides = array<i32>} : memref<8x32xf32, #tpu.memory_space<vmem>>, vector<1x32xf32>,
    %494 = vector.extract_strided_slice %282 {offsets = [7, 0], sizes = [1, 96], strides = [1, 1]} : vector<8x96xf32> to vector<1x96xf32>
    %cst_121 = arith.constant dense<0.000000e+00> : vector<1x96xf32>
    %495 = tpu.matmul %492, %7, %cst_121 {dimension_numbers = #tpu.dot_dimension_numbers<[1], [0], [0], [1], [0, 0, 1, 1], [], []>} : vector<1x32xf32>, vector<32x96xf32>, vector<1x96xf32> -> vector<1x96xf32>
    %496 = arith.addf %495, %9 : vector<1x96xf32>
    %497 = vector.extract_strided_slice %494 {offsets = [0, 0], sizes = [1, 32], strides = [1, 1]} : vector<1x96xf32> to vector<1x32xf32>
    %498 = vector.extract_strided_slice %496 {offsets = [0, 0], sizes = [1, 32], strides = [1, 1]} : vector<1x96xf32> to vector<1x32xf32>
    %499 = arith.addf %497, %498 : vector<1x32xf32>
    %500 = arith.negf %499 : vector<1x32xf32>
    %501 = math.exp %500 : vector<1x32xf32>
    %cst_122 = arith.constant 1.000000e+00 : f32
    %502 = vector.broadcast %cst_122 : f32 to vector<1x32xf32>
    %503 = arith.addf %502, %501 : vector<1x32xf32>
    %504 = arith.divf %502, %503 : vector<1x32xf32>
    %505 = vector.extract_strided_slice %494 {offsets = [0, 32], sizes = [1, 32], strides = [1, 1]} : vector<1x96xf32> to vector<1x32xf32>
    %506 = vector.extract_strided_slice %496 {offsets = [0, 32], sizes = [1, 32], strides = [1, 1]} : vector<1x96xf32> to vector<1x32xf32>
    %507 = arith.addf %505, %506 : vector<1x32xf32>
    %508 = arith.negf %507 : vector<1x32xf32>
    %509 = math.exp %508 : vector<1x32xf32>
    %cst_123 = arith.constant 1.000000e+00 : f32
    %510 = vector.broadcast %cst_123 : f32 to vector<1x32xf32>
    %511 = arith.addf %510, %509 : vector<1x32xf32>
    %512 = arith.divf %510, %511 : vector<1x32xf32>
    %513 = vector.extract_strided_slice %494 {offsets = [0, 64], sizes = [1, 32], strides = [1, 1]} : vector<1x96xf32> to vector<1x32xf32>
    %514 = vector.extract_strided_slice %496 {offsets = [0, 64], sizes = [1, 32], strides = [1, 1]} : vector<1x96xf32> to vector<1x32xf32>
    %515 = arith.mulf %504, %514 : vector<1x32xf32>
    %516 = arith.addf %513, %515 : vector<1x32xf32>
    %517 = math.tanh %516 : vector<1x32xf32>
    %cst_124 = arith.constant 1.000000e+00 : f32
    %518 = vector.broadcast %cst_124 : f32 to vector<1x32xf32>
    %519 = arith.subf %518, %512 : vector<1x32xf32>
    %520 = arith.mulf %519, %517 : vector<1x32xf32>
    %521 = arith.mulf %512, %492 : vector<1x32xf32>
    %522 = arith.addf %520, %521 : vector<1x32xf32>
    %c7_125 = arith.constant 7 : index
    %c0_126 = arith.constant 0 : index
    %523 = vector.load %arg16[%c7_125, %c0_126] : memref<8x32xf32, #tpu.memory_space<vmem>>, vector<1x32xf32>
    tpu.vector_store %arg16[%c7_125, %c0_126], %522 {strides = array<i32>} : memref<8x32xf32, #tpu.memory_space<vmem>>, vector<1x32xf32>,
    %c0_127 = arith.constant 0 : index
    %c0_128 = arith.constant 0 : index
    %524 = vector.load %arg16[%c0_127, %c0_128] : memref<8x32xf32, #tpu.memory_space<vmem>>, vector<8x32xf32>
    %cst_129 = arith.constant dense<0.000000e+00> : vector<8x32xf32>
    %525 = tpu.matmul %524, %10, %cst_129 {dimension_numbers = #tpu.dot_dimension_numbers<[1], [0], [0], [1], [0, 0, 1, 1], [], []>} : vector<8x32xf32>, vector<32x32xf32>, vector<8x32xf32> -> vector<8x32xf32>
    %526 = vector.broadcast %11 : vector<1x32xf32> to vector<8x32xf32>
    %527 = arith.addf %525, %526 : vector<8x32xf32>
    %c0_130 = arith.constant 0 : index
    %c0_131 = arith.constant 0 : index
    %c0_132 = arith.constant 0 : index
    %528 = vector.load %arg14[%c0_130, %c0_131, %c0_132] : memref<2x8x32xf32, #tpu.memory_space<vmem>>, vector<1x8x32xf32>
    %529 = vector.shape_cast %528 : vector<1x8x32xf32> to vector<8x32xf32>
    %530 = vector.shape_cast %527 : vector<8x32xf32> to vector<1x8x32xf32>
    tpu.vector_store %arg14[%c0_130, %c0_131, %c0_132], %530 {strides = array<i32>} : memref<2x8x32xf32, #tpu.memory_space<vmem>>, vector<1x8x32xf32>,
    %531 = tpu.concatenate %277, %522 in 0 : vector<1x32xf32>, vector<1x32xf32> -> vector<2x32xf32>
    %c0_133 = arith.constant 0 : index
    %c0_134 = arith.constant 0 : index
    %c0_135 = arith.constant 0 : index
    %532 = vector.load %arg15[%c0_133, %c0_134, %c0_135] : memref<2x2x32xf32, #tpu.memory_space<vmem>>, vector<1x2x32xf32>
    %533 = vector.shape_cast %532 : vector<1x2x32xf32> to vector<2x32xf32>
    %534 = vector.shape_cast %531 : vector<2x32xf32> to vector<1x2x32xf32>
    tpu.vector_store %arg15[%c0_133, %c0_134, %c0_135], %534 {strides = array<i32>} : memref<2x2x32xf32, #tpu.memory_space<vmem>>, vector<1x2x32xf32>,
    %c1_136 = arith.constant 1 : index
    %c0_137 = arith.constant 0 : index
    %c0_138 = arith.constant 0 : index
    %535 = vector.load %arg1[%c1_136, %c0_137, %c0_138] : memref<2x8x16xf32, #tpu.memory_space<vmem>>, vector<1x8x16xf32>
    %536 = vector.shape_cast %535 : vector<1x8x16xf32> to vector<8x16xf32>
    %cst_139 = arith.constant dense<0.000000e+00> : vector<8x16xf32>
    %537 = tpu.matmul %536, %0, %cst_139 {dimension_numbers = #tpu.dot_dimension_numbers<[1], [0], [0], [1], [0, 0, 1, 1], [], []>} : vector<8x16xf32>, vector<16x16xf32>, vector<8x16xf32> -> vector<8x16xf32>
    %538 = vector.broadcast %1 : vector<1x16xf32> to vector<8x16xf32>
    %539 = arith.addf %537, %538 : vector<8x16xf32>
    %cst_140 = arith.constant dense<0.000000e+00> : vector<8x8xf32>
    %540 = tpu.matmul %539, %536, %cst_140 {dimension_numbers = #tpu.dot_dimension_numbers<[1], [1], [0], [0], [0, 0, 1, 0], [], []>} : vector<8x16xf32>, vector<8x16xf32>, vector<8x8xf32> -> vector<8x8xf32>
    %cst_141 = arith.constant 0.353553385 : f32
    %541 = vector.broadcast %cst_141 : f32 to vector<8x8xf32>
    %542 = arith.mulf %540, %541 : vector<8x8xf32>
    %543 = tpu.iota {dimensions = array<i32: 0>} : vector<8x8xi32>
    %544 = tpu.iota {dimensions = array<i32: 1>} : vector<8x8xi32>
    %545 = arith.cmpi sgt, %544, %543 : vector<8x8xi32>
    %cst_142 = arith.constant -1.000000e+30 : f32
    %546 = vector.broadcast %cst_142 : f32 to vector<8x8xf32>
    %547 = arith.select %545, %546, %542 : vector<8x8xi1>, vector<8x8xf32>
    %cst_143 = arith.constant dense<0xFF800000> : vector<8xf32>
    %548 = vector.multi_reduction <maximumf>, %547, %cst_143 [0] : vector<8x8xf32> to vector<8xf32>
    %549 = vector.shape_cast %548 : vector<8xf32> to vector<1x8xf32>
    %550 = vector.broadcast %549 : vector<1x8xf32> to vector<8x8xf32>
    %551 = arith.subf %547, %550 : vector<8x8xf32>
    %552 = math.exp %551 : vector<8x8xf32>
    %cst_144 = arith.constant dense<0.000000e+00> : vector<8xf32>
    %553 = vector.multi_reduction <add>, %552, %cst_144 [0] : vector<8x8xf32> to vector<8xf32>
    %554 = vector.shape_cast %553 : vector<8xf32> to vector<1x8xf32>
    %555 = vector.broadcast %554 : vector<1x8xf32> to vector<8x8xf32>
    %556 = arith.divf %552, %555 : vector<8x8xf32>
    %cst_145 = arith.constant dense<0.000000e+00> : vector<8x16xf32>
    %557 = tpu.matmul %556, %536, %cst_145 {dimension_numbers = #tpu.dot_dimension_numbers<[1], [0], [0], [1], [0, 0, 1, 1], [], []>} : vector<8x8xf32>, vector<8x16xf32>, vector<8x16xf32> -> vector<8x16xf32>
    %cst_146 = arith.constant dense<0.000000e+00> : vector<8x96xf32>
    %558 = tpu.matmul %557, %2, %cst_146 {dimension_numbers = #tpu.dot_dimension_numbers<[1], [0], [0], [1], [0, 0, 1, 1], [], []>} : vector<8x16xf32>, vector<16x96xf32>, vector<8x96xf32> -> vector<8x96xf32>
    %559 = vector.broadcast %4 : vector<1x96xf32> to vector<8x96xf32>
    %560 = arith.addf %558, %559 : vector<8x96xf32>
    %cst_147 = arith.constant 0.000000e+00 : f32
    %561 = vector.broadcast %cst_147 : f32 to vector<1x32xf32>
    %562 = vector.extract_strided_slice %560 {offsets = [0, 0], sizes = [1, 96], strides = [1, 1]} : vector<8x96xf32> to vector<1x96xf32>
    %cst_148 = arith.constant dense<0.000000e+00> : vector<1x96xf32>
    %563 = tpu.matmul %561, %3, %cst_148 {dimension_numbers = #tpu.dot_dimension_numbers<[1], [0], [0], [1], [0, 0, 1, 1], [], []>} : vector<1x32xf32>, vector<32x96xf32>, vector<1x96xf32> -> vector<1x96xf32>
    %564 = arith.addf %563, %5 : vector<1x96xf32>
    %565 = vector.extract_strided_slice %562 {offsets = [0, 0], sizes = [1, 32], strides = [1, 1]} : vector<1x96xf32> to vector<1x32xf32>
    %566 = vector.extract_strided_slice %564 {offsets = [0, 0], sizes = [1, 32], strides = [1, 1]} : vector<1x96xf32> to vector<1x32xf32>
    %567 = arith.addf %565, %566 : vector<1x32xf32>
    %568 = arith.negf %567 : vector<1x32xf32>
    %569 = math.exp %568 : vector<1x32xf32>
    %cst_149 = arith.constant 1.000000e+00 : f32
    %570 = vector.broadcast %cst_149 : f32 to vector<1x32xf32>
    %571 = arith.addf %570, %569 : vector<1x32xf32>
    %572 = arith.divf %570, %571 : vector<1x32xf32>
    %573 = vector.extract_strided_slice %562 {offsets = [0, 32], sizes = [1, 32], strides = [1, 1]} : vector<1x96xf32> to vector<1x32xf32>
    %574 = vector.extract_strided_slice %564 {offsets = [0, 32], sizes = [1, 32], strides = [1, 1]} : vector<1x96xf32> to vector<1x32xf32>
    %575 = arith.addf %573, %574 : vector<1x32xf32>
    %576 = arith.negf %575 : vector<1x32xf32>
    %577 = math.exp %576 : vector<1x32xf32>
    %cst_150 = arith.constant 1.000000e+00 : f32
    %578 = vector.broadcast %cst_150 : f32 to vector<1x32xf32>
    %579 = arith.addf %578, %577 : vector<1x32xf32>
    %580 = arith.divf %578, %579 : vector<1x32xf32>
    %581 = vector.extract_strided_slice %562 {offsets = [0, 64], sizes = [1, 32], strides = [1, 1]} : vector<1x96xf32> to vector<1x32xf32>
    %582 = vector.extract_strided_slice %564 {offsets = [0, 64], sizes = [1, 32], strides = [1, 1]} : vector<1x96xf32> to vector<1x32xf32>
    %583 = arith.mulf %572, %582 : vector<1x32xf32>
    %584 = arith.addf %581, %583 : vector<1x32xf32>
    %585 = math.tanh %584 : vector<1x32xf32>
    %cst_151 = arith.constant 1.000000e+00 : f32
    %586 = vector.broadcast %cst_151 : f32 to vector<1x32xf32>
    %587 = arith.subf %586, %580 : vector<1x32xf32>
    %588 = arith.mulf %587, %585 : vector<1x32xf32>
    %589 = arith.mulf %580, %561 : vector<1x32xf32>
    %590 = arith.addf %588, %589 : vector<1x32xf32>
    %c0_152 = arith.constant 0 : index
    %c0_153 = arith.constant 0 : index
    %591 = vector.load %arg16[%c0_152, %c0_153] : memref<8x32xf32, #tpu.memory_space<vmem>>, vector<1x32xf32>
    tpu.vector_store %arg16[%c0_152, %c0_153], %590 {strides = array<i32>} : memref<8x32xf32, #tpu.memory_space<vmem>>, vector<1x32xf32>,
    %592 = vector.extract_strided_slice %560 {offsets = [1, 0], sizes = [1, 96], strides = [1, 1]} : vector<8x96xf32> to vector<1x96xf32>
    %cst_154 = arith.constant dense<0.000000e+00> : vector<1x96xf32>
    %593 = tpu.matmul %590, %3, %cst_154 {dimension_numbers = #tpu.dot_dimension_numbers<[1], [0], [0], [1], [0, 0, 1, 1], [], []>} : vector<1x32xf32>, vector<32x96xf32>, vector<1x96xf32> -> vector<1x96xf32>
    %594 = arith.addf %593, %5 : vector<1x96xf32>
    %595 = vector.extract_strided_slice %592 {offsets = [0, 0], sizes = [1, 32], strides = [1, 1]} : vector<1x96xf32> to vector<1x32xf32>
    %596 = vector.extract_strided_slice %594 {offsets = [0, 0], sizes = [1, 32], strides = [1, 1]} : vector<1x96xf32> to vector<1x32xf32>
    %597 = arith.addf %595, %596 : vector<1x32xf32>
    %598 = arith.negf %597 : vector<1x32xf32>
    %599 = math.exp %598 : vector<1x32xf32>
    %cst_155 = arith.constant 1.000000e+00 : f32
    %600 = vector.broadcast %cst_155 : f32 to vector<1x32xf32>
    %601 = arith.addf %600, %599 : vector<1x32xf32>
    %602 = arith.divf %600, %601 : vector<1x32xf32>
    %603 = vector.extract_strided_slice %592 {offsets = [0, 32], sizes = [1, 32], strides = [1, 1]} : vector<1x96xf32> to vector<1x32xf32>
    %604 = vector.extract_strided_slice %594 {offsets = [0, 32], sizes = [1, 32], strides = [1, 1]} : vector<1x96xf32> to vector<1x32xf32>
    %605 = arith.addf %603, %604 : vector<1x32xf32>
    %606 = arith.negf %605 : vector<1x32xf32>
    %607 = math.exp %606 : vector<1x32xf32>
    %cst_156 = arith.constant 1.000000e+00 : f32
    %608 = vector.broadcast %cst_156 : f32 to vector<1x32xf32>
    %609 = arith.addf %608, %607 : vector<1x32xf32>
    %610 = arith.divf %608, %609 : vector<1x32xf32>
    %611 = vector.extract_strided_slice %592 {offsets = [0, 64], sizes = [1, 32], strides = [1, 1]} : vector<1x96xf32> to vector<1x32xf32>
    %612 = vector.extract_strided_slice %594 {offsets = [0, 64], sizes = [1, 32], strides = [1, 1]} : vector<1x96xf32> to vector<1x32xf32>
    %613 = arith.mulf %602, %612 : vector<1x32xf32>
    %614 = arith.addf %611, %613 : vector<1x32xf32>
    %615 = math.tanh %614 : vector<1x32xf32>
    %cst_157 = arith.constant 1.000000e+00 : f32
    %616 = vector.broadcast %cst_157 : f32 to vector<1x32xf32>
    %617 = arith.subf %616, %610 : vector<1x32xf32>
    %618 = arith.mulf %617, %615 : vector<1x32xf32>
    %619 = arith.mulf %610, %590 : vector<1x32xf32>
    %620 = arith.addf %618, %619 : vector<1x32xf32>
    %c1_158 = arith.constant 1 : index
    %c0_159 = arith.constant 0 : index
    %621 = vector.load %arg16[%c1_158, %c0_159] : memref<8x32xf32, #tpu.memory_space<vmem>>, vector<1x32xf32>
    tpu.vector_store %arg16[%c1_158, %c0_159], %620 {strides = array<i32>} : memref<8x32xf32, #tpu.memory_space<vmem>>, vector<1x32xf32>,
    %622 = vector.extract_strided_slice %560 {offsets = [2, 0], sizes = [1, 96], strides = [1, 1]} : vector<8x96xf32> to vector<1x96xf32>
    %cst_160 = arith.constant dense<0.000000e+00> : vector<1x96xf32>
    %623 = tpu.matmul %620, %3, %cst_160 {dimension_numbers = #tpu.dot_dimension_numbers<[1], [0], [0], [1], [0, 0, 1, 1], [], []>} : vector<1x32xf32>, vector<32x96xf32>, vector<1x96xf32> -> vector<1x96xf32>
    %624 = arith.addf %623, %5 : vector<1x96xf32>
    %625 = vector.extract_strided_slice %622 {offsets = [0, 0], sizes = [1, 32], strides = [1, 1]} : vector<1x96xf32> to vector<1x32xf32>
    %626 = vector.extract_strided_slice %624 {offsets = [0, 0], sizes = [1, 32], strides = [1, 1]} : vector<1x96xf32> to vector<1x32xf32>
    %627 = arith.addf %625, %626 : vector<1x32xf32>
    %628 = arith.negf %627 : vector<1x32xf32>
    %629 = math.exp %628 : vector<1x32xf32>
    %cst_161 = arith.constant 1.000000e+00 : f32
    %630 = vector.broadcast %cst_161 : f32 to vector<1x32xf32>
    %631 = arith.addf %630, %629 : vector<1x32xf32>
    %632 = arith.divf %630, %631 : vector<1x32xf32>
    %633 = vector.extract_strided_slice %622 {offsets = [0, 32], sizes = [1, 32], strides = [1, 1]} : vector<1x96xf32> to vector<1x32xf32>
    %634 = vector.extract_strided_slice %624 {offsets = [0, 32], sizes = [1, 32], strides = [1, 1]} : vector<1x96xf32> to vector<1x32xf32>
    %635 = arith.addf %633, %634 : vector<1x32xf32>
    %636 = arith.negf %635 : vector<1x32xf32>
    %637 = math.exp %636 : vector<1x32xf32>
    %cst_162 = arith.constant 1.000000e+00 : f32
    %638 = vector.broadcast %cst_162 : f32 to vector<1x32xf32>
    %639 = arith.addf %638, %637 : vector<1x32xf32>
    %640 = arith.divf %638, %639 : vector<1x32xf32>
    %641 = vector.extract_strided_slice %622 {offsets = [0, 64], sizes = [1, 32], strides = [1, 1]} : vector<1x96xf32> to vector<1x32xf32>
    %642 = vector.extract_strided_slice %624 {offsets = [0, 64], sizes = [1, 32], strides = [1, 1]} : vector<1x96xf32> to vector<1x32xf32>
    %643 = arith.mulf %632, %642 : vector<1x32xf32>
    %644 = arith.addf %641, %643 : vector<1x32xf32>
    %645 = math.tanh %644 : vector<1x32xf32>
    %cst_163 = arith.constant 1.000000e+00 : f32
    %646 = vector.broadcast %cst_163 : f32 to vector<1x32xf32>
    %647 = arith.subf %646, %640 : vector<1x32xf32>
    %648 = arith.mulf %647, %645 : vector<1x32xf32>
    %649 = arith.mulf %640, %620 : vector<1x32xf32>
    %650 = arith.addf %648, %649 : vector<1x32xf32>
    %c2_164 = arith.constant 2 : index
    %c0_165 = arith.constant 0 : index
    %651 = vector.load %arg16[%c2_164, %c0_165] : memref<8x32xf32, #tpu.memory_space<vmem>>, vector<1x32xf32>
    tpu.vector_store %arg16[%c2_164, %c0_165], %650 {strides = array<i32>} : memref<8x32xf32, #tpu.memory_space<vmem>>, vector<1x32xf32>,
    %652 = vector.extract_strided_slice %560 {offsets = [3, 0], sizes = [1, 96], strides = [1, 1]} : vector<8x96xf32> to vector<1x96xf32>
    %cst_166 = arith.constant dense<0.000000e+00> : vector<1x96xf32>
    %653 = tpu.matmul %650, %3, %cst_166 {dimension_numbers = #tpu.dot_dimension_numbers<[1], [0], [0], [1], [0, 0, 1, 1], [], []>} : vector<1x32xf32>, vector<32x96xf32>, vector<1x96xf32> -> vector<1x96xf32>
    %654 = arith.addf %653, %5 : vector<1x96xf32>
    %655 = vector.extract_strided_slice %652 {offsets = [0, 0], sizes = [1, 32], strides = [1, 1]} : vector<1x96xf32> to vector<1x32xf32>
    %656 = vector.extract_strided_slice %654 {offsets = [0, 0], sizes = [1, 32], strides = [1, 1]} : vector<1x96xf32> to vector<1x32xf32>
    %657 = arith.addf %655, %656 : vector<1x32xf32>
    %658 = arith.negf %657 : vector<1x32xf32>
    %659 = math.exp %658 : vector<1x32xf32>
    %cst_167 = arith.constant 1.000000e+00 : f32
    %660 = vector.broadcast %cst_167 : f32 to vector<1x32xf32>
    %661 = arith.addf %660, %659 : vector<1x32xf32>
    %662 = arith.divf %660, %661 : vector<1x32xf32>
    %663 = vector.extract_strided_slice %652 {offsets = [0, 32], sizes = [1, 32], strides = [1, 1]} : vector<1x96xf32> to vector<1x32xf32>
    %664 = vector.extract_strided_slice %654 {offsets = [0, 32], sizes = [1, 32], strides = [1, 1]} : vector<1x96xf32> to vector<1x32xf32>
    %665 = arith.addf %663, %664 : vector<1x32xf32>
    %666 = arith.negf %665 : vector<1x32xf32>
    %667 = math.exp %666 : vector<1x32xf32>
    %cst_168 = arith.constant 1.000000e+00 : f32
    %668 = vector.broadcast %cst_168 : f32 to vector<1x32xf32>
    %669 = arith.addf %668, %667 : vector<1x32xf32>
    %670 = arith.divf %668, %669 : vector<1x32xf32>
    %671 = vector.extract_strided_slice %652 {offsets = [0, 64], sizes = [1, 32], strides = [1, 1]} : vector<1x96xf32> to vector<1x32xf32>
    %672 = vector.extract_strided_slice %654 {offsets = [0, 64], sizes = [1, 32], strides = [1, 1]} : vector<1x96xf32> to vector<1x32xf32>
    %673 = arith.mulf %662, %672 : vector<1x32xf32>
    %674 = arith.addf %671, %673 : vector<1x32xf32>
    %675 = math.tanh %674 : vector<1x32xf32>
    %cst_169 = arith.constant 1.000000e+00 : f32
    %676 = vector.broadcast %cst_169 : f32 to vector<1x32xf32>
    %677 = arith.subf %676, %670 : vector<1x32xf32>
    %678 = arith.mulf %677, %675 : vector<1x32xf32>
    %679 = arith.mulf %670, %650 : vector<1x32xf32>
    %680 = arith.addf %678, %679 : vector<1x32xf32>
    %c3_170 = arith.constant 3 : index
    %c0_171 = arith.constant 0 : index
    %681 = vector.load %arg16[%c3_170, %c0_171] : memref<8x32xf32, #tpu.memory_space<vmem>>, vector<1x32xf32>
    tpu.vector_store %arg16[%c3_170, %c0_171], %680 {strides = array<i32>} : memref<8x32xf32, #tpu.memory_space<vmem>>, vector<1x32xf32>,
    %682 = vector.extract_strided_slice %560 {offsets = [4, 0], sizes = [1, 96], strides = [1, 1]} : vector<8x96xf32> to vector<1x96xf32>
    %cst_172 = arith.constant dense<0.000000e+00> : vector<1x96xf32>
    %683 = tpu.matmul %680, %3, %cst_172 {dimension_numbers = #tpu.dot_dimension_numbers<[1], [0], [0], [1], [0, 0, 1, 1], [], []>} : vector<1x32xf32>, vector<32x96xf32>, vector<1x96xf32> -> vector<1x96xf32>
    %684 = arith.addf %683, %5 : vector<1x96xf32>
    %685 = vector.extract_strided_slice %682 {offsets = [0, 0], sizes = [1, 32], strides = [1, 1]} : vector<1x96xf32> to vector<1x32xf32>
    %686 = vector.extract_strided_slice %684 {offsets = [0, 0], sizes = [1, 32], strides = [1, 1]} : vector<1x96xf32> to vector<1x32xf32>
    %687 = arith.addf %685, %686 : vector<1x32xf32>
    %688 = arith.negf %687 : vector<1x32xf32>
    %689 = math.exp %688 : vector<1x32xf32>
    %cst_173 = arith.constant 1.000000e+00 : f32
    %690 = vector.broadcast %cst_173 : f32 to vector<1x32xf32>
    %691 = arith.addf %690, %689 : vector<1x32xf32>
    %692 = arith.divf %690, %691 : vector<1x32xf32>
    %693 = vector.extract_strided_slice %682 {offsets = [0, 32], sizes = [1, 32], strides = [1, 1]} : vector<1x96xf32> to vector<1x32xf32>
    %694 = vector.extract_strided_slice %684 {offsets = [0, 32], sizes = [1, 32], strides = [1, 1]} : vector<1x96xf32> to vector<1x32xf32>
    %695 = arith.addf %693, %694 : vector<1x32xf32>
    %696 = arith.negf %695 : vector<1x32xf32>
    %697 = math.exp %696 : vector<1x32xf32>
    %cst_174 = arith.constant 1.000000e+00 : f32
    %698 = vector.broadcast %cst_174 : f32 to vector<1x32xf32>
    %699 = arith.addf %698, %697 : vector<1x32xf32>
    %700 = arith.divf %698, %699 : vector<1x32xf32>
    %701 = vector.extract_strided_slice %682 {offsets = [0, 64], sizes = [1, 32], strides = [1, 1]} : vector<1x96xf32> to vector<1x32xf32>
    %702 = vector.extract_strided_slice %684 {offsets = [0, 64], sizes = [1, 32], strides = [1, 1]} : vector<1x96xf32> to vector<1x32xf32>
    %703 = arith.mulf %692, %702 : vector<1x32xf32>
    %704 = arith.addf %701, %703 : vector<1x32xf32>
    %705 = math.tanh %704 : vector<1x32xf32>
    %cst_175 = arith.constant 1.000000e+00 : f32
    %706 = vector.broadcast %cst_175 : f32 to vector<1x32xf32>
    %707 = arith.subf %706, %700 : vector<1x32xf32>
    %708 = arith.mulf %707, %705 : vector<1x32xf32>
    %709 = arith.mulf %700, %680 : vector<1x32xf32>
    %710 = arith.addf %708, %709 : vector<1x32xf32>
    %c4_176 = arith.constant 4 : index
    %c0_177 = arith.constant 0 : index
    %711 = vector.load %arg16[%c4_176, %c0_177] : memref<8x32xf32, #tpu.memory_space<vmem>>, vector<1x32xf32>
    tpu.vector_store %arg16[%c4_176, %c0_177], %710 {strides = array<i32>} : memref<8x32xf32, #tpu.memory_space<vmem>>, vector<1x32xf32>,
    %712 = vector.extract_strided_slice %560 {offsets = [5, 0], sizes = [1, 96], strides = [1, 1]} : vector<8x96xf32> to vector<1x96xf32>
    %cst_178 = arith.constant dense<0.000000e+00> : vector<1x96xf32>
    %713 = tpu.matmul %710, %3, %cst_178 {dimension_numbers = #tpu.dot_dimension_numbers<[1], [0], [0], [1], [0, 0, 1, 1], [], []>} : vector<1x32xf32>, vector<32x96xf32>, vector<1x96xf32> -> vector<1x96xf32>
    %714 = arith.addf %713, %5 : vector<1x96xf32>
    %715 = vector.extract_strided_slice %712 {offsets = [0, 0], sizes = [1, 32], strides = [1, 1]} : vector<1x96xf32> to vector<1x32xf32>
    %716 = vector.extract_strided_slice %714 {offsets = [0, 0], sizes = [1, 32], strides = [1, 1]} : vector<1x96xf32> to vector<1x32xf32>
    %717 = arith.addf %715, %716 : vector<1x32xf32>
    %718 = arith.negf %717 : vector<1x32xf32>
    %719 = math.exp %718 : vector<1x32xf32>
    %cst_179 = arith.constant 1.000000e+00 : f32
    %720 = vector.broadcast %cst_179 : f32 to vector<1x32xf32>
    %721 = arith.addf %720, %719 : vector<1x32xf32>
    %722 = arith.divf %720, %721 : vector<1x32xf32>
    %723 = vector.extract_strided_slice %712 {offsets = [0, 32], sizes = [1, 32], strides = [1, 1]} : vector<1x96xf32> to vector<1x32xf32>
    %724 = vector.extract_strided_slice %714 {offsets = [0, 32], sizes = [1, 32], strides = [1, 1]} : vector<1x96xf32> to vector<1x32xf32>
    %725 = arith.addf %723, %724 : vector<1x32xf32>
    %726 = arith.negf %725 : vector<1x32xf32>
    %727 = math.exp %726 : vector<1x32xf32>
    %cst_180 = arith.constant 1.000000e+00 : f32
    %728 = vector.broadcast %cst_180 : f32 to vector<1x32xf32>
    %729 = arith.addf %728, %727 : vector<1x32xf32>
    %730 = arith.divf %728, %729 : vector<1x32xf32>
    %731 = vector.extract_strided_slice %712 {offsets = [0, 64], sizes = [1, 32], strides = [1, 1]} : vector<1x96xf32> to vector<1x32xf32>
    %732 = vector.extract_strided_slice %714 {offsets = [0, 64], sizes = [1, 32], strides = [1, 1]} : vector<1x96xf32> to vector<1x32xf32>
    %733 = arith.mulf %722, %732 : vector<1x32xf32>
    %734 = arith.addf %731, %733 : vector<1x32xf32>
    %735 = math.tanh %734 : vector<1x32xf32>
    %cst_181 = arith.constant 1.000000e+00 : f32
    %736 = vector.broadcast %cst_181 : f32 to vector<1x32xf32>
    %737 = arith.subf %736, %730 : vector<1x32xf32>
    %738 = arith.mulf %737, %735 : vector<1x32xf32>
    %739 = arith.mulf %730, %710 : vector<1x32xf32>
    %740 = arith.addf %738, %739 : vector<1x32xf32>
    %c5_182 = arith.constant 5 : index
    %c0_183 = arith.constant 0 : index
    %741 = vector.load %arg16[%c5_182, %c0_183] : memref<8x32xf32, #tpu.memory_space<vmem>>, vector<1x32xf32>
    tpu.vector_store %arg16[%c5_182, %c0_183], %740 {strides = array<i32>} : memref<8x32xf32, #tpu.memory_space<vmem>>, vector<1x32xf32>,
    %742 = vector.extract_strided_slice %560 {offsets = [6, 0], sizes = [1, 96], strides = [1, 1]} : vector<8x96xf32> to vector<1x96xf32>
    %cst_184 = arith.constant dense<0.000000e+00> : vector<1x96xf32>
    %743 = tpu.matmul %740, %3, %cst_184 {dimension_numbers = #tpu.dot_dimension_numbers<[1], [0], [0], [1], [0, 0, 1, 1], [], []>} : vector<1x32xf32>, vector<32x96xf32>, vector<1x96xf32> -> vector<1x96xf32>
    %744 = arith.addf %743, %5 : vector<1x96xf32>
    %745 = vector.extract_strided_slice %742 {offsets = [0, 0], sizes = [1, 32], strides = [1, 1]} : vector<1x96xf32> to vector<1x32xf32>
    %746 = vector.extract_strided_slice %744 {offsets = [0, 0], sizes = [1, 32], strides = [1, 1]} : vector<1x96xf32> to vector<1x32xf32>
    %747 = arith.addf %745, %746 : vector<1x32xf32>
    %748 = arith.negf %747 : vector<1x32xf32>
    %749 = math.exp %748 : vector<1x32xf32>
    %cst_185 = arith.constant 1.000000e+00 : f32
    %750 = vector.broadcast %cst_185 : f32 to vector<1x32xf32>
    %751 = arith.addf %750, %749 : vector<1x32xf32>
    %752 = arith.divf %750, %751 : vector<1x32xf32>
    %753 = vector.extract_strided_slice %742 {offsets = [0, 32], sizes = [1, 32], strides = [1, 1]} : vector<1x96xf32> to vector<1x32xf32>
    %754 = vector.extract_strided_slice %744 {offsets = [0, 32], sizes = [1, 32], strides = [1, 1]} : vector<1x96xf32> to vector<1x32xf32>
    %755 = arith.addf %753, %754 : vector<1x32xf32>
    %756 = arith.negf %755 : vector<1x32xf32>
    %757 = math.exp %756 : vector<1x32xf32>
    %cst_186 = arith.constant 1.000000e+00 : f32
    %758 = vector.broadcast %cst_186 : f32 to vector<1x32xf32>
    %759 = arith.addf %758, %757 : vector<1x32xf32>
    %760 = arith.divf %758, %759 : vector<1x32xf32>
    %761 = vector.extract_strided_slice %742 {offsets = [0, 64], sizes = [1, 32], strides = [1, 1]} : vector<1x96xf32> to vector<1x32xf32>
    %762 = vector.extract_strided_slice %744 {offsets = [0, 64], sizes = [1, 32], strides = [1, 1]} : vector<1x96xf32> to vector<1x32xf32>
    %763 = arith.mulf %752, %762 : vector<1x32xf32>
    %764 = arith.addf %761, %763 : vector<1x32xf32>
    %765 = math.tanh %764 : vector<1x32xf32>
    %cst_187 = arith.constant 1.000000e+00 : f32
    %766 = vector.broadcast %cst_187 : f32 to vector<1x32xf32>
    %767 = arith.subf %766, %760 : vector<1x32xf32>
    %768 = arith.mulf %767, %765 : vector<1x32xf32>
    %769 = arith.mulf %760, %740 : vector<1x32xf32>
    %770 = arith.addf %768, %769 : vector<1x32xf32>
    %c6_188 = arith.constant 6 : index
    %c0_189 = arith.constant 0 : index
    %771 = vector.load %arg16[%c6_188, %c0_189] : memref<8x32xf32, #tpu.memory_space<vmem>>, vector<1x32xf32>
    tpu.vector_store %arg16[%c6_188, %c0_189], %770 {strides = array<i32>} : memref<8x32xf32, #tpu.memory_space<vmem>>, vector<1x32xf32>,
    %772 = vector.extract_strided_slice %560 {offsets = [7, 0], sizes = [1, 96], strides = [1, 1]} : vector<8x96xf32> to vector<1x96xf32>
    %cst_190 = arith.constant dense<0.000000e+00> : vector<1x96xf32>
    %773 = tpu.matmul %770, %3, %cst_190 {dimension_numbers = #tpu.dot_dimension_numbers<[1], [0], [0], [1], [0, 0, 1, 1], [], []>} : vector<1x32xf32>, vector<32x96xf32>, vector<1x96xf32> -> vector<1x96xf32>
    %774 = arith.addf %773, %5 : vector<1x96xf32>
    %775 = vector.extract_strided_slice %772 {offsets = [0, 0], sizes = [1, 32], strides = [1, 1]} : vector<1x96xf32> to vector<1x32xf32>
    %776 = vector.extract_strided_slice %774 {offsets = [0, 0], sizes = [1, 32], strides = [1, 1]} : vector<1x96xf32> to vector<1x32xf32>
    %777 = arith.addf %775, %776 : vector<1x32xf32>
    %778 = arith.negf %777 : vector<1x32xf32>
    %779 = math.exp %778 : vector<1x32xf32>
    %cst_191 = arith.constant 1.000000e+00 : f32
    %780 = vector.broadcast %cst_191 : f32 to vector<1x32xf32>
    %781 = arith.addf %780, %779 : vector<1x32xf32>
    %782 = arith.divf %780, %781 : vector<1x32xf32>
    %783 = vector.extract_strided_slice %772 {offsets = [0, 32], sizes = [1, 32], strides = [1, 1]} : vector<1x96xf32> to vector<1x32xf32>
    %784 = vector.extract_strided_slice %774 {offsets = [0, 32], sizes = [1, 32], strides = [1, 1]} : vector<1x96xf32> to vector<1x32xf32>
    %785 = arith.addf %783, %784 : vector<1x32xf32>
    %786 = arith.negf %785 : vector<1x32xf32>
    %787 = math.exp %786 : vector<1x32xf32>
    %cst_192 = arith.constant 1.000000e+00 : f32
    %788 = vector.broadcast %cst_192 : f32 to vector<1x32xf32>
    %789 = arith.addf %788, %787 : vector<1x32xf32>
    %790 = arith.divf %788, %789 : vector<1x32xf32>
    %791 = vector.extract_strided_slice %772 {offsets = [0, 64], sizes = [1, 32], strides = [1, 1]} : vector<1x96xf32> to vector<1x32xf32>
    %792 = vector.extract_strided_slice %774 {offsets = [0, 64], sizes = [1, 32], strides = [1, 1]} : vector<1x96xf32> to vector<1x32xf32>
    %793 = arith.mulf %782, %792 : vector<1x32xf32>
    %794 = arith.addf %791, %793 : vector<1x32xf32>
    %795 = math.tanh %794 : vector<1x32xf32>
    %cst_193 = arith.constant 1.000000e+00 : f32
    %796 = vector.broadcast %cst_193 : f32 to vector<1x32xf32>
    %797 = arith.subf %796, %790 : vector<1x32xf32>
    %798 = arith.mulf %797, %795 : vector<1x32xf32>
    %799 = arith.mulf %790, %770 : vector<1x32xf32>
    %800 = arith.addf %798, %799 : vector<1x32xf32>
    %c7_194 = arith.constant 7 : index
    %c0_195 = arith.constant 0 : index
    %801 = vector.load %arg16[%c7_194, %c0_195] : memref<8x32xf32, #tpu.memory_space<vmem>>, vector<1x32xf32>
    tpu.vector_store %arg16[%c7_194, %c0_195], %800 {strides = array<i32>} : memref<8x32xf32, #tpu.memory_space<vmem>>, vector<1x32xf32>,
    %c0_196 = arith.constant 0 : index
    %c0_197 = arith.constant 0 : index
    %802 = vector.load %arg16[%c0_196, %c0_197] : memref<8x32xf32, #tpu.memory_space<vmem>>, vector<8x32xf32>
    %cst_198 = arith.constant dense<0.000000e+00> : vector<8x96xf32>
    %803 = tpu.matmul %802, %6, %cst_198 {dimension_numbers = #tpu.dot_dimension_numbers<[1], [0], [0], [1], [0, 0, 1, 1], [], []>} : vector<8x32xf32>, vector<32x96xf32>, vector<8x96xf32> -> vector<8x96xf32>
    %804 = vector.broadcast %8 : vector<1x96xf32> to vector<8x96xf32>
    %805 = arith.addf %803, %804 : vector<8x96xf32>
    %cst_199 = arith.constant 0.000000e+00 : f32
    %806 = vector.broadcast %cst_199 : f32 to vector<1x32xf32>
    %807 = vector.extract_strided_slice %805 {offsets = [0, 0], sizes = [1, 96], strides = [1, 1]} : vector<8x96xf32> to vector<1x96xf32>
    %cst_200 = arith.constant dense<0.000000e+00> : vector<1x96xf32>
    %808 = tpu.matmul %806, %7, %cst_200 {dimension_numbers = #tpu.dot_dimension_numbers<[1], [0], [0], [1], [0, 0, 1, 1], [], []>} : vector<1x32xf32>, vector<32x96xf32>, vector<1x96xf32> -> vector<1x96xf32>
    %809 = arith.addf %808, %9 : vector<1x96xf32>
    %810 = vector.extract_strided_slice %807 {offsets = [0, 0], sizes = [1, 32], strides = [1, 1]} : vector<1x96xf32> to vector<1x32xf32>
    %811 = vector.extract_strided_slice %809 {offsets = [0, 0], sizes = [1, 32], strides = [1, 1]} : vector<1x96xf32> to vector<1x32xf32>
    %812 = arith.addf %810, %811 : vector<1x32xf32>
    %813 = arith.negf %812 : vector<1x32xf32>
    %814 = math.exp %813 : vector<1x32xf32>
    %cst_201 = arith.constant 1.000000e+00 : f32
    %815 = vector.broadcast %cst_201 : f32 to vector<1x32xf32>
    %816 = arith.addf %815, %814 : vector<1x32xf32>
    %817 = arith.divf %815, %816 : vector<1x32xf32>
    %818 = vector.extract_strided_slice %807 {offsets = [0, 32], sizes = [1, 32], strides = [1, 1]} : vector<1x96xf32> to vector<1x32xf32>
    %819 = vector.extract_strided_slice %809 {offsets = [0, 32], sizes = [1, 32], strides = [1, 1]} : vector<1x96xf32> to vector<1x32xf32>
    %820 = arith.addf %818, %819 : vector<1x32xf32>
    %821 = arith.negf %820 : vector<1x32xf32>
    %822 = math.exp %821 : vector<1x32xf32>
    %cst_202 = arith.constant 1.000000e+00 : f32
    %823 = vector.broadcast %cst_202 : f32 to vector<1x32xf32>
    %824 = arith.addf %823, %822 : vector<1x32xf32>
    %825 = arith.divf %823, %824 : vector<1x32xf32>
    %826 = vector.extract_strided_slice %807 {offsets = [0, 64], sizes = [1, 32], strides = [1, 1]} : vector<1x96xf32> to vector<1x32xf32>
    %827 = vector.extract_strided_slice %809 {offsets = [0, 64], sizes = [1, 32], strides = [1, 1]} : vector<1x96xf32> to vector<1x32xf32>
    %828 = arith.mulf %817, %827 : vector<1x32xf32>
    %829 = arith.addf %826, %828 : vector<1x32xf32>
    %830 = math.tanh %829 : vector<1x32xf32>
    %cst_203 = arith.constant 1.000000e+00 : f32
    %831 = vector.broadcast %cst_203 : f32 to vector<1x32xf32>
    %832 = arith.subf %831, %825 : vector<1x32xf32>
    %833 = arith.mulf %832, %830 : vector<1x32xf32>
    %834 = arith.mulf %825, %806 : vector<1x32xf32>
    %835 = arith.addf %833, %834 : vector<1x32xf32>
    %c0_204 = arith.constant 0 : index
    %c0_205 = arith.constant 0 : index
    %836 = vector.load %arg16[%c0_204, %c0_205] : memref<8x32xf32, #tpu.memory_space<vmem>>, vector<1x32xf32>
    tpu.vector_store %arg16[%c0_204, %c0_205], %835 {strides = array<i32>} : memref<8x32xf32, #tpu.memory_space<vmem>>, vector<1x32xf32>,
    %837 = vector.extract_strided_slice %805 {offsets = [1, 0], sizes = [1, 96], strides = [1, 1]} : vector<8x96xf32> to vector<1x96xf32>
    %cst_206 = arith.constant dense<0.000000e+00> : vector<1x96xf32>
    %838 = tpu.matmul %835, %7, %cst_206 {dimension_numbers = #tpu.dot_dimension_numbers<[1], [0], [0], [1], [0, 0, 1, 1], [], []>} : vector<1x32xf32>, vector<32x96xf32>, vector<1x96xf32> -> vector<1x96xf32>
    %839 = arith.addf %838, %9 : vector<1x96xf32>
    %840 = vector.extract_strided_slice %837 {offsets = [0, 0], sizes = [1, 32], strides = [1, 1]} : vector<1x96xf32> to vector<1x32xf32>
    %841 = vector.extract_strided_slice %839 {offsets = [0, 0], sizes = [1, 32], strides = [1, 1]} : vector<1x96xf32> to vector<1x32xf32>
    %842 = arith.addf %840, %841 : vector<1x32xf32>
    %843 = arith.negf %842 : vector<1x32xf32>
    %844 = math.exp %843 : vector<1x32xf32>
    %cst_207 = arith.constant 1.000000e+00 : f32
    %845 = vector.broadcast %cst_207 : f32 to vector<1x32xf32>
    %846 = arith.addf %845, %844 : vector<1x32xf32>
    %847 = arith.divf %845, %846 : vector<1x32xf32>
    %848 = vector.extract_strided_slice %837 {offsets = [0, 32], sizes = [1, 32], strides = [1, 1]} : vector<1x96xf32> to vector<1x32xf32>
    %849 = vector.extract_strided_slice %839 {offsets = [0, 32], sizes = [1, 32], strides = [1, 1]} : vector<1x96xf32> to vector<1x32xf32>
    %850 = arith.addf %848, %849 : vector<1x32xf32>
    %851 = arith.negf %850 : vector<1x32xf32>
    %852 = math.exp %851 : vector<1x32xf32>
    %cst_208 = arith.constant 1.000000e+00 : f32
    %853 = vector.broadcast %cst_208 : f32 to vector<1x32xf32>
    %854 = arith.addf %853, %852 : vector<1x32xf32>
    %855 = arith.divf %853, %854 : vector<1x32xf32>
    %856 = vector.extract_strided_slice %837 {offsets = [0, 64], sizes = [1, 32], strides = [1, 1]} : vector<1x96xf32> to vector<1x32xf32>
    %857 = vector.extract_strided_slice %839 {offsets = [0, 64], sizes = [1, 32], strides = [1, 1]} : vector<1x96xf32> to vector<1x32xf32>
    %858 = arith.mulf %847, %857 : vector<1x32xf32>
    %859 = arith.addf %856, %858 : vector<1x32xf32>
    %860 = math.tanh %859 : vector<1x32xf32>
    %cst_209 = arith.constant 1.000000e+00 : f32
    %861 = vector.broadcast %cst_209 : f32 to vector<1x32xf32>
    %862 = arith.subf %861, %855 : vector<1x32xf32>
    %863 = arith.mulf %862, %860 : vector<1x32xf32>
    %864 = arith.mulf %855, %835 : vector<1x32xf32>
    %865 = arith.addf %863, %864 : vector<1x32xf32>
    %c1_210 = arith.constant 1 : index
    %c0_211 = arith.constant 0 : index
    %866 = vector.load %arg16[%c1_210, %c0_211] : memref<8x32xf32, #tpu.memory_space<vmem>>, vector<1x32xf32>
    tpu.vector_store %arg16[%c1_210, %c0_211], %865 {strides = array<i32>} : memref<8x32xf32, #tpu.memory_space<vmem>>, vector<1x32xf32>,
    %867 = vector.extract_strided_slice %805 {offsets = [2, 0], sizes = [1, 96], strides = [1, 1]} : vector<8x96xf32> to vector<1x96xf32>
    %cst_212 = arith.constant dense<0.000000e+00> : vector<1x96xf32>
    %868 = tpu.matmul %865, %7, %cst_212 {dimension_numbers = #tpu.dot_dimension_numbers<[1], [0], [0], [1], [0, 0, 1, 1], [], []>} : vector<1x32xf32>, vector<32x96xf32>, vector<1x96xf32> -> vector<1x96xf32>
    %869 = arith.addf %868, %9 : vector<1x96xf32>
    %870 = vector.extract_strided_slice %867 {offsets = [0, 0], sizes = [1, 32], strides = [1, 1]} : vector<1x96xf32> to vector<1x32xf32>
    %871 = vector.extract_strided_slice %869 {offsets = [0, 0], sizes = [1, 32], strides = [1, 1]} : vector<1x96xf32> to vector<1x32xf32>
    %872 = arith.addf %870, %871 : vector<1x32xf32>
    %873 = arith.negf %872 : vector<1x32xf32>
    %874 = math.exp %873 : vector<1x32xf32>
    %cst_213 = arith.constant 1.000000e+00 : f32
    %875 = vector.broadcast %cst_213 : f32 to vector<1x32xf32>
    %876 = arith.addf %875, %874 : vector<1x32xf32>
    %877 = arith.divf %875, %876 : vector<1x32xf32>
    %878 = vector.extract_strided_slice %867 {offsets = [0, 32], sizes = [1, 32], strides = [1, 1]} : vector<1x96xf32> to vector<1x32xf32>
    %879 = vector.extract_strided_slice %869 {offsets = [0, 32], sizes = [1, 32], strides = [1, 1]} : vector<1x96xf32> to vector<1x32xf32>
    %880 = arith.addf %878, %879 : vector<1x32xf32>
    %881 = arith.negf %880 : vector<1x32xf32>
    %882 = math.exp %881 : vector<1x32xf32>
    %cst_214 = arith.constant 1.000000e+00 : f32
    %883 = vector.broadcast %cst_214 : f32 to vector<1x32xf32>
    %884 = arith.addf %883, %882 : vector<1x32xf32>
    %885 = arith.divf %883, %884 : vector<1x32xf32>
    %886 = vector.extract_strided_slice %867 {offsets = [0, 64], sizes = [1, 32], strides = [1, 1]} : vector<1x96xf32> to vector<1x32xf32>
    %887 = vector.extract_strided_slice %869 {offsets = [0, 64], sizes = [1, 32], strides = [1, 1]} : vector<1x96xf32> to vector<1x32xf32>
    %888 = arith.mulf %877, %887 : vector<1x32xf32>
    %889 = arith.addf %886, %888 : vector<1x32xf32>
    %890 = math.tanh %889 : vector<1x32xf32>
    %cst_215 = arith.constant 1.000000e+00 : f32
    %891 = vector.broadcast %cst_215 : f32 to vector<1x32xf32>
    %892 = arith.subf %891, %885 : vector<1x32xf32>
    %893 = arith.mulf %892, %890 : vector<1x32xf32>
    %894 = arith.mulf %885, %865 : vector<1x32xf32>
    %895 = arith.addf %893, %894 : vector<1x32xf32>
    %c2_216 = arith.constant 2 : index
    %c0_217 = arith.constant 0 : index
    %896 = vector.load %arg16[%c2_216, %c0_217] : memref<8x32xf32, #tpu.memory_space<vmem>>, vector<1x32xf32>
    tpu.vector_store %arg16[%c2_216, %c0_217], %895 {strides = array<i32>} : memref<8x32xf32, #tpu.memory_space<vmem>>, vector<1x32xf32>,
    %897 = vector.extract_strided_slice %805 {offsets = [3, 0], sizes = [1, 96], strides = [1, 1]} : vector<8x96xf32> to vector<1x96xf32>
    %cst_218 = arith.constant dense<0.000000e+00> : vector<1x96xf32>
    %898 = tpu.matmul %895, %7, %cst_218 {dimension_numbers = #tpu.dot_dimension_numbers<[1], [0], [0], [1], [0, 0, 1, 1], [], []>} : vector<1x32xf32>, vector<32x96xf32>, vector<1x96xf32> -> vector<1x96xf32>
    %899 = arith.addf %898, %9 : vector<1x96xf32>
    %900 = vector.extract_strided_slice %897 {offsets = [0, 0], sizes = [1, 32], strides = [1, 1]} : vector<1x96xf32> to vector<1x32xf32>
    %901 = vector.extract_strided_slice %899 {offsets = [0, 0], sizes = [1, 32], strides = [1, 1]} : vector<1x96xf32> to vector<1x32xf32>
    %902 = arith.addf %900, %901 : vector<1x32xf32>
    %903 = arith.negf %902 : vector<1x32xf32>
    %904 = math.exp %903 : vector<1x32xf32>
    %cst_219 = arith.constant 1.000000e+00 : f32
    %905 = vector.broadcast %cst_219 : f32 to vector<1x32xf32>
    %906 = arith.addf %905, %904 : vector<1x32xf32>
    %907 = arith.divf %905, %906 : vector<1x32xf32>
    %908 = vector.extract_strided_slice %897 {offsets = [0, 32], sizes = [1, 32], strides = [1, 1]} : vector<1x96xf32> to vector<1x32xf32>
    %909 = vector.extract_strided_slice %899 {offsets = [0, 32], sizes = [1, 32], strides = [1, 1]} : vector<1x96xf32> to vector<1x32xf32>
    %910 = arith.addf %908, %909 : vector<1x32xf32>
    %911 = arith.negf %910 : vector<1x32xf32>
    %912 = math.exp %911 : vector<1x32xf32>
    %cst_220 = arith.constant 1.000000e+00 : f32
    %913 = vector.broadcast %cst_220 : f32 to vector<1x32xf32>
    %914 = arith.addf %913, %912 : vector<1x32xf32>
    %915 = arith.divf %913, %914 : vector<1x32xf32>
    %916 = vector.extract_strided_slice %897 {offsets = [0, 64], sizes = [1, 32], strides = [1, 1]} : vector<1x96xf32> to vector<1x32xf32>
    %917 = vector.extract_strided_slice %899 {offsets = [0, 64], sizes = [1, 32], strides = [1, 1]} : vector<1x96xf32> to vector<1x32xf32>
    %918 = arith.mulf %907, %917 : vector<1x32xf32>
    %919 = arith.addf %916, %918 : vector<1x32xf32>
    %920 = math.tanh %919 : vector<1x32xf32>
    %cst_221 = arith.constant 1.000000e+00 : f32
    %921 = vector.broadcast %cst_221 : f32 to vector<1x32xf32>
    %922 = arith.subf %921, %915 : vector<1x32xf32>
    %923 = arith.mulf %922, %920 : vector<1x32xf32>
    %924 = arith.mulf %915, %895 : vector<1x32xf32>
    %925 = arith.addf %923, %924 : vector<1x32xf32>
    %c3_222 = arith.constant 3 : index
    %c0_223 = arith.constant 0 : index
    %926 = vector.load %arg16[%c3_222, %c0_223] : memref<8x32xf32, #tpu.memory_space<vmem>>, vector<1x32xf32>
    tpu.vector_store %arg16[%c3_222, %c0_223], %925 {strides = array<i32>} : memref<8x32xf32, #tpu.memory_space<vmem>>, vector<1x32xf32>,
    %927 = vector.extract_strided_slice %805 {offsets = [4, 0], sizes = [1, 96], strides = [1, 1]} : vector<8x96xf32> to vector<1x96xf32>
    %cst_224 = arith.constant dense<0.000000e+00> : vector<1x96xf32>
    %928 = tpu.matmul %925, %7, %cst_224 {dimension_numbers = #tpu.dot_dimension_numbers<[1], [0], [0], [1], [0, 0, 1, 1], [], []>} : vector<1x32xf32>, vector<32x96xf32>, vector<1x96xf32> -> vector<1x96xf32>
    %929 = arith.addf %928, %9 : vector<1x96xf32>
    %930 = vector.extract_strided_slice %927 {offsets = [0, 0], sizes = [1, 32], strides = [1, 1]} : vector<1x96xf32> to vector<1x32xf32>
    %931 = vector.extract_strided_slice %929 {offsets = [0, 0], sizes = [1, 32], strides = [1, 1]} : vector<1x96xf32> to vector<1x32xf32>
    %932 = arith.addf %930, %931 : vector<1x32xf32>
    %933 = arith.negf %932 : vector<1x32xf32>
    %934 = math.exp %933 : vector<1x32xf32>
    %cst_225 = arith.constant 1.000000e+00 : f32
    %935 = vector.broadcast %cst_225 : f32 to vector<1x32xf32>
    %936 = arith.addf %935, %934 : vector<1x32xf32>
    %937 = arith.divf %935, %936 : vector<1x32xf32>
    %938 = vector.extract_strided_slice %927 {offsets = [0, 32], sizes = [1, 32], strides = [1, 1]} : vector<1x96xf32> to vector<1x32xf32>
    %939 = vector.extract_strided_slice %929 {offsets = [0, 32], sizes = [1, 32], strides = [1, 1]} : vector<1x96xf32> to vector<1x32xf32>
    %940 = arith.addf %938, %939 : vector<1x32xf32>
    %941 = arith.negf %940 : vector<1x32xf32>
    %942 = math.exp %941 : vector<1x32xf32>
    %cst_226 = arith.constant 1.000000e+00 : f32
    %943 = vector.broadcast %cst_226 : f32 to vector<1x32xf32>
    %944 = arith.addf %943, %942 : vector<1x32xf32>
    %945 = arith.divf %943, %944 : vector<1x32xf32>
    %946 = vector.extract_strided_slice %927 {offsets = [0, 64], sizes = [1, 32], strides = [1, 1]} : vector<1x96xf32> to vector<1x32xf32>
    %947 = vector.extract_strided_slice %929 {offsets = [0, 64], sizes = [1, 32], strides = [1, 1]} : vector<1x96xf32> to vector<1x32xf32>
    %948 = arith.mulf %937, %947 : vector<1x32xf32>
    %949 = arith.addf %946, %948 : vector<1x32xf32>
    %950 = math.tanh %949 : vector<1x32xf32>
    %cst_227 = arith.constant 1.000000e+00 : f32
    %951 = vector.broadcast %cst_227 : f32 to vector<1x32xf32>
    %952 = arith.subf %951, %945 : vector<1x32xf32>
    %953 = arith.mulf %952, %950 : vector<1x32xf32>
    %954 = arith.mulf %945, %925 : vector<1x32xf32>
    %955 = arith.addf %953, %954 : vector<1x32xf32>
    %c4_228 = arith.constant 4 : index
    %c0_229 = arith.constant 0 : index
    %956 = vector.load %arg16[%c4_228, %c0_229] : memref<8x32xf32, #tpu.memory_space<vmem>>, vector<1x32xf32>
    tpu.vector_store %arg16[%c4_228, %c0_229], %955 {strides = array<i32>} : memref<8x32xf32, #tpu.memory_space<vmem>>, vector<1x32xf32>,
    %957 = vector.extract_strided_slice %805 {offsets = [5, 0], sizes = [1, 96], strides = [1, 1]} : vector<8x96xf32> to vector<1x96xf32>
    %cst_230 = arith.constant dense<0.000000e+00> : vector<1x96xf32>
    %958 = tpu.matmul %955, %7, %cst_230 {dimension_numbers = #tpu.dot_dimension_numbers<[1], [0], [0], [1], [0, 0, 1, 1], [], []>} : vector<1x32xf32>, vector<32x96xf32>, vector<1x96xf32> -> vector<1x96xf32>
    %959 = arith.addf %958, %9 : vector<1x96xf32>
    %960 = vector.extract_strided_slice %957 {offsets = [0, 0], sizes = [1, 32], strides = [1, 1]} : vector<1x96xf32> to vector<1x32xf32>
    %961 = vector.extract_strided_slice %959 {offsets = [0, 0], sizes = [1, 32], strides = [1, 1]} : vector<1x96xf32> to vector<1x32xf32>
    %962 = arith.addf %960, %961 : vector<1x32xf32>
    %963 = arith.negf %962 : vector<1x32xf32>
    %964 = math.exp %963 : vector<1x32xf32>
    %cst_231 = arith.constant 1.000000e+00 : f32
    %965 = vector.broadcast %cst_231 : f32 to vector<1x32xf32>
    %966 = arith.addf %965, %964 : vector<1x32xf32>
    %967 = arith.divf %965, %966 : vector<1x32xf32>
    %968 = vector.extract_strided_slice %957 {offsets = [0, 32], sizes = [1, 32], strides = [1, 1]} : vector<1x96xf32> to vector<1x32xf32>
    %969 = vector.extract_strided_slice %959 {offsets = [0, 32], sizes = [1, 32], strides = [1, 1]} : vector<1x96xf32> to vector<1x32xf32>
    %970 = arith.addf %968, %969 : vector<1x32xf32>
    %971 = arith.negf %970 : vector<1x32xf32>
    %972 = math.exp %971 : vector<1x32xf32>
    %cst_232 = arith.constant 1.000000e+00 : f32
    %973 = vector.broadcast %cst_232 : f32 to vector<1x32xf32>
    %974 = arith.addf %973, %972 : vector<1x32xf32>
    %975 = arith.divf %973, %974 : vector<1x32xf32>
    %976 = vector.extract_strided_slice %957 {offsets = [0, 64], sizes = [1, 32], strides = [1, 1]} : vector<1x96xf32> to vector<1x32xf32>
    %977 = vector.extract_strided_slice %959 {offsets = [0, 64], sizes = [1, 32], strides = [1, 1]} : vector<1x96xf32> to vector<1x32xf32>
    %978 = arith.mulf %967, %977 : vector<1x32xf32>
    %979 = arith.addf %976, %978 : vector<1x32xf32>
    %980 = math.tanh %979 : vector<1x32xf32>
    %cst_233 = arith.constant 1.000000e+00 : f32
    %981 = vector.broadcast %cst_233 : f32 to vector<1x32xf32>
    %982 = arith.subf %981, %975 : vector<1x32xf32>
    %983 = arith.mulf %982, %980 : vector<1x32xf32>
    %984 = arith.mulf %975, %955 : vector<1x32xf32>
    %985 = arith.addf %983, %984 : vector<1x32xf32>
    %c5_234 = arith.constant 5 : index
    %c0_235 = arith.constant 0 : index
    %986 = vector.load %arg16[%c5_234, %c0_235] : memref<8x32xf32, #tpu.memory_space<vmem>>, vector<1x32xf32>
    tpu.vector_store %arg16[%c5_234, %c0_235], %985 {strides = array<i32>} : memref<8x32xf32, #tpu.memory_space<vmem>>, vector<1x32xf32>,
    %987 = vector.extract_strided_slice %805 {offsets = [6, 0], sizes = [1, 96], strides = [1, 1]} : vector<8x96xf32> to vector<1x96xf32>
    %cst_236 = arith.constant dense<0.000000e+00> : vector<1x96xf32>
    %988 = tpu.matmul %985, %7, %cst_236 {dimension_numbers = #tpu.dot_dimension_numbers<[1], [0], [0], [1], [0, 0, 1, 1], [], []>} : vector<1x32xf32>, vector<32x96xf32>, vector<1x96xf32> -> vector<1x96xf32>
    %989 = arith.addf %988, %9 : vector<1x96xf32>
    %990 = vector.extract_strided_slice %987 {offsets = [0, 0], sizes = [1, 32], strides = [1, 1]} : vector<1x96xf32> to vector<1x32xf32>
    %991 = vector.extract_strided_slice %989 {offsets = [0, 0], sizes = [1, 32], strides = [1, 1]} : vector<1x96xf32> to vector<1x32xf32>
    %992 = arith.addf %990, %991 : vector<1x32xf32>
    %993 = arith.negf %992 : vector<1x32xf32>
    %994 = math.exp %993 : vector<1x32xf32>
    %cst_237 = arith.constant 1.000000e+00 : f32
    %995 = vector.broadcast %cst_237 : f32 to vector<1x32xf32>
    %996 = arith.addf %995, %994 : vector<1x32xf32>
    %997 = arith.divf %995, %996 : vector<1x32xf32>
    %998 = vector.extract_strided_slice %987 {offsets = [0, 32], sizes = [1, 32], strides = [1, 1]} : vector<1x96xf32> to vector<1x32xf32>
    %999 = vector.extract_strided_slice %989 {offsets = [0, 32], sizes = [1, 32], strides = [1, 1]} : vector<1x96xf32> to vector<1x32xf32>
    %1000 = arith.addf %998, %999 : vector<1x32xf32>
    %1001 = arith.negf %1000 : vector<1x32xf32>
    %1002 = math.exp %1001 : vector<1x32xf32>
    %cst_238 = arith.constant 1.000000e+00 : f32
    %1003 = vector.broadcast %cst_238 : f32 to vector<1x32xf32>
    %1004 = arith.addf %1003, %1002 : vector<1x32xf32>
    %1005 = arith.divf %1003, %1004 : vector<1x32xf32>
    %1006 = vector.extract_strided_slice %987 {offsets = [0, 64], sizes = [1, 32], strides = [1, 1]} : vector<1x96xf32> to vector<1x32xf32>
    %1007 = vector.extract_strided_slice %989 {offsets = [0, 64], sizes = [1, 32], strides = [1, 1]} : vector<1x96xf32> to vector<1x32xf32>
    %1008 = arith.mulf %997, %1007 : vector<1x32xf32>
    %1009 = arith.addf %1006, %1008 : vector<1x32xf32>
    %1010 = math.tanh %1009 : vector<1x32xf32>
    %cst_239 = arith.constant 1.000000e+00 : f32
    %1011 = vector.broadcast %cst_239 : f32 to vector<1x32xf32>
    %1012 = arith.subf %1011, %1005 : vector<1x32xf32>
    %1013 = arith.mulf %1012, %1010 : vector<1x32xf32>
    %1014 = arith.mulf %1005, %985 : vector<1x32xf32>
    %1015 = arith.addf %1013, %1014 : vector<1x32xf32>
    %c6_240 = arith.constant 6 : index
    %c0_241 = arith.constant 0 : index
    %1016 = vector.load %arg16[%c6_240, %c0_241] : memref<8x32xf32, #tpu.memory_space<vmem>>, vector<1x32xf32>
    tpu.vector_store %arg16[%c6_240, %c0_241], %1015 {strides = array<i32>} : memref<8x32xf32, #tpu.memory_space<vmem>>, vector<1x32xf32>,
    %1017 = vector.extract_strided_slice %805 {offsets = [7, 0], sizes = [1, 96], strides = [1, 1]} : vector<8x96xf32> to vector<1x96xf32>
    %cst_242 = arith.constant dense<0.000000e+00> : vector<1x96xf32>
    %1018 = tpu.matmul %1015, %7, %cst_242 {dimension_numbers = #tpu.dot_dimension_numbers<[1], [0], [0], [1], [0, 0, 1, 1], [], []>} : vector<1x32xf32>, vector<32x96xf32>, vector<1x96xf32> -> vector<1x96xf32>
    %1019 = arith.addf %1018, %9 : vector<1x96xf32>
    %1020 = vector.extract_strided_slice %1017 {offsets = [0, 0], sizes = [1, 32], strides = [1, 1]} : vector<1x96xf32> to vector<1x32xf32>
    %1021 = vector.extract_strided_slice %1019 {offsets = [0, 0], sizes = [1, 32], strides = [1, 1]} : vector<1x96xf32> to vector<1x32xf32>
    %1022 = arith.addf %1020, %1021 : vector<1x32xf32>
    %1023 = arith.negf %1022 : vector<1x32xf32>
    %1024 = math.exp %1023 : vector<1x32xf32>
    %cst_243 = arith.constant 1.000000e+00 : f32
    %1025 = vector.broadcast %cst_243 : f32 to vector<1x32xf32>
    %1026 = arith.addf %1025, %1024 : vector<1x32xf32>
    %1027 = arith.divf %1025, %1026 : vector<1x32xf32>
    %1028 = vector.extract_strided_slice %1017 {offsets = [0, 32], sizes = [1, 32], strides = [1, 1]} : vector<1x96xf32> to vector<1x32xf32>
    %1029 = vector.extract_strided_slice %1019 {offsets = [0, 32], sizes = [1, 32], strides = [1, 1]} : vector<1x96xf32> to vector<1x32xf32>
    %1030 = arith.addf %1028, %1029 : vector<1x32xf32>
    %1031 = arith.negf %1030 : vector<1x32xf32>
    %1032 = math.exp %1031 : vector<1x32xf32>
    %cst_244 = arith.constant 1.000000e+00 : f32
    %1033 = vector.broadcast %cst_244 : f32 to vector<1x32xf32>
    %1034 = arith.addf %1033, %1032 : vector<1x32xf32>
    %1035 = arith.divf %1033, %1034 : vector<1x32xf32>
    %1036 = vector.extract_strided_slice %1017 {offsets = [0, 64], sizes = [1, 32], strides = [1, 1]} : vector<1x96xf32> to vector<1x32xf32>
    %1037 = vector.extract_strided_slice %1019 {offsets = [0, 64], sizes = [1, 32], strides = [1, 1]} : vector<1x96xf32> to vector<1x32xf32>
    %1038 = arith.mulf %1027, %1037 : vector<1x32xf32>
    %1039 = arith.addf %1036, %1038 : vector<1x32xf32>
    %1040 = math.tanh %1039 : vector<1x32xf32>
    %cst_245 = arith.constant 1.000000e+00 : f32
    %1041 = vector.broadcast %cst_245 : f32 to vector<1x32xf32>
    %1042 = arith.subf %1041, %1035 : vector<1x32xf32>
    %1043 = arith.mulf %1042, %1040 : vector<1x32xf32>
    %1044 = arith.mulf %1035, %1015 : vector<1x32xf32>
    %1045 = arith.addf %1043, %1044 : vector<1x32xf32>
    %c7_246 = arith.constant 7 : index
    %c0_247 = arith.constant 0 : index
    %1046 = vector.load %arg16[%c7_246, %c0_247] : memref<8x32xf32, #tpu.memory_space<vmem>>, vector<1x32xf32>
    tpu.vector_store %arg16[%c7_246, %c0_247], %1045 {strides = array<i32>} : memref<8x32xf32, #tpu.memory_space<vmem>>, vector<1x32xf32>,
    %c0_248 = arith.constant 0 : index
    %c0_249 = arith.constant 0 : index
    %1047 = vector.load %arg16[%c0_248, %c0_249] : memref<8x32xf32, #tpu.memory_space<vmem>>, vector<8x32xf32>
    %cst_250 = arith.constant dense<0.000000e+00> : vector<8x32xf32>
    %1048 = tpu.matmul %1047, %10, %cst_250 {dimension_numbers = #tpu.dot_dimension_numbers<[1], [0], [0], [1], [0, 0, 1, 1], [], []>} : vector<8x32xf32>, vector<32x32xf32>, vector<8x32xf32> -> vector<8x32xf32>
    %1049 = vector.broadcast %11 : vector<1x32xf32> to vector<8x32xf32>
    %1050 = arith.addf %1048, %1049 : vector<8x32xf32>
    %c1_251 = arith.constant 1 : index
    %c0_252 = arith.constant 0 : index
    %c0_253 = arith.constant 0 : index
    %1051 = vector.load %arg14[%c1_251, %c0_252, %c0_253] : memref<2x8x32xf32, #tpu.memory_space<vmem>>, vector<1x8x32xf32>
    %1052 = vector.shape_cast %1051 : vector<1x8x32xf32> to vector<8x32xf32>
    %1053 = vector.shape_cast %1050 : vector<8x32xf32> to vector<1x8x32xf32>
    tpu.vector_store %arg14[%c1_251, %c0_252, %c0_253], %1053 {strides = array<i32>} : memref<2x8x32xf32, #tpu.memory_space<vmem>>, vector<1x8x32xf32>,
    %1054 = tpu.concatenate %800, %1045 in 0 : vector<1x32xf32>, vector<1x32xf32> -> vector<2x32xf32>
    %c1_254 = arith.constant 1 : index
    %c0_255 = arith.constant 0 : index
    %c0_256 = arith.constant 0 : index
    %1055 = vector.load %arg15[%c1_254, %c0_255, %c0_256] : memref<2x2x32xf32, #tpu.memory_space<vmem>>, vector<1x2x32xf32>
    %1056 = vector.shape_cast %1055 : vector<1x2x32xf32> to vector<2x32xf32>
    %1057 = vector.shape_cast %1054 : vector<2x32xf32> to vector<1x2x32xf32>
    tpu.vector_store %arg15[%c1_254, %c0_255, %c0_256], %1057 {strides = array<i32>} : memref<2x2x32xf32, #tpu.memory_space<vmem>>, vector<1x2x32xf32>,
    return
  }
  func.func @transform_0(%arg0: i32) -> (i32, i32, i32) {
    %c0_i32 = arith.constant 0 : i32
    %c0_i32_0 = arith.constant 0 : i32
    %c0_i32_1 = arith.constant 0 : i32
    %c0_i32_2 = arith.constant 0 : i32
    return %c0_i32, %c0_i32_0, %c0_i32_1 : i32, i32, i32
  }
  func.func @transform_1(%arg0: i32) -> (i32, i32) {
    %c0_i32 = arith.constant 0 : i32
    %c0_i32_0 = arith.constant 0 : i32
    %c0_i32_1 = arith.constant 0 : i32
    return %c0_i32, %c0_i32_0 : i32, i32
  }
  func.func @transform_2(%arg0: i32) -> (i32, i32) {
    %c0_i32 = arith.constant 0 : i32
    %c0_i32_0 = arith.constant 0 : i32
    %c0_i32_1 = arith.constant 0 : i32
    return %c0_i32, %c0_i32_0 : i32, i32
  }
  func.func @transform_3(%arg0: i32) -> (i32, i32) {
    %c0_i32 = arith.constant 0 : i32
    %c0_i32_0 = arith.constant 0 : i32
    %c0_i32_1 = arith.constant 0 : i32
    return %c0_i32, %c0_i32_0 : i32, i32
  }
  func.func @transform_4(%arg0: i32) -> (i32, i32) {
    %c0_i32 = arith.constant 0 : i32
    %c0_i32_0 = arith.constant 0 : i32
    %c0_i32_1 = arith.constant 0 : i32
    return %c0_i32, %c0_i32_0 : i32, i32
  }
  func.func @transform_5(%arg0: i32) -> (i32, i32) {
    %c0_i32 = arith.constant 0 : i32
    %c0_i32_0 = arith.constant 0 : i32
    %c0_i32_1 = arith.constant 0 : i32
    return %c0_i32, %c0_i32_0 : i32, i32
  }
  func.func @transform_6(%arg0: i32) -> (i32, i32) {
    %c0_i32 = arith.constant 0 : i32
    %c0_i32_0 = arith.constant 0 : i32
    %c0_i32_1 = arith.constant 0 : i32
    return %c0_i32, %c0_i32_0 : i32, i32
  }
  func.func @transform_7(%arg0: i32) -> (i32, i32) {
    %c0_i32 = arith.constant 0 : i32
    %c0_i32_0 = arith.constant 0 : i32
    %c0_i32_1 = arith.constant 0 : i32
    return %c0_i32, %c0_i32_0 : i32, i32
  }
  func.func @transform_8(%arg0: i32) -> (i32, i32) {
    %c0_i32 = arith.constant 0 : i32
    %c0_i32_0 = arith.constant 0 : i32
    %c0_i32_1 = arith.constant 0 : i32
    return %c0_i32, %c0_i32_0 : i32, i32
  }
  func.func @transform_9(%arg0: i32) -> (i32, i32) {
    %c0_i32 = arith.constant 0 : i32
    %c0_i32_0 = arith.constant 0 : i32
    %c0_i32_1 = arith.constant 0 : i32
    return %c0_i32, %c0_i32_0 : i32, i32
  }
  func.func @transform_10(%arg0: i32) -> (i32, i32) {
    %c0_i32 = arith.constant 0 : i32
    %c0_i32_0 = arith.constant 0 : i32
    %c0_i32_1 = arith.constant 0 : i32
    return %c0_i32, %c0_i32_0 : i32, i32
  }
  func.func @transform_11(%arg0: i32) -> (i32, i32) {
    %c0_i32 = arith.constant 0 : i32
    %c0_i32_0 = arith.constant 0 : i32
    %c0_i32_1 = arith.constant 0 : i32
    return %c0_i32, %c0_i32_0 : i32, i32
  }
  func.func @transform_12(%arg0: i32) -> (i32, i32) {
    %c0_i32 = arith.constant 0 : i32
    %c0_i32_0 = arith.constant 0 : i32
    %c0_i32_1 = arith.constant 0 : i32
    return %c0_i32, %c0_i32_0 : i32, i32
  }
  func.func @transform_13(%arg0: i32) -> (i32, i32, i32) {
    %c0_i32 = arith.constant 0 : i32
    %c0_i32_0 = arith.constant 0 : i32
    %c0_i32_1 = arith.constant 0 : i32
    %c0_i32_2 = arith.constant 0 : i32
    return %c0_i32, %c0_i32_0, %c0_i32_1 : i32, i32, i32
  }
  func.func @transform_14(%arg0: i32) -> (i32, i32, i32) {
    %c0_i32 = arith.constant 0 : i32
    %c0_i32_0 = arith.constant 0 : i32
    %c0_i32_1 = arith.constant 0 : i32
    %c0_i32_2 = arith.constant 0 : i32
    return %c0_i32, %c0_i32_0, %c0_i32_1 : i32, i32, i32
  }
}

</mosaic_0001>

<bundles_post_ra>
// kernel: tpu_custom_call.1
= control target key start
LH: loop header
LB: loop body
LE: loop exit
PB: predicated region body
PF: predicated region fallthrough
CT: control target
= control target key end

     0   :  { %20 = vsyncpa [#allocation4], 0  ;;  %s6703_s0 = inlined_call_operand.hbm [shape: f32[2,8,16], index: 0, kind: input, shape index: {}]   ;;  %s6704_s1 = inlined_call_operand.hbm [shape: f32[16,16], index: 1, kind: input, shape index: {}]   ;;  %s6705_s2 = inlined_call_operand.vmem [shape: f32[1,16], index: 2, kind: input, shape index: {}]   ;;  %s6706_s3 = inlined_call_operand.hbm [shape: f32[16,96], index: 3, kind: input, shape index: {}]   ;;  %s6707_s4 = inlined_call_operand.hbm [shape: f32[32,96], index: 4, kind: input, shape index: {}]   ;;  %s6708_s5 = inlined_call_operand.vmem [shape: f32[1,96], index: 5, kind: input, shape index: {}]   ;;  %s6709_s6 = inlined_call_operand.vmem [shape: f32[1,96], index: 6, kind: input, shape index: {}]   ;;  %s6710_s7 = inlined_call_operand.hbm [shape: f32[32,96], index: 7, kind: input, shape index: {}]   ;;  %s6711_s8 = inlined_call_operand.hbm [shape: f32[32,96], index: 8, kind: input, shape index: {}]   ;;  %s6712_s9 = inlined_call_operand.vmem [shape: f32[1,96], index: 9, kind: input, shape index: {}]   ;;  %s6713_s10 = inlined_call_operand.vmem [shape: f32[1,96], index: 10, kind: input, shape index: {}]   ;;  %s6714_s11 = inlined_call_operand.hbm [shape: f32[32,32], index: 11, kind: input, shape index: {}]   ;;  %s6715_s12 = inlined_call_operand.vmem [shape: f32[1,32], index: 12, kind: input, shape index: {}]   ;;  %s6716_s13 = inlined_call_operand.hbm [shape: f32[2,8,32], index: 13, kind: output, shape index: {0}]   ;;  %s6717_s14 = inlined_call_operand.hbm [shape: f32[2,2,32], index: 14, kind: output, shape index: {1}]  }
   0x1   :  { %21 = vsyncpa [#allocation7], 0 }
   0x2   :  { %22 = vsyncpa [#allocation10], 0 }
   0x3   :  { %23 = vsyncpa [#allocation13], 0 }
   0x4   :  { %24 = vsyncpa [#allocation5], 0 }
   0x5   :  { %25 = vsyncpa [#allocation17], 0  ;;  %s5648_s29 = smov [#allocation6]   ;;  %s5649_s15 = smov [#allocation9]  }
   0x6   :  { %s43_s30 = sshll.u32 %s5648_s29, 4  ;;  %s69_s16 = sshll.u32 %s5649_s15, 4  ;;  %s44_s30 = int_to_ptr.vmem [resolvable:$true] %s43_s30  ;;  %s70_s16 = int_to_ptr.vmem [resolvable:$true] %s69_s16 }
   0x7   :  { %s5464_s17 = scalar_lea.vmem %s44_s30, 256  ;;  %p5469_p1 = scmp.lt.s32.totalorder %s44_s30, %s44_s30 }
   0x8   :  { %p5465_p0 = scmp.ne.s32.totalorder %s44_s30, %s5464_s17  ;;  %p5470_p2 = scmp.lt.s32.totalorder %s5464_s17, %s5464_s17 }
   0xa   :  { %p5471_p3 = por %p5470_p2, %p5469_p1 }
   0xc   :  { %p5472_p4 = pnand %p5471_p3, %p5465_p0 }
   0xe   :  { %5475 = shalt.err (!%p5472_p4)
}
   0xf   :  { %s5650_s18 = smov 128   ;;  %s5651_s19 = smov 8  }
  0x10   :  { %49 = dma.hbm_to_vmem [thread:$0]  %s6704_s1, 256, %s44_s30, [#allocation7], %s5650_s18, %s5650_s18, %s5651_s19  }
  0x11   :  { %s5484_s22 = scalar_lea.vmem %s70_s16, 512  ;;  %p5489_p6 = scmp.lt.s32.totalorder %s70_s16, %s70_s16 }
  0x12   :  { %p5485_p5 = scmp.ne.s32.totalorder %s70_s16, %s5484_s22  ;;  %p5490_p7 = scmp.lt.s32.totalorder %s5484_s22, %s5484_s22 }
  0x14   :  { %p5491_p8 = por %p5490_p7, %p5489_p6 }
  0x16   :  { %p5492_p9 = pnand %p5491_p8, %p5485_p5 }
  0x18   :  { %5495 = shalt.err (!%p5492_p9)
}
  0x19   :  { %75 = dma.hbm_to_vmem [thread:$0]  %s6707_s4, 512, %s70_s16, [#allocation10], %s5650_s18, %s5650_s18, %s5651_s19  }
  0x1a   :  { %s5652_s25 = smov [#allocation12]   ;;  %s5653_s27 = smov [#allocation3]  }
  0x1b   :  { %s97_s26 = sshll.u32 %s5652_s25, 4  ;;  %s31_s28 = sshll.u32 %s5653_s27, 4  ;;  %s98_s26 = int_to_ptr.vmem [resolvable:$true] %s97_s26  ;;  %s32_s28 = int_to_ptr.vmem [resolvable:$true] %s31_s28 }
  0x1c   :  { %s5504_s1 = scalar_lea.vmem %s98_s26, 512  ;;  %p5509_p11 = scmp.lt.s32.totalorder %s98_s26, %s98_s26 }
  0x1d   :  { %p5505_p10 = scmp.ne.s32.totalorder %s98_s26, %s5504_s1  ;;  %p5510_p12 = scmp.lt.s32.totalorder %s5504_s1, %s5504_s1 }
  0x1f   :  { %p5511_p13 = por %p5510_p12, %p5509_p11 }
  0x21   :  { %p5512_p0 = pnand %p5511_p13, %p5505_p10 }
  0x23   :  { %5515 = shalt.err (!%p5512_p0)
}
  0x24   :  { %103 = dma.hbm_to_vmem [thread:$0]  %s6711_s8, 512, %s98_s26, [#allocation13], %s5650_s18, %s5650_s18, %s5651_s19  }
  0x25   :  { %s5524_s4 = scalar_lea.vmem %s32_s28, 256  ;;  %p5529_p2 = scmp.lt.s32.totalorder %s32_s28, %s32_s28 }
  0x26   :  { %p5525_p1 = scmp.ne.s32.totalorder %s32_s28, %s5524_s4  ;;  %p5530_p3 = scmp.lt.s32.totalorder %s5524_s4, %s5524_s4 }
  0x28   :  { %p5531_p4 = por %p5530_p3, %p5529_p2 }
  0x2a   :  { %p5532_p5 = pnand %p5531_p4, %p5525_p1 }
  0x2c   :  { %5535 = shalt.err (!%p5532_p5)
}
  0x2d   :  { %37 = dma.hbm_to_vmem [thread:$0]  %s6703_s0, 256, %s32_s28, [#allocation4], %s5650_s18, %s5650_s18, %s5651_s19  }
  0x2e   :  { %s5654_s17 = smov [#allocation8]   ;;  %s5655_s21 = smov [#allocation11]  }
  0x2f   :  { %s57_s20 = sshll.u32 %s5654_s17, 4  ;;  %s85_s22 = sshll.u32 %s5655_s21, 4  ;;  %s58_s20 = int_to_ptr.vmem [resolvable:$true] %s57_s20  ;;  %s86_s22 = int_to_ptr.vmem [resolvable:$true] %s85_s22 }
  0x30   :  { %s5544_s8 = scalar_lea.vmem %s58_s20, 256  ;;  %p5549_p7 = scmp.lt.s32.totalorder %s58_s20, %s58_s20 }
  0x31   :  { %p5545_p6 = scmp.ne.s32.totalorder %s58_s20, %s5544_s8  ;;  %p5550_p8 = scmp.lt.s32.totalorder %s5544_s8, %s5544_s8 }
  0x33   :  { %p5551_p9 = por %p5550_p8, %p5549_p7 }
  0x35   :  { %p5552_p10 = pnand %p5551_p9, %p5545_p6 }
  0x37   :  { %5555 = shalt.err (!%p5552_p10)
}
  0x38   :  { %63 = dma.hbm_to_vmem [thread:$0]  %s6706_s3, 256, %s58_s20, [#allocation7], %s5650_s18, %s5650_s18, %s5651_s19  }
  0x39   :  { %s5564_s0 = scalar_lea.vmem %s86_s22, 512  ;;  %p5569_p12 = scmp.lt.s32.totalorder %s86_s22, %s86_s22 }
  0x3a   :  { %p5565_p11 = scmp.ne.s32.totalorder %s86_s22, %s5564_s0  ;;  %p5570_p13 = scmp.lt.s32.totalorder %s5564_s0, %s5564_s0 }
  0x3c   :  { %p5571_p0 = por %p5570_p13, %p5569_p12 }
  0x3e   :  { %p5572_p1 = pnand %p5571_p0, %p5565_p11 }
  0x40   :  { %5575 = shalt.err (!%p5572_p1)
}
  0x41   :  { %91 = dma.hbm_to_vmem [thread:$0]  %s6710_s7, 512, %s86_s22, [#allocation10], %s5650_s18, %s5650_s18, %s5651_s19  }
  0x42   :  { %s5656_s27 = smov [#allocation14]  }
  0x43   :  { %s113_s28 = sshll.u32 %s5656_s27, 4  ;;  %s114_s28 = int_to_ptr.vmem [resolvable:$true] %s113_s28 }
  0x44   :  { %s5584_s1 = scalar_lea.vmem %s114_s28, 512  ;;  %p5589_p3 = scmp.lt.s32.totalorder %s114_s28, %s114_s28 }
  0x45   :  { %p5585_p2 = scmp.ne.s32.totalorder %s114_s28, %s5584_s1  ;;  %p5590_p4 = scmp.lt.s32.totalorder %s5584_s1, %s5584_s1 }
  0x47   :  { %p5591_p5 = por %p5590_p4, %p5589_p3 }
  0x49   :  { %p5592_p6 = pnand %p5591_p5, %p5585_p2 }
  0x4b   :  { %5595 = shalt.err (!%p5592_p6)
}
  0x4c   :  { %119 = dma.hbm_to_vmem [thread:$0]  %s6714_s11, 512, %s114_s28, [#allocation13], %s5650_s18, %s5650_s18, %s5651_s19  }
  0x4d   :  { %5636 = dma.done.wait [#allocation4], 256  }
  0x4e   :  { %5637 = vsyncadd [#allocation4], 4294967040 }
  0x4f   :  { %5638 = dma.done.wait [#allocation7], 512  }
  0x50   :  { %5639 = vsyncadd [#allocation7], 4294966784 }
  0x51   :  { %5640 = dma.done.wait [#allocation10], 1024  }
  0x52   :  { %5641 = vsyncadd [#allocation10], 4294966272 }
  0x53   :  { %5642 = dma.done.wait [#allocation13], 1024  }
  0x54   :  { %5643 = vsyncadd [#allocation13], 4294966272  ;;  %v5657_v0 = vmov 0.0   ;;  %vm5658_vm0 = vmmov 0   ;;  %v144_v1 = vld [vmem:[#allocation6 + $0x8] sm:$0xff]  ;;  %v143_v2 = vld [vmem:[#allocation6] sm:$0xff]  ;;  %v324_v10 = vlaneseq }
  0x55   :  { %4791 = vmatprep.subr.mxu0 %v5657_v0  ;;  %4795 = vmatprep.mubr.msk.f32.mxu0 %vm5658_vm0, %v5657_v0  ;;  %v169_v3 = vld [vmem:[#allocation3] sm:$0xff]  ;;  %vm176_vm1 = vcmask 130048   ;;  %v4523_v4 = vld [vmem:[%s6705_s2] ss:$0 sm:$0xff]  ;;  %v147_v8 = vld [vmem:[#allocation8 + $0x8] sm:$0xff]  ;;  %vm330_vm3 = vcmask 64512  }
  0x56   :  { %4798 = vmatprep.subr.mxu1 %v5657_v0  ;;  %4800 = vmatprep.mubr.msk.f32.mxu1 %vm5658_vm0, %v5657_v0  ;;  %v146_v9 = vld [vmem:[#allocation8] sm:$0xff]  ;;  %v5804_v11 = vshrl.u32 %v324_v10, 7  ;;  %v5806_v12 = vand.u32 127, %v324_v10  ;;  %v5815_v36 = vld [vmem:[#allocation9 + $0x18] sm:$0xff]  ;;  %v5824_v38 = vld [vmem:[#allocation9 + $0x8] sm:$0xff]  ;;  %s5659_s15 = smov 64  }
  0x57   :  { %4792 = vmatpush3.msra.mxu0 %v144_v1  ;;  %4799 = vmatpush3.xpose.msk.msra.mxu1 %vm176_vm1, %v169_v3  ;;  %v5818_v37 = vld [vmem:[#allocation9 + $0x10] sm:$0xff]  ;;  %v5828_v39 = vld [vmem:[#allocation9] sm:$0xff]  ;;  %v5855_v42 = vld [vmem:[%s6709_s6] sm:$0x1]  ;;  %s5660_s20 = smov 96   ;;  %vm606_vm4 = vcmask 253952  }
  0x58   :  { %4793 = vmatprep.subr.mxu0 %v5657_v0  ;;  %4808 = vmatprep.subr.mxu1 %v5657_v0  ;;  %vm328_vm2 = vcmp.gt.s32.totalorder %v5806_v12, %v5804_v11  ;;  %v4528_v46 = vld [vmem:[%s6708_s5] ss:$0 sm:$0xff]  ;;  %vm502_vm5 = vcmask 261120   ;;  %vm714_vm6 = vcmask 254977   ;;  %vm936_vm7 = vcmask 257027  }
  0x59   :  { %4794 = vmatpush3.msra.mxu0 %v143_v2  ;;  %vm1158_vm8 = vcmask 259077   ;;  %vm825_vm9 = vcmask 256002   ;;  %vm1047_vm10 = vcmask 258052   ;;  %vm1269_vm11 = vcmask 260102  }
  0x5a   :  { %4796 = vmatmul.mubr.msk.f32.vlgmr.msra.gmra.mxu0 %vm176_vm1, %v169_v3  ;;  %4803 = vmatprep.subr.mxu0 %v5657_v0  ;;  %vm1380_vm12 = vcmask 261127   ;;  %vm2415_vm13 = vcmask 1040384   ;;  %vm2421_vm14 = vcmask 254976  }
  0x5b   :  { %4804 = vmatpush3.msra.mxu0 %v169_v3  ;;  %4805 = vmatprep.mubr.msk.f32.mxu0 %vm5658_vm0, %v5657_v0 }
  0x5c   :  { %4815 = vmatprep.subr.mxu0 %v5657_v0 }
 0x11a   :  { %v246_v5 = vpop.f32.mrf.mxu0 }
 0x11b   :  { %v247_v6 = vadd.f32 %v4523_v4, %v246_v5 }
 0x11c   :  { %v4797_v7 = vpop.f32.mrf.mxu0 }
 0x11d   :  { %4801 = vmatmul.mubr.msk.f32.vlgmr.msra.gmra.mxu1 %vm176_vm1, %v247_v6 }
 0x11e   :  { %4812 = vmatprep.mubr.msk.f32.mxu1 %vm5658_vm0, %v5657_v0  ;;  %4809 = vmatpush3.msra.mxu1 %v147_v8 }
 0x11f   :  { %4810 = vmatprep.subr.mxu1 %v5657_v0 }
 0x120   :  { %4811 = vmatpush3.msra.mxu1 %v146_v9 }
 0x121   :  { %4826 = vmatprep.subr.mxu1 %v5657_v0 }
 0x1dd   :  { %v319_v13 = vpop.f32.mrf.mxu1 }
 0x1de   :  { %v323_v14 = vmul.f32 0.35355338, %v319_v13 }
 0x1df   :  { %v4802_v15 = vpop.f32.mrf.mxu1 }
 0x1e0   :  { %v329_v16 = vsel %vm328_vm2, -1e+30, %v323_v14 }
 0x1e1   :  { %v331_v17 = vsel %vm330_vm3, %v329_v16, -inf }
 0x1e2   :  { %v332_v18 = vrot.slane %v331_v17, 4 }
 0x1e4   :  { %v333_v19 = vmax.f32 %v331_v17, %v332_v18 }
 0x1e6   :  { %v334_v20 = vrot.slane %v333_v19, 2 }
 0x1e8   :  { %v335_v21 = vmax.f32 %v333_v19, %v334_v20 }
 0x1ea   :  { %v336_v22 = vrot.slane %v335_v21, 1 }
 0x1ec   :  { %v337_v23 = vmax.f32 %v335_v21, %v336_v22 }
 0x1ee   :  { %v338_v24 = vsub.f32 %v329_v16, %v337_v23 }
 0x1f0   :  { %v339_v25 = vmul.f32 1.442695, %v338_v24 }
 0x1f2   :  { %5230 = vpow2.f32 %v339_v25 }
 0x1ff   :  { %v5231_v26 = vpop.eup %5230 }
 0x200   :  { %v341_v27 = vsel %vm330_vm3, %v5231_v26, 0.0 }
 0x201   :  { %v342_v28 = vrot.slane %v341_v27, 4 }
 0x203   :  { %v343_v29 = vadd.f32 %v342_v28, %v341_v27 }
 0x205   :  { %v344_v30 = vrot.slane %v343_v29, 2 }
 0x207   :  { %v345_v31 = vadd.f32 %v344_v30, %v343_v29 }
 0x209   :  { %v346_v32 = vrot.slane %v345_v31, 1 }
 0x20b   :  { %v347_v33 = vadd.f32 %v346_v32, %v345_v31 }
 0x20d   :  { %5232 = vrcp.f32 %v347_v33 }
 0x21a   :  { %v5233_v34 = vpop.eup %5232 }
 0x21b   :  { %v349_v35 = vmul.f32 %v5233_v34, %v5231_v26 }
 0x21d   :  { %4806 = vmatmul.mubr.msk.f32.vlgmr.msra.gmra.mxu0 %vm330_vm3, %v349_v35 }
 0x21e   :  { %4816 = vmatpush3.msra.mxu0 %v5815_v36  ;;  %4823 = vmatprep.mubr.msk.f32.mxu0 %vm5658_vm0, %v5657_v0 }
 0x21f   :  { %4817 = vmatprep.subr.mxu0 %v5657_v0 }
 0x220   :  { %4818 = vmatpush3.msra.mxu0 %v5818_v37 }
 0x221   :  { %4819 = vmatprep.subr.mxu0 %v5657_v0 }
 0x222   :  { %4820 = vmatpush3.msra.mxu0 %v5824_v38 }
 0x223   :  { %4821 = vmatprep.subr.mxu0 %v5657_v0 }
 0x224   :  { %4822 = vmatpush3.msra.mxu0 %v5828_v39 }
 0x225   :  { %4824 = vmatmul.mubr.f32.vlgmr.msra.gmra.mxu0 %v5657_v0  ;;  %4837 = vmatprep.subr.mxu0 %v5657_v0 }
 0x226   :  { %4838 = vmatpush3.msra.mxu0 %v5815_v36  ;;  %4845 = vmatprep.mubr.msk.f32.mxu0 %vm5658_vm0, %v5657_v0 }
 0x227   :  { %4839 = vmatprep.subr.mxu0 %v5657_v0 }
 0x228   :  { %4840 = vmatpush3.msra.mxu0 %v5818_v37 }
 0x229   :  { %4841 = vmatprep.subr.mxu0 %v5657_v0 }
 0x22a   :  { %4842 = vmatpush3.msra.mxu0 %v5824_v38 }
 0x22b   :  { %4843 = vmatprep.subr.mxu0 %v5657_v0 }
 0x22c   :  { %4844 = vmatpush3.msra.mxu0 %v5828_v39 }
 0x22d   :  { %4859 = vmatprep.subr.mxu0 %v5657_v0 }
 0x2dd   :  { %v419_v40 = vpop.f32.mrf.mxu0 }
 0x2de   :  { %4813 = vmatmul.mubr.msk.f32.vlgmr.msra.gmra.mxu1 %vm176_vm1, %v419_v40 }
 0x2df   :  { %v4807_v41 = vpop.f32.mrf.mxu0  ;;  %4827 = vmatpush3.msra.mxu1 %v5815_v36  ;;  %4834 = vmatprep.mubr.msk.f32.mxu1 %vm5658_vm0, %v5657_v0 }
 0x2e0   :  { %4828 = vmatprep.subr.mxu1 %v5657_v0 }
 0x2e1   :  { %4829 = vmatpush3.msra.mxu1 %v5818_v37 }
 0x2e2   :  { %4830 = vmatprep.subr.mxu1 %v5657_v0 }
 0x2e3   :  { %4831 = vmatpush3.msra.mxu1 %v5824_v38 }
 0x2e4   :  { %4832 = vmatprep.subr.mxu1 %v5657_v0 }
 0x2e5   :  { %v572_v43 = vpop.f32.mrf.mxu0  ;;  %4833 = vmatpush3.msra.mxu1 %v5828_v39 }
 0x2e6   :  { %v5861_v44 = vadd.f32 %v572_v43, %v5855_v42  ;;  %4848 = vmatprep.subr.mxu1 %v5657_v0 }
 0x2e7   :  { %v4825_v45 = vpop.f32.mrf.mxu0 }
 0x2e8   :  { %584 = vrot.lane.b32.xlu0 %v5861_v44, %s5659_s15 }
 0x35a   :  { %v5873_v54 = vpop.permute.xlu0 %584 }
 0x39e   :  { %v498_v47 = vpop.f32.mrf.mxu1 }
 0x39f   :  { %v5869_v48 = vadd.f32 %v4528_v46, %v498_v47 }
 0x3a0   :  { %v4814_v49 = vpop.f32.mrf.mxu1 }
 0x3a1   :  { %v576_v50 = vadd.f32 %v5861_v44, %v5869_v48 }
 0x3a3   :  { %v4530_v51 = vmul.f32 -1.442695, %v576_v50 }
 0x3a5   :  { %5234 = vpow2.f32 %v4530_v51 }
 0x3b2   :  { %v5235_v52 = vpop.eup %5234 }
 0x3b3   :  { %v580_v53 = vadd.f32 1.0, %v5235_v52 }
 0x3b5   :  { %5236 = vrcp.f32 %v580_v53 }
 0x3c2   :  { %v5237_v55 = vpop.eup %5236 }
 0x3c3   :  { %v587_v56 = vmul.f32 %v5237_v55, %v5873_v54  ;;  %v594_v60 = vsub.f32 1.0, %v5237_v55  ;;  %v600_v62 = vmul.f32 0.0, %v5237_v55 }
 0x3c5   :  { %589 = vrot.lane.b32.xlu0 %v587_v56, %s5659_s15 }
 0x437   :  { %v590_v57 = vpop.permute.xlu0 %589 }
 0x438   :  { %v592_v58 = vadd.f32 %v590_v57, %v5869_v48 }
 0x43a   :  { %5238 = vtanh.f32 %v592_v58 }
 0x447   :  { %v5239_v59 = vpop.eup %5238 }
 0x448   :  { %596 = vrot.lane.b32.xlu1 %v5239_v59, %s5660_s20 }
 0x4ba   :  { %v597_v61 = vpop.permute.xlu1 %596 }
 0x4bb   :  { %v599_v63 = vmul.f32 %v597_v61, %v594_v60 }
 0x4bd   :  { %v601_v1 = vadd.f32 %v600_v62, %v599_v63 }
 0x4bf   :  { %603 = vrot.lane.b32.xlu1 %v601_v1, %s5660_s20  ;;  %v706_v19 = vrot.slane %v601_v1, 7 }
 0x531   :  { %v604_v2 = vpop.permute.xlu1 %603 }
 0x532   :  { %607 = vst.msk [vmem:[#allocation2] sm:$0x1] %vm606_vm4, %v604_v2  ;;  %4835 = vmatmul.mubr.msk.f32.vlgmr.msra.gmra.mxu1 %vm502_vm5, %v604_v2 }
 0x533   :  { %4849 = vmatpush3.msra.mxu1 %v5815_v36  ;;  %4856 = vmatprep.mubr.msk.f32.mxu1 %vm5658_vm0, %v5657_v0 }
 0x534   :  { %4850 = vmatprep.subr.mxu1 %v5657_v0 }
 0x535   :  { %4851 = vmatpush3.msra.mxu1 %v5818_v37 }
 0x536   :  { %4852 = vmatprep.subr.mxu1 %v5657_v0 }
 0x537   :  { %4853 = vmatpush3.msra.mxu1 %v5824_v38 }
 0x538   :  { %4854 = vmatprep.subr.mxu1 %v5657_v0 }
 0x539   :  { %4855 = vmatpush3.msra.mxu1 %v5828_v39 }
 0x53a   :  { %4870 = vmatprep.subr.mxu1 %v5657_v0 }
 0x5f2   :  { %v676_v3 = vpop.f32.mrf.mxu1 }
 0x5f3   :  { %v677_v4 = vadd.f32 %v676_v3, %v5855_v42 }
 0x5f4   :  { %v4836_v5 = vpop.f32.mrf.mxu1 }
 0x5f5   :  { %v681_v6 = vrot.slane %v677_v4, 7 }
 0x5f7   :  { %690 = vrot.lane.b32.xlu0 %v681_v6, %s5659_s15  ;;  %v683_v7 = vadd.f32 %v681_v6, %v5869_v48 }
 0x5f9   :  { %v4532_v8 = vmul.f32 -1.442695, %v683_v7 }
 0x5fb   :  { %5240 = vpow2.f32 %v4532_v8 }
 0x608   :  { %v5241_v9 = vpop.eup %5240 }
 0x609   :  { %v687_v10 = vadd.f32 1.0, %v5241_v9 }
 0x60b   :  { %5242 = vrcp.f32 %v687_v10 }
 0x618   :  { %v5243_v13 = vpop.eup %5242 }
 0x619   :  { %v700_v20 = vsub.f32 1.0, %v5243_v13  ;;  %v708_v23 = vmul.f32 %v5243_v13, %v706_v19 }
 0x669   :  { %v691_v14 = vpop.permute.xlu0 %690 }
 0x66a   :  { %v693_v15 = vmul.f32 %v5243_v13, %v691_v14 }
 0x66c   :  { %695 = vrot.lane.b32.xlu1 %v693_v15, %s5659_s15 }
 0x6de   :  { %v696_v16 = vpop.permute.xlu1 %695 }
 0x6df   :  { %v698_v17 = vadd.f32 %v696_v16, %v5869_v48 }
 0x6e1   :  { %5244 = vtanh.f32 %v698_v17 }
 0x6ee   :  { %v5245_v18 = vpop.eup %5244 }
 0x6ef   :  { %702 = vrot.lane.b32.xlu0 %v5245_v18, %s5660_s20 }
 0x761   :  { %v703_v21 = vpop.permute.xlu0 %702 }
 0x762   :  { %v705_v22 = vmul.f32 %v703_v21, %v700_v20 }
 0x764   :  { %v5898_v24 = vadd.f32 %v708_v23, %v705_v22 }
 0x766   :  { %v716_v25 = vrot.slane %v5898_v24, 1  ;;  %v817_v49 = vrot.slane %v5898_v24, 7 }
 0x768   :  { %717 = vrot.lane.b32.xlu1 %v716_v25, %s5660_s20 }
 0x7da   :  { %v718_v26 = vpop.permute.xlu1 %717 }
 0x7db   :  { %4846 = vmatmul.mubr.msk.f32.vlgmr.msra.gmra.mxu0 %vm502_vm5, %v718_v26 }
 0x7dc   :  { %4860 = vmatpush3.msra.mxu0 %v5815_v36  ;;  %4867 = vmatprep.mubr.msk.f32.mxu0 %vm5658_vm0, %v5657_v0 }
 0x7dd   :  { %4861 = vmatprep.subr.mxu0 %v5657_v0 }
 0x7de   :  { %4862 = vmatpush3.msra.mxu0 %v5818_v37 }
 0x7df   :  { %4863 = vmatprep.subr.mxu0 %v5657_v0 }
 0x7e0   :  { %4864 = vmatpush3.msra.mxu0 %v5824_v38 }
 0x7e1   :  { %4865 = vmatprep.subr.mxu0 %v5657_v0 }
 0x7e2   :  { %4866 = vmatpush3.msra.mxu0 %v5828_v39 }
 0x7e3   :  { %4881 = vmatprep.subr.mxu0 %v5657_v0 }
 0x89b   :  { %v787_v27 = vpop.f32.mrf.mxu0 }
 0x89c   :  { %v788_v28 = vadd.f32 %v787_v27, %v5855_v42 }
 0x89d   :  { %v4847_v29 = vpop.f32.mrf.mxu0 }
 0x89e   :  { %v792_v30 = vrot.slane %v788_v28, 6 }
 0x8a0   :  { %801 = vrot.lane.b32.xlu0 %v792_v30, %s5659_s15  ;;  %v794_v31 = vadd.f32 %v792_v30, %v5869_v48 }
 0x8a2   :  { %v4534_v32 = vmul.f32 -1.442695, %v794_v31 }
 0x8a4   :  { %5246 = vpow2.f32 %v4534_v32 }
 0x8b1   :  { %v5247_v33 = vpop.eup %5246 }
 0x8b2   :  { %v798_v34 = vadd.f32 1.0, %v5247_v33 }
 0x8b4   :  { %5248 = vrcp.f32 %v798_v34 }
 0x8c1   :  { %v5249_v35 = vpop.eup %5248 }
 0x8c2   :  { %v811_v47 = vsub.f32 1.0, %v5249_v35  ;;  %v819_v51 = vmul.f32 %v5249_v35, %v817_v49 }
 0x912   :  { %v802_v40 = vpop.permute.xlu0 %801 }
 0x913   :  { %v804_v41 = vmul.f32 %v5249_v35, %v802_v40 }
 0x915   :  { %806 = vrot.lane.b32.xlu1 %v804_v41, %s5659_s15 }
 0x987   :  { %v807_v43 = vpop.permute.xlu1 %806 }
 0x988   :  { %v809_v45 = vadd.f32 %v807_v43, %v5869_v48 }
 0x98a   :  { %5250 = vtanh.f32 %v809_v45 }
 0x997   :  { %v5251_v46 = vpop.eup %5250 }
 0x998   :  { %813 = vrot.lane.b32.xlu0 %v5251_v46, %s5660_s20 }
 0xa0a   :  { %v814_v50 = vpop.permute.xlu0 %813 }
 0xa0b   :  { %v816_v52 = vmul.f32 %v814_v50, %v811_v47 }
 0xa0d   :  { %v5920_v53 = vadd.f32 %v819_v51, %v816_v52 }
 0xa0f   :  { %v827_v55 = vrot.slane %v5920_v53, 2  ;;  %v928_v9 = vrot.slane %v5920_v53, 7 }
 0xa11   :  { %828 = vrot.lane.b32.xlu1 %v827_v55, %s5660_s20 }
 0xa83   :  { %v829_v56 = vpop.permute.xlu1 %828 }
 0xa84   :  { %4857 = vmatmul.mubr.msk.f32.vlgmr.msra.gmra.mxu1 %vm502_vm5, %v829_v56 }
 0xa85   :  { %4871 = vmatpush3.msra.mxu1 %v5815_v36  ;;  %4878 = vmatprep.mubr.msk.f32.mxu1 %vm5658_vm0, %v5657_v0 }
 0xa86   :  { %4872 = vmatprep.subr.mxu1 %v5657_v0 }
 0xa87   :  { %4873 = vmatpush3.msra.mxu1 %v5818_v37 }
 0xa88   :  { %4874 = vmatprep.subr.mxu1 %v5657_v0 }
 0xa89   :  { %4875 = vmatpush3.msra.mxu1 %v5824_v38 }
 0xa8a   :  { %4876 = vmatprep.subr.mxu1 %v5657_v0 }
 0xa8b   :  { %4877 = vmatpush3.msra.mxu1 %v5828_v39 }
 0xa8c   :  { %4892 = vmatprep.subr.mxu1 %v5657_v0 }
 0xb44   :  { %v898_v57 = vpop.f32.mrf.mxu1 }
 0xb45   :  { %v899_v58 = vadd.f32 %v898_v57, %v5855_v42 }
 0xb46   :  { %v4858_v59 = vpop.f32.mrf.mxu1 }
 0xb47   :  { %v903_v60 = vrot.slane %v899_v58, 5 }
 0xb49   :  { %912 = vrot.lane.b32.xlu0 %v903_v60, %s5659_s15  ;;  %v905_v61 = vadd.f32 %v903_v60, %v5869_v48 }
 0xb4b   :  { %v4536_v62 = vmul.f32 -1.442695, %v905_v61 }
 0xb4d   :  { %5252 = vpow2.f32 %v4536_v62 }
 0xb5a   :  { %v5253_v63 = vpop.eup %5252 }
 0xb5b   :  { %v909_v1 = vadd.f32 1.0, %v5253_v63 }
 0xb5d   :  { %5254 = vrcp.f32 %v909_v1 }
 0xb6a   :  { %v5255_v2 = vpop.eup %5254 }
 0xb6b   :  { %v922_v8 = vsub.f32 1.0, %v5255_v2  ;;  %v930_v13 = vmul.f32 %v5255_v2, %v928_v9 }
 0xbbb   :  { %v913_v3 = vpop.permute.xlu0 %912 }
 0xbbc   :  { %v915_v4 = vmul.f32 %v5255_v2, %v913_v3 }
 0xbbe   :  { %917 = vrot.lane.b32.xlu1 %v915_v4, %s5659_s15 }
 0xc30   :  { %v918_v5 = vpop.permute.xlu1 %917 }
 0xc31   :  { %v920_v6 = vadd.f32 %v918_v5, %v5869_v48 }
 0xc33   :  { %5256 = vtanh.f32 %v920_v6 }
 0xc40   :  { %v5257_v7 = vpop.eup %5256 }
 0xc41   :  { %924 = vrot.lane.b32.xlu0 %v5257_v7, %s5660_s20 }
 0xcb3   :  { %v925_v10 = vpop.permute.xlu0 %924 }
 0xcb4   :  { %v927_v14 = vmul.f32 %v925_v10, %v922_v8 }
 0xcb6   :  { %v5942_v15 = vadd.f32 %v930_v13, %v927_v14 }
 0xcb8   :  { %v938_v16 = vrot.slane %v5942_v15, 3  ;;  %v1039_v34 = vrot.slane %v5942_v15, 7 }
 0xcba   :  { %939 = vrot.lane.b32.xlu1 %v938_v16, %s5660_s20 }
 0xd2c   :  { %v940_v17 = vpop.permute.xlu1 %939 }
 0xd2d   :  { %4868 = vmatmul.mubr.msk.f32.vlgmr.msra.gmra.mxu0 %vm502_vm5, %v940_v17 }
 0xd2e   :  { %4882 = vmatpush3.msra.mxu0 %v5815_v36  ;;  %4889 = vmatprep.mubr.msk.f32.mxu0 %vm5658_vm0, %v5657_v0 }
 0xd2f   :  { %4883 = vmatprep.subr.mxu0 %v5657_v0 }
 0xd30   :  { %4884 = vmatpush3.msra.mxu0 %v5818_v37 }
 0xd31   :  { %4885 = vmatprep.subr.mxu0 %v5657_v0 }
 0xd32   :  { %4886 = vmatpush3.msra.mxu0 %v5824_v38 }
 0xd33   :  { %4887 = vmatprep.subr.mxu0 %v5657_v0 }
 0xd34   :  { %4888 = vmatpush3.msra.mxu0 %v5828_v39 }
 0xd35   :  { %4903 = vmatprep.subr.mxu0 %v5657_v0 }
 0xded   :  { %v1009_v18 = vpop.f32.mrf.mxu0 }
 0xdee   :  { %v1010_v19 = vadd.f32 %v1009_v18, %v5855_v42 }
 0xdef   :  { %v4869_v20 = vpop.f32.mrf.mxu0 }
 0xdf0   :  { %v1014_v21 = vrot.slane %v1010_v19, 4 }
 0xdf2   :  { %1023 = vrot.lane.b32.xlu0 %v1014_v21, %s5659_s15  ;;  %v1016_v22 = vadd.f32 %v1014_v21, %v5869_v48 }
 0xdf4   :  { %v4538_v23 = vmul.f32 -1.442695, %v1016_v22 }
 0xdf6   :  { %5258 = vpow2.f32 %v4538_v23 }
 0xe03   :  { %v5259_v25 = vpop.eup %5258 }
 0xe04   :  { %v1020_v26 = vadd.f32 1.0, %v5259_v25 }
 0xe06   :  { %5260 = vrcp.f32 %v1020_v26 }
 0xe13   :  { %v5261_v27 = vpop.eup %5260 }
 0xe14   :  { %v1033_v33 = vsub.f32 1.0, %v5261_v27  ;;  %v1041_v40 = vmul.f32 %v5261_v27, %v1039_v34 }
 0xe64   :  { %v1024_v28 = vpop.permute.xlu0 %1023 }
 0xe65   :  { %v1026_v29 = vmul.f32 %v5261_v27, %v1024_v28 }
 0xe67   :  { %1028 = vrot.lane.b32.xlu1 %v1026_v29, %s5659_s15 }
 0xed9   :  { %v1029_v30 = vpop.permute.xlu1 %1028 }
 0xeda   :  { %v1031_v31 = vadd.f32 %v1029_v30, %v5869_v48 }
 0xedc   :  { %5262 = vtanh.f32 %v1031_v31 }
 0xee9   :  { %v5263_v32 = vpop.eup %5262 }
 0xeea   :  { %1035 = vrot.lane.b32.xlu0 %v5263_v32, %s5660_s20 }
 0xf5c   :  { %v1036_v35 = vpop.permute.xlu0 %1035 }
 0xf5d   :  { %v1038_v41 = vmul.f32 %v1036_v35, %v1033_v33 }
 0xf5f   :  { %v5964_v43 = vadd.f32 %v1041_v40, %v1038_v41 }
 0xf61   :  { %v1049_v45 = vrot.slane %v5964_v43, 4  ;;  %v1150_v61 = vrot.slane %v5964_v43, 7 }
 0xf63   :  { %1050 = vrot.lane.b32.xlu1 %v1049_v45, %s5660_s20 }
 0xfd5   :  { %v1051_v46 = vpop.permute.xlu1 %1050 }
 0xfd6   :  { %4879 = vmatmul.mubr.msk.f32.vlgmr.msra.gmra.mxu1 %vm502_vm5, %v1051_v46 }
 0xfd7   :  { %4893 = vmatpush3.msra.mxu1 %v5815_v36  ;;  %4900 = vmatprep.mubr.msk.f32.mxu1 %vm5658_vm0, %v5657_v0 }
 0xfd8   :  { %4894 = vmatprep.subr.mxu1 %v5657_v0 }
 0xfd9   :  { %4895 = vmatpush3.msra.mxu1 %v5818_v37 }
 0xfda   :  { %4896 = vmatprep.subr.mxu1 %v5657_v0 }
 0xfdb   :  { %4897 = vmatpush3.msra.mxu1 %v5824_v38 }
 0xfdc   :  { %4898 = vmatprep.subr.mxu1 %v5657_v0 }
 0xfdd   :  { %4899 = vmatpush3.msra.mxu1 %v5828_v39 }
 0xfde   :  { %4914 = vmatprep.subr.mxu1 %v5657_v0 }
0x1096   :  { %v1120_v47 = vpop.f32.mrf.mxu1 }
0x1097   :  { %v1121_v36 = vadd.f32 %v1120_v47, %v5855_v42 }
0x1098   :  { %v4880_v49 = vpop.f32.mrf.mxu1 }
0x1099   :  { %v1125_v50 = vrot.slane %v1121_v36, 3 }
0x109b   :  { %1134 = vrot.lane.b32.xlu0 %v1125_v50, %s5659_s15  ;;  %v1127_v51 = vadd.f32 %v1125_v50, %v5869_v48 }
0x109d   :  { %v4540_v37 = vmul.f32 -1.442695, %v1127_v51 }
0x109f   :  { %5264 = vpow2.f32 %v4540_v37 }
0x10ac   :  { %v5265_v52 = vpop.eup %5264 }
0x10ad   :  { %v1131_v55 = vadd.f32 1.0, %v5265_v52  ;;  %v6021_v52 = vld [vmem:[#allocation12 + $0x10] sm:$0xff] }
0x10af   :  { %5266 = vrcp.f32 %v1131_v55  ;;  %v6030_v55 = vld [vmem:[#allocation12] sm:$0xff] }
0x10bc   :  { %v5267_v38 = vpop.eup %5266 }
0x10bd   :  { %v1144_v60 = vsub.f32 1.0, %v5267_v38  ;;  %v1152_v63 = vmul.f32 %v5267_v38, %v1150_v61 }
0x110d   :  { %v1135_v56 = vpop.permute.xlu0 %1134 }
0x110e   :  { %v1137_v57 = vmul.f32 %v5267_v38, %v1135_v56  ;;  %v155_v38 = vld [vmem:[#allocation11 + $0x8] sm:$0xff]  ;;  %v154_v56 = vld [vmem:[#allocation11] sm:$0xff] }
0x1110   :  { %1139 = vrot.lane.b32.xlu1 %v1137_v57, %s5659_s15 }
0x1182   :  { %v1140_v39 = vpop.permute.xlu1 %1139 }
0x1183   :  { %v1142_v58 = vadd.f32 %v1140_v39, %v5869_v48 }
0x1185   :  { %5268 = vtanh.f32 %v1142_v58 }
0x1192   :  { %v5269_v59 = vpop.eup %5268 }
0x1193   :  { %1146 = vrot.lane.b32.xlu0 %v5269_v59, %s5660_s20 }
0x1205   :  { %v1147_v62 = vpop.permute.xlu0 %1146 }
0x1206   :  { %v1149_v1 = vmul.f32 %v1147_v62, %v1144_v60 }
0x1208   :  { %v1153_v2 = vadd.f32 %v1152_v63, %v1149_v1 }
0x120a   :  { %v1160_v3 = vrot.slane %v1153_v2, 5  ;;  %v1261_v23 = vrot.slane %v1153_v2, 7 }
0x120c   :  { %1161 = vrot.lane.b32.xlu1 %v1160_v3, %s5660_s20 }
0x127e   :  { %v1162_v4 = vpop.permute.xlu1 %1161 }
0x127f   :  { %4890 = vmatmul.mubr.msk.f32.vlgmr.msra.gmra.mxu0 %vm502_vm5, %v1162_v4 }
0x1280   :  { %4911 = vmatprep.mubr.msk.f32.mxu0 %vm5658_vm0, %v5657_v0 }
0x133f   :  { %v1231_v5 = vpop.f32.mrf.mxu0 }
0x1340   :  { %v1232_v6 = vadd.f32 %v1231_v5, %v5855_v42 }
0x1341   :  { %v4891_v7 = vpop.f32.mrf.mxu0 }
0x1342   :  { %v1236_v8 = vrot.slane %v1232_v6, 2 }
0x1344   :  { %1245 = vrot.lane.b32.xlu0 %v1236_v8, %s5659_s15  ;;  %v1238_v9 = vadd.f32 %v1236_v8, %v5869_v48  ;;  %v4545_v8 = vld [vmem:[%s6712_s9] ss:$0 sm:$0xff] }
0x1346   :  { %v4542_v10 = vmul.f32 -1.442695, %v1238_v9 }
0x1348   :  { %5270 = vpow2.f32 %v4542_v10 }
0x1355   :  { %v5271_v13 = vpop.eup %5270 }
0x1356   :  { %v1242_v14 = vadd.f32 1.0, %v5271_v13 }
0x1358   :  { %5272 = vrcp.f32 %v1242_v14 }
0x1365   :  { %v5273_v16 = vpop.eup %5272 }
0x1366   :  { %v1255_v22 = vsub.f32 1.0, %v5273_v16  ;;  %v1263_v26 = vmul.f32 %v5273_v16, %v1261_v23 }
0x13b6   :  { %v1246_v17 = vpop.permute.xlu0 %1245 }
0x13b7   :  { %v1248_v18 = vmul.f32 %v5273_v16, %v1246_v17 }
0x13b9   :  { %1250 = vrot.lane.b32.xlu1 %v1248_v18, %s5659_s15 }
0x142b   :  { %v1251_v19 = vpop.permute.xlu1 %1250 }
0x142c   :  { %v1253_v20 = vadd.f32 %v1251_v19, %v5869_v48 }
0x142e   :  { %5274 = vtanh.f32 %v1253_v20 }
0x143b   :  { %v5275_v21 = vpop.eup %5274 }
0x143c   :  { %1257 = vrot.lane.b32.xlu0 %v5275_v21, %s5660_s20 }
0x14ae   :  { %v1258_v25 = vpop.permute.xlu0 %1257 }
0x14af   :  { %v1260_v27 = vmul.f32 %v1258_v25, %v1255_v22 }
0x14b1   :  { %v5996_v28 = vadd.f32 %v1263_v26, %v1260_v27 }
0x14b3   :  { %v1271_v29 = vrot.slane %v5996_v28, 6  ;;  %v1372_v39 = vrot.slane %v5996_v28, 7 }
0x14b5   :  { %1272 = vrot.lane.b32.xlu1 %v1271_v29, %s5660_s20 }
0x1527   :  { %v1273_v30 = vpop.permute.xlu1 %1272 }
0x1528   :  { %4901 = vmatmul.mubr.msk.f32.vlgmr.msra.gmra.mxu1 %vm502_vm5, %v1273_v30 }
0x1529   :  { %4922 = vmatprep.mubr.msk.f32.mxu1 %vm5658_vm0, %v5657_v0 }
0x15e8   :  { %v1342_v31 = vpop.f32.mrf.mxu1 }
0x15e9   :  { %v1343_v32 = vadd.f32 %v1342_v31, %v5855_v42 }
0x15ea   :  { %v4902_v33 = vpop.f32.mrf.mxu1 }
0x15eb   :  { %v1347_v34 = vrot.slane %v1343_v32, 1 }
0x15ed   :  { %1356 = vrot.lane.b32.xlu0 %v1347_v34, %s5659_s15  ;;  %v1349_v35 = vadd.f32 %v1347_v34, %v5869_v48 }
0x15ef   :  { %v4544_v40 = vmul.f32 -1.442695, %v1349_v35 }
0x15f1   :  { %5276 = vpow2.f32 %v4544_v40 }
0x15fe   :  { %v5277_v41 = vpop.eup %5276 }
0x15ff   :  { %v1353_v45 = vadd.f32 1.0, %v5277_v41 }
0x1601   :  { %5278 = vrcp.f32 %v1353_v45 }
0x160e   :  { %v6006_v46 = vpop.eup %5278 }
0x160f   :  { %v1366_v57 = vsub.f32 1.0, %v6006_v46  ;;  %v1374_v59 = vmul.f32 %v6006_v46, %v1372_v39 }
0x165f   :  { %v1357_v47 = vpop.permute.xlu0 %1356 }
0x1660   :  { %v1359_v36 = vmul.f32 %v6006_v46, %v1357_v47 }
0x1662   :  { %1361 = vrot.lane.b32.xlu1 %v1359_v36, %s5659_s15 }
0x1666   :  { %711 = vrot.lane.b32.xlu1 %v5898_v24, %s5660_s20 }
0x166a   :  { %933 = vrot.lane.b32.xlu1 %v5942_v15, %s5660_s20  ;;  %v6019_v15 = vld [vmem:[#allocation12 + $0x18] sm:$0xff] }
0x166b   :  { %4915 = vmatpush3.msra.mxu1 %v6019_v15 }
0x166c   :  { %4916 = vmatprep.subr.mxu1 %v5657_v0 }
0x166d   :  { %4917 = vmatpush3.msra.mxu1 %v6021_v52 }
0x166e   :  { %1155 = vrot.lane.b32.xlu1 %v1153_v2, %s5660_s20  ;;  %4918 = vmatprep.subr.mxu1 %v5657_v0  ;;  %v6070_v2 = vld [vmem:[%s6713_s10] sm:$0x1] }
0x16d4   :  { %v1362_v42 = vpop.permute.xlu1 %1361 }
0x16d5   :  { %v1364_v49 = vadd.f32 %v1362_v42, %v5869_v48  ;;  %v6026_v48 = vld [vmem:[#allocation12 + $0x8] sm:$0xff] }
0x16d6   :  { %4919 = vmatpush3.msra.mxu1 %v6026_v48 }
0x16d7   :  { %5280 = vtanh.f32 %v1364_v49  ;;  %4920 = vmatprep.subr.mxu1 %v5657_v0 }
0x16d8   :  { %v712_v50 = vpop.permute.xlu1 %711  ;;  %4921 = vmatpush3.msra.mxu1 %v6030_v55 }
0x16d9   :  { %715 = vst.msk [vmem:[#allocation2] sm:$0x2] %vm714_vm6, %v712_v50  ;;  %4923 = vmatmul.mubr.f32.vlgmr.msra.gmra.mxu1 %v5657_v0  ;;  %4936 = vmatprep.subr.mxu1 %v5657_v0 }
0x16da   :  { %4937 = vmatpush3.msra.mxu1 %v6019_v15  ;;  %4944 = vmatprep.mubr.msk.f32.mxu1 %vm5658_vm0, %v5657_v0 }
0x16db   :  { %4938 = vmatprep.subr.mxu1 %v5657_v0 }
0x16dc   :  { %v934_v51 = vpop.permute.xlu1 %933  ;;  %4939 = vmatpush3.msra.mxu1 %v6021_v52 }
0x16dd   :  { %937 = vst.msk [vmem:[#allocation2] sm:$0x8] %vm936_vm7, %v934_v51  ;;  %4940 = vmatprep.subr.mxu1 %v5657_v0 }
0x16de   :  { %4941 = vmatpush3.msra.mxu1 %v6026_v48 }
0x16df   :  { %4942 = vmatprep.subr.mxu1 %v5657_v0 }
0x16e0   :  { %v1156_v37 = vpop.permute.xlu1 %1155  ;;  %4943 = vmatpush3.msra.mxu1 %v6030_v55 }
0x16e1   :  { %1159 = vst.msk [vmem:[#allocation2] sm:$0x20] %vm1158_vm8, %v1156_v37  ;;  %4958 = vmatprep.subr.mxu1 %v5657_v0 }
0x16e4   :  { %v5281_v24 = vpop.eup %5280 }
0x16e5   :  { %1368 = vrot.lane.b32.xlu0 %v5281_v24, %s5660_s20 }
0x16e9   :  { %822 = vrot.lane.b32.xlu0 %v5920_v53, %s5660_s20  ;;  %v157_v53 = vld [vmem:[#allocation11 + $0x18] sm:$0xff] }
0x16ea   :  { %4904 = vmatpush3.msra.mxu0 %v157_v53 }
0x16eb   :  { %4905 = vmatprep.subr.mxu0 %v5657_v0 }
0x16ed   :  { %1044 = vrot.lane.b32.xlu0 %v5964_v43, %s5660_s20  ;;  %v156_v43 = vld [vmem:[#allocation11 + $0x10] sm:$0xff] }
0x16ee   :  { %4906 = vmatpush3.msra.mxu0 %v156_v43 }
0x16ef   :  { %4907 = vmatprep.subr.mxu0 %v5657_v0 }
0x16f0   :  { %4908 = vmatpush3.msra.mxu0 %v155_v38 }
0x16f1   :  { %1266 = vrot.lane.b32.xlu0 %v5996_v28, %s5660_s20  ;;  %4909 = vmatprep.subr.mxu0 %v5657_v0 }
0x16f2   :  { %4910 = vmatpush3.msra.mxu0 %v154_v56 }
0x16f3   :  { %4925 = vmatprep.subr.mxu0 %v5657_v0 }
0x1757   :  { %v1369_v58 = vpop.permute.xlu0 %1368 }
0x1758   :  { %v1371_v60 = vmul.f32 %v1369_v58, %v1366_v57 }
0x175a   :  { %v6060_v61 = vadd.f32 %v1374_v59, %v1371_v60 }
0x175b   :  { %v823_v62 = vpop.permute.xlu0 %822 }
0x175c   :  { %826 = vst.msk [vmem:[#allocation2] sm:$0x4] %vm825_vm9, %v823_v62  ;;  %1377 = vrot.lane.b32.xlu1 %v6060_v61, %s5660_s20 }
0x175f   :  { %v1045_v63 = vpop.permute.xlu0 %1044 }
0x1760   :  { %1048 = vst.msk [vmem:[#allocation2] sm:$0x10] %vm1047_vm10, %v1045_v63 }
0x1763   :  { %v1267_v1 = vpop.permute.xlu0 %1266 }
0x1764   :  { %1270 = vst.msk [vmem:[#allocation2] sm:$0x40] %vm1269_vm11, %v1267_v1 }
0x1799   :  { %v1528_v3 = vpop.f32.mrf.mxu1 }
0x179a   :  { %v6073_v4 = vadd.f32 %v1528_v3, %v6070_v2 }
0x179b   :  { %v4924_v5 = vpop.f32.mrf.mxu1 }
0x179c   :  { %1540 = vrot.lane.b32.xlu0 %v6073_v4, %s5659_s15 }
0x17ce   :  { %v1378_v6 = vpop.permute.xlu1 %1377 }
0x17cf   :  { %1381 = vst.msk [vmem:[#allocation2] sm:$0x80] %vm1380_vm12, %v1378_v6 }
0x17d6   :  { %v1382_v7 = vld [vmem:[#allocation2] sm:$0xff] }
0x17d7   :  { %4912 = vmatmul.mubr.msk.f32.vlgmr.msra.gmra.mxu0 %vm502_vm5, %v1382_v7 }
0x17d8   :  { %4926 = vmatpush3.msra.mxu0 %v6019_v15  ;;  %4933 = vmatprep.mubr.msk.f32.mxu0 %vm5658_vm0, %v5657_v0 }
0x17d9   :  { %4927 = vmatprep.subr.mxu0 %v5657_v0 }
0x17da   :  { %4928 = vmatpush3.msra.mxu0 %v6021_v52 }
0x17db   :  { %4929 = vmatprep.subr.mxu0 %v5657_v0 }
0x17dc   :  { %4930 = vmatpush3.msra.mxu0 %v6026_v48 }
0x17dd   :  { %4931 = vmatprep.subr.mxu0 %v5657_v0 }
0x17de   :  { %4932 = vmatpush3.msra.mxu0 %v6030_v55 }
0x17df   :  { %4947 = vmatprep.subr.mxu0 %v5657_v0 }
0x180e   :  { %v6096_v19 = vpop.permute.xlu0 %1540 }
0x1897   :  { %v1458_v9 = vpop.f32.mrf.mxu0 }
0x1898   :  { %v6092_v10 = vadd.f32 %v4545_v8, %v1458_v9 }
0x1899   :  { %v4913_v13 = vpop.f32.mrf.mxu0 }
0x189a   :  { %v1532_v14 = vadd.f32 %v6073_v4, %v6092_v10 }
0x189c   :  { %v4547_v16 = vmul.f32 -1.442695, %v1532_v14 }
0x189e   :  { %5282 = vpow2.f32 %v4547_v16 }
0x18ab   :  { %v5283_v17 = vpop.eup %5282 }
0x18ac   :  { %v1536_v18 = vadd.f32 1.0, %v5283_v17 }
0x18ae   :  { %5284 = vrcp.f32 %v1536_v18 }
0x18bb   :  { %v5285_v20 = vpop.eup %5284 }
0x18bc   :  { %v1543_v21 = vmul.f32 %v5285_v20, %v6096_v19  ;;  %v1550_v26 = vsub.f32 1.0, %v5285_v20  ;;  %v1556_v28 = vmul.f32 0.0, %v5285_v20 }
0x18be   :  { %1545 = vrot.lane.b32.xlu1 %v1543_v21, %s5659_s15 }
0x1930   :  { %v1546_v22 = vpop.permute.xlu1 %1545 }
0x1931   :  { %v1548_v23 = vadd.f32 %v1546_v22, %v6092_v10 }
0x1933   :  { %5286 = vtanh.f32 %v1548_v23 }
0x1940   :  { %v5287_v25 = vpop.eup %5286 }
0x1941   :  { %1552 = vrot.lane.b32.xlu0 %v5287_v25, %s5660_s20 }
0x19b3   :  { %v1553_v27 = vpop.permute.xlu0 %1552 }
0x19b4   :  { %v1555_v29 = vmul.f32 %v1553_v27, %v1550_v26 }
0x19b6   :  { %v1557_v30 = vadd.f32 %v1556_v28, %v1555_v29 }
0x19b8   :  { %1559 = vrot.lane.b32.xlu1 %v1557_v30, %s5660_s20  ;;  %v1661_v37 = vrot.slane %v1557_v30, 7 }
0x1a2a   :  { %v1560_v31 = vpop.permute.xlu1 %1559 }
0x1a2b   :  { %1562 = vst.msk [vmem:[#allocation2] sm:$0x1] %vm606_vm4, %v1560_v31  ;;  %4934 = vmatmul.mubr.msk.f32.vlgmr.msra.gmra.mxu0 %vm502_vm5, %v1560_v31 }
0x1a2c   :  { %4948 = vmatpush3.msra.mxu0 %v6019_v15  ;;  %4955 = vmatprep.mubr.msk.f32.mxu0 %vm5658_vm0, %v5657_v0 }
0x1a2d   :  { %4949 = vmatprep.subr.mxu0 %v5657_v0 }
0x1a2e   :  { %4950 = vmatpush3.msra.mxu0 %v6021_v52 }
0x1a2f   :  { %4951 = vmatprep.subr.mxu0 %v5657_v0 }
0x1a30   :  { %4952 = vmatpush3.msra.mxu0 %v6026_v48 }
0x1a31   :  { %4953 = vmatprep.subr.mxu0 %v5657_v0 }
0x1a32   :  { %4954 = vmatpush3.msra.mxu0 %v6030_v55 }
0x1a33   :  { %4969 = vmatprep.subr.mxu0 %v5657_v0 }
0x1aeb   :  { %v1631_v32 = vpop.f32.mrf.mxu0 }
0x1aec   :  { %v1632_v33 = vadd.f32 %v1631_v32, %v6070_v2 }
0x1aed   :  { %v4935_v34 = vpop.f32.mrf.mxu0 }
0x1aee   :  { %v1636_v35 = vrot.slane %v1632_v33, 7 }
0x1af0   :  { %1645 = vrot.lane.b32.xlu0 %v1636_v35, %s5659_s15  ;;  %v1638_v40 = vadd.f32 %v1636_v35, %v6092_v10 }
0x1af2   :  { %v4549_v41 = vmul.f32 -1.442695, %v1638_v40 }
0x1af4   :  { %5288 = vpow2.f32 %v4549_v41 }
0x1b01   :  { %v5289_v45 = vpop.eup %5288 }
0x1b02   :  { %v1642_v46 = vadd.f32 1.0, %v5289_v45 }
0x1b04   :  { %5290 = vrcp.f32 %v1642_v46 }
0x1b11   :  { %v5291_v47 = vpop.eup %5290 }
0x1b12   :  { %v1655_v24 = vsub.f32 1.0, %v5291_v47  ;;  %v1663_v43 = vmul.f32 %v5291_v47, %v1661_v37 }
0x1b62   :  { %v1646_v36 = vpop.permute.xlu0 %1645 }
0x1b63   :  { %v1648_v42 = vmul.f32 %v5291_v47, %v1646_v36 }
0x1b65   :  { %1650 = vrot.lane.b32.xlu1 %v1648_v42, %s5659_s15 }
0x1bd7   :  { %v1651_v49 = vpop.permute.xlu1 %1650 }
0x1bd8   :  { %v1653_v50 = vadd.f32 %v1651_v49, %v6092_v10 }
0x1bda   :  { %5292 = vtanh.f32 %v1653_v50 }
0x1be7   :  { %v5293_v51 = vpop.eup %5292 }
0x1be8   :  { %1657 = vrot.lane.b32.xlu0 %v5293_v51, %s5660_s20 }
0x1c5a   :  { %v1658_v53 = vpop.permute.xlu0 %1657 }
0x1c5b   :  { %v1660_v38 = vmul.f32 %v1658_v53, %v1655_v24 }
0x1c5d   :  { %v6121_v56 = vadd.f32 %v1663_v43, %v1660_v38 }
0x1c5f   :  { %v1670_v57 = vrot.slane %v6121_v56, 1  ;;  %v1771_v17 = vrot.slane %v6121_v56, 7 }
0x1c61   :  { %1671 = vrot.lane.b32.xlu1 %v1670_v57, %s5660_s20 }
0x1cd3   :  { %v1672_v39 = vpop.permute.xlu1 %1671 }
0x1cd4   :  { %4945 = vmatmul.mubr.msk.f32.vlgmr.msra.gmra.mxu1 %vm502_vm5, %v1672_v39 }
0x1cd5   :  { %4959 = vmatpush3.msra.mxu1 %v6019_v15  ;;  %4966 = vmatprep.mubr.msk.f32.mxu1 %vm5658_vm0, %v5657_v0 }
0x1cd6   :  { %4960 = vmatprep.subr.mxu1 %v5657_v0 }
0x1cd7   :  { %4961 = vmatpush3.msra.mxu1 %v6021_v52 }
0x1cd8   :  { %4962 = vmatprep.subr.mxu1 %v5657_v0 }
0x1cd9   :  { %4963 = vmatpush3.msra.mxu1 %v6026_v48 }
0x1cda   :  { %4964 = vmatprep.subr.mxu1 %v5657_v0 }
0x1cdb   :  { %4965 = vmatpush3.msra.mxu1 %v6030_v55 }
0x1cdc   :  { %4980 = vmatprep.subr.mxu1 %v5657_v0 }
0x1d94   :  { %v1741_v58 = vpop.f32.mrf.mxu1 }
0x1d95   :  { %v1742_v59 = vadd.f32 %v1741_v58, %v6070_v2 }
0x1d96   :  { %v4946_v60 = vpop.f32.mrf.mxu1 }
0x1d97   :  { %v1746_v62 = vrot.slane %v1742_v59, 6 }
0x1d99   :  { %1755 = vrot.lane.b32.xlu0 %v1746_v62, %s5659_s15  ;;  %v1748_v63 = vadd.f32 %v1746_v62, %v6092_v10 }
0x1d9b   :  { %v4551_v1 = vmul.f32 -1.442695, %v1748_v63 }
0x1d9d   :  { %5294 = vpow2.f32 %v4551_v1 }
0x1daa   :  { %v5295_v3 = vpop.eup %5294 }
0x1dab   :  { %v1752_v5 = vadd.f32 1.0, %v5295_v3 }
0x1dad   :  { %5296 = vrcp.f32 %v1752_v5 }
0x1dba   :  { %v5297_v6 = vpop.eup %5296 }
0x1dbb   :  { %v1765_v16 = vsub.f32 1.0, %v5297_v6  ;;  %v1773_v20 = vmul.f32 %v5297_v6, %v1771_v17 }
0x1e0b   :  { %v1756_v7 = vpop.permute.xlu0 %1755 }
0x1e0c   :  { %v1758_v8 = vmul.f32 %v5297_v6, %v1756_v7 }
0x1e0e   :  { %1760 = vrot.lane.b32.xlu1 %v1758_v8, %s5659_s15 }
0x1e80   :  { %v1761_v9 = vpop.permute.xlu1 %1760 }
0x1e81   :  { %v1763_v13 = vadd.f32 %v1761_v9, %v6092_v10 }
0x1e83   :  { %5298 = vtanh.f32 %v1763_v13 }
0x1e90   :  { %v5299_v14 = vpop.eup %5298 }
0x1e91   :  { %1767 = vrot.lane.b32.xlu0 %v5299_v14, %s5660_s20 }
0x1f03   :  { %v1768_v18 = vpop.permute.xlu0 %1767 }
0x1f04   :  { %v1770_v21 = vmul.f32 %v1768_v18, %v1765_v16 }
0x1f06   :  { %v6143_v22 = vadd.f32 %v1773_v20, %v1770_v21 }
0x1f08   :  { %v1780_v23 = vrot.slane %v6143_v22, 2  ;;  %v1881_v36 = vrot.slane %v6143_v22, 7 }
0x1f0a   :  { %1781 = vrot.lane.b32.xlu1 %v1780_v23, %s5660_s20 }
0x1f7c   :  { %v1782_v25 = vpop.permute.xlu1 %1781 }
0x1f7d   :  { %4956 = vmatmul.mubr.msk.f32.vlgmr.msra.gmra.mxu0 %vm502_vm5, %v1782_v25 }
0x1f7e   :  { %4970 = vmatpush3.msra.mxu0 %v6019_v15  ;;  %4977 = vmatprep.mubr.msk.f32.mxu0 %vm5658_vm0, %v5657_v0 }
0x1f7f   :  { %4971 = vmatprep.subr.mxu0 %v5657_v0 }
0x1f80   :  { %4972 = vmatpush3.msra.mxu0 %v6021_v52 }
0x1f81   :  { %4973 = vmatprep.subr.mxu0 %v5657_v0 }
0x1f82   :  { %4974 = vmatpush3.msra.mxu0 %v6026_v48 }
0x1f83   :  { %4975 = vmatprep.subr.mxu0 %v5657_v0 }
0x1f84   :  { %4976 = vmatpush3.msra.mxu0 %v6030_v55 }
0x1f85   :  { %4991 = vmatprep.subr.mxu0 %v5657_v0 }
0x203d   :  { %v1851_v26 = vpop.f32.mrf.mxu0 }
0x203e   :  { %v1852_v27 = vadd.f32 %v1851_v26, %v6070_v2 }
0x203f   :  { %v4957_v28 = vpop.f32.mrf.mxu0 }
0x2040   :  { %v1856_v29 = vrot.slane %v1852_v27, 5 }
0x2042   :  { %1865 = vrot.lane.b32.xlu0 %v1856_v29, %s5659_s15  ;;  %v1858_v30 = vadd.f32 %v1856_v29, %v6092_v10 }
0x2044   :  { %v4553_v31 = vmul.f32 -1.442695, %v1858_v30 }
0x2046   :  { %5300 = vpow2.f32 %v4553_v31 }
0x2053   :  { %v5301_v32 = vpop.eup %5300 }
0x2054   :  { %v1862_v33 = vadd.f32 1.0, %v5301_v32 }
0x2056   :  { %5302 = vrcp.f32 %v1862_v33 }
0x2063   :  { %v5303_v34 = vpop.eup %5302 }
0x2064   :  { %v1875_v47 = vsub.f32 1.0, %v5303_v34  ;;  %v1883_v49 = vmul.f32 %v5303_v34, %v1881_v36 }
0x20b4   :  { %v1866_v35 = vpop.permute.xlu0 %1865 }
0x20b5   :  { %v1868_v40 = vmul.f32 %v5303_v34, %v1866_v35 }
0x20b7   :  { %1870 = vrot.lane.b32.xlu1 %v1868_v40, %s5659_s15 }
0x2129   :  { %v1871_v41 = vpop.permute.xlu1 %1870 }
0x212a   :  { %v1873_v45 = vadd.f32 %v1871_v41, %v6092_v10 }
0x212c   :  { %5304 = vtanh.f32 %v1873_v45 }
0x2139   :  { %v5305_v46 = vpop.eup %5304 }
0x213a   :  { %1877 = vrot.lane.b32.xlu0 %v5305_v46, %s5660_s20 }
0x21ac   :  { %v1878_v42 = vpop.permute.xlu0 %1877 }
0x21ad   :  { %v1880_v50 = vmul.f32 %v1878_v42, %v1875_v47 }
0x21af   :  { %v6165_v51 = vadd.f32 %v1883_v49, %v1880_v50 }
0x21b1   :  { %v1890_v37 = vrot.slane %v6165_v51, 3  ;;  %v1991_v8 = vrot.slane %v6165_v51, 7 }
0x21b3   :  { %1891 = vrot.lane.b32.xlu1 %v1890_v37, %s5660_s20 }
0x2225   :  { %v1892_v24 = vpop.permute.xlu1 %1891 }
0x2226   :  { %4967 = vmatmul.mubr.msk.f32.vlgmr.msra.gmra.mxu1 %vm502_vm5, %v1892_v24 }
0x2227   :  { %4981 = vmatpush3.msra.mxu1 %v6019_v15  ;;  %4988 = vmatprep.mubr.msk.f32.mxu1 %vm5658_vm0, %v5657_v0 }
0x2228   :  { %4982 = vmatprep.subr.mxu1 %v5657_v0 }
0x2229   :  { %4983 = vmatpush3.msra.mxu1 %v6021_v52 }
0x222a   :  { %4984 = vmatprep.subr.mxu1 %v5657_v0 }
0x222b   :  { %4985 = vmatpush3.msra.mxu1 %v6026_v48 }
0x222c   :  { %4986 = vmatprep.subr.mxu1 %v5657_v0 }
0x222d   :  { %4987 = vmatpush3.msra.mxu1 %v6030_v55 }
0x222e   :  { %5002 = vmatprep.subr.mxu1 %v5657_v0 }
0x22e6   :  { %v1961_v53 = vpop.f32.mrf.mxu1 }
0x22e7   :  { %v1962_v43 = vadd.f32 %v1961_v53, %v6070_v2 }
0x22e8   :  { %v4968_v38 = vpop.f32.mrf.mxu1 }
0x22e9   :  { %v1966_v57 = vrot.slane %v1962_v43, 4 }
0x22eb   :  { %1975 = vrot.lane.b32.xlu0 %v1966_v57, %s5659_s15  ;;  %v1968_v39 = vadd.f32 %v1966_v57, %v6092_v10 }
0x22ed   :  { %v4555_v58 = vmul.f32 -1.442695, %v1968_v39 }
0x22ef   :  { %5306 = vpow2.f32 %v4555_v58 }
0x22fc   :  { %v5307_v59 = vpop.eup %5306 }
0x22fd   :  { %v1972_v60 = vadd.f32 1.0, %v5307_v59 }
0x22ff   :  { %5308 = vrcp.f32 %v1972_v60 }
0x230c   :  { %v5309_v62 = vpop.eup %5308 }
0x230d   :  { %v1985_v7 = vsub.f32 1.0, %v5309_v62  ;;  %v1993_v13 = vmul.f32 %v5309_v62, %v1991_v8  ;;  %v5430_v8 = vld [vmem:[#allocation6 + $0x8] sm:$0xff] }
0x235d   :  { %v1976_v63 = vpop.permute.xlu0 %1975 }
0x235e   :  { %v1978_v1 = vmul.f32 %v5309_v62, %v1976_v63 }
0x2360   :  { %1980 = vrot.lane.b32.xlu1 %v1978_v1, %s5659_s15 }
0x23d2   :  { %v1981_v3 = vpop.permute.xlu1 %1980 }
0x23d3   :  { %v1983_v5 = vadd.f32 %v1981_v3, %v6092_v10 }
0x23d5   :  { %5310 = vtanh.f32 %v1983_v5 }
0x23e2   :  { %v5311_v6 = vpop.eup %5310 }
0x23e3   :  { %1987 = vrot.lane.b32.xlu0 %v5311_v6, %s5660_s20 }
0x2455   :  { %v1988_v9 = vpop.permute.xlu0 %1987 }
0x2456   :  { %v1990_v14 = vmul.f32 %v1988_v9, %v1985_v7  ;;  %v5431_v9 = vld [vmem:[#allocation6] sm:$0xff] }
0x2458   :  { %v6187_v16 = vadd.f32 %v1993_v13, %v1990_v14 }
0x245a   :  { %v2000_v17 = vrot.slane %v6187_v16, 4  ;;  %v2101_v33 = vrot.slane %v6187_v16, 7 }
0x245c   :  { %2001 = vrot.lane.b32.xlu1 %v2000_v17, %s5660_s20 }
0x24ce   :  { %v2002_v18 = vpop.permute.xlu1 %2001 }
0x24cf   :  { %4978 = vmatmul.mubr.msk.f32.vlgmr.msra.gmra.mxu0 %vm502_vm5, %v2002_v18 }
0x24d0   :  { %4992 = vmatpush3.msra.mxu0 %v6019_v15  ;;  %4999 = vmatprep.mubr.msk.f32.mxu0 %vm5658_vm0, %v5657_v0 }
0x24d1   :  { %4993 = vmatprep.subr.mxu0 %v5657_v0 }
0x24d2   :  { %4994 = vmatpush3.msra.mxu0 %v6021_v52 }
0x24d3   :  { %4995 = vmatprep.subr.mxu0 %v5657_v0 }
0x24d4   :  { %4996 = vmatpush3.msra.mxu0 %v6026_v48 }
0x24d5   :  { %4997 = vmatprep.subr.mxu0 %v5657_v0 }
0x24d6   :  { %4998 = vmatpush3.msra.mxu0 %v6030_v55 }
0x24d7   :  { %5013 = vmatprep.subr.mxu0 %v5657_v0 }
0x258f   :  { %v2071_v20 = vpop.f32.mrf.mxu0 }
0x2590   :  { %v2072_v15 = vadd.f32 %v2071_v20, %v6070_v2 }
0x2591   :  { %v4979_v21 = vpop.f32.mrf.mxu0 }
0x2592   :  { %v2076_v23 = vrot.slane %v2072_v15, 3 }
0x2594   :  { %2085 = vrot.lane.b32.xlu0 %v2076_v23, %s5659_s15  ;;  %v2078_v25 = vadd.f32 %v2076_v23, %v6092_v10 }
0x2596   :  { %v4557_v52 = vmul.f32 -1.442695, %v2078_v25 }
0x2598   :  { %5312 = vpow2.f32 %v4557_v52 }
0x25a5   :  { %v5313_v26 = vpop.eup %5312 }
0x25a6   :  { %v2082_v27 = vadd.f32 1.0, %v5313_v26 }
0x25a8   :  { %5314 = vrcp.f32 %v2082_v27 }
0x25b5   :  { %v5315_v48 = vpop.eup %5314 }
0x25b6   :  { %v2095_v32 = vsub.f32 1.0, %v5315_v48  ;;  %v2103_v35 = vmul.f32 %v5315_v48, %v2101_v33 }
0x2606   :  { %v2086_v28 = vpop.permute.xlu0 %2085 }
0x2607   :  { %v2088_v29 = vmul.f32 %v5315_v48, %v2086_v28 }
0x2609   :  { %2090 = vrot.lane.b32.xlu1 %v2088_v29, %s5659_s15 }
0x267b   :  { %v2091_v55 = vpop.permute.xlu1 %2090 }
0x267c   :  { %v2093_v30 = vadd.f32 %v2091_v55, %v6092_v10  ;;  %v166_v55 = vld [vmem:[#allocation14 + $0x10] sm:$0xff] }
0x267e   :  { %5316 = vtanh.f32 %v2093_v30  ;;  %v165_v30 = vld [vmem:[#allocation14 + $0x8] sm:$0xff] }
0x268b   :  { %v5317_v31 = vpop.eup %5316 }
0x268c   :  { %2097 = vrot.lane.b32.xlu0 %v5317_v31, %s5660_s20  ;;  %v164_v31 = vld [vmem:[#allocation14] sm:$0xff] }
0x26fe   :  { %v2098_v34 = vpop.permute.xlu0 %2097 }
0x26ff   :  { %v2100_v40 = vmul.f32 %v2098_v34, %v2095_v32 }
0x2701   :  { %v2104_v41 = vadd.f32 %v2103_v35, %v2100_v40 }
0x2703   :  { %v2110_v45 = vrot.slane %v2104_v41, 5  ;;  %v2211_v62 = vrot.slane %v2104_v41, 7 }
0x2705   :  { %2111 = vrot.lane.b32.xlu1 %v2110_v45, %s5660_s20 }
0x2777   :  { %v2112_v46 = vpop.permute.xlu1 %2111 }
0x2778   :  { %4989 = vmatmul.mubr.msk.f32.vlgmr.msra.gmra.mxu1 %vm502_vm5, %v2112_v46  ;;  %v2411_v46 = vrot.slane %v6060_v61, 7  ;;  %v5432_v61 = vld [vmem:[%s6705_s2] ss:$0 sm:$0xff] }
0x2779   :  { %5010 = vmatprep.mubr.msk.f32.mxu1 %vm5658_vm0, %v5657_v0 }
0x2838   :  { %v2181_v47 = vpop.f32.mrf.mxu1 }
0x2839   :  { %v2182_v36 = vadd.f32 %v2181_v47, %v6070_v2 }
0x283a   :  { %v4990_v42 = vpop.f32.mrf.mxu1 }
0x283b   :  { %v2186_v49 = vrot.slane %v2182_v36, 2 }
0x283d   :  { %2195 = vrot.lane.b32.xlu0 %v2186_v49, %s5659_s15  ;;  %v2188_v50 = vadd.f32 %v2186_v49, %v6092_v10 }
0x283f   :  { %v4559_v37 = vmul.f32 -1.442695, %v2188_v50 }
0x2841   :  { %5318 = vpow2.f32 %v4559_v37 }
0x284e   :  { %v5319_v24 = vpop.eup %5318 }
0x284f   :  { %v2192_v53 = vadd.f32 1.0, %v5319_v24 }
0x2851   :  { %5320 = vrcp.f32 %v2192_v53  ;;  %v5433_v53 = vld [vmem:[#allocation8 + $0x8] sm:$0xff] }
0x285e   :  { %v5321_v43 = vpop.eup %5320 }
0x285f   :  { %v2205_v60 = vsub.f32 1.0, %v5321_v43  ;;  %v2213_v1 = vmul.f32 %v5321_v43, %v2211_v62 }
0x28af   :  { %v2196_v38 = vpop.permute.xlu0 %2195 }
0x28b0   :  { %v2198_v57 = vmul.f32 %v5321_v43, %v2196_v38  ;;  %v5434_v43 = vld [vmem:[#allocation8] sm:$0xff]  ;;  %v4562_v38 = vld [vmem:[%s6715_s12] ss:$0 sm:$0xff] }
0x28b2   :  { %2200 = vrot.lane.b32.xlu1 %v2198_v57, %s5659_s15 }
0x2924   :  { %v2201_v39 = vpop.permute.xlu1 %2200 }
0x2925   :  { %v2203_v58 = vadd.f32 %v2201_v39, %v6092_v10 }
0x2927   :  { %5322 = vtanh.f32 %v2203_v58 }
0x2934   :  { %v5323_v59 = vpop.eup %5322 }
0x2935   :  { %2207 = vrot.lane.b32.xlu0 %v5323_v59, %s5660_s20 }
0x29a7   :  { %v2208_v63 = vpop.permute.xlu0 %2207 }
0x29a8   :  { %v2210_v3 = vmul.f32 %v2208_v63, %v2205_v60 }
0x29aa   :  { %v6219_v5 = vadd.f32 %v2213_v1, %v2210_v3 }
0x29ac   :  { %v2220_v6 = vrot.slane %v6219_v5, 6  ;;  %v2321_v32 = vrot.slane %v6219_v5, 7 }
0x29ae   :  { %2221 = vrot.lane.b32.xlu1 %v2220_v6, %s5660_s20 }
0x2a20   :  { %v2222_v7 = vpop.permute.xlu1 %2221 }
0x2a21   :  { %5000 = vmatmul.mubr.msk.f32.vlgmr.msra.gmra.mxu0 %vm502_vm5, %v2222_v7 }
0x2a22   :  { %5014 = vmatpush3.msra.mxu0 %v5430_v8  ;;  %5017 = vmatprep.mubr.msk.f32.mxu0 %vm5658_vm0, %v5657_v0 }
0x2a23   :  { %5015 = vmatprep.subr.mxu0 %v5657_v0 }
0x2a24   :  { %5016 = vmatpush3.msra.mxu0 %v5431_v9 }
0x2a25   :  { %5025 = vmatprep.subr.mxu0 %v5657_v0 }
0x2ae1   :  { %v2291_v13 = vpop.f32.mrf.mxu0 }
0x2ae2   :  { %v2292_v14 = vadd.f32 %v2291_v13, %v6070_v2  ;;  %v2424_v2 = vld [vmem:[#allocation3 + $0x8] sm:$0xff] }
0x2ae3   :  { %v5001_v17 = vpop.f32.mrf.mxu0  ;;  %5018 = vmatmul.mubr.msk.f32.vlgmr.msra.gmra.mxu0 %vm176_vm1, %v2424_v2 }
0x2ae4   :  { %v2296_v18 = vrot.slane %v2292_v14, 1  ;;  %5026 = vmatpush3.msra.mxu0 %v2424_v2  ;;  %5027 = vmatprep.mubr.msk.f32.mxu0 %vm5658_vm0, %v5657_v0 }
0x2ae5   :  { %5037 = vmatprep.subr.mxu0 %v5657_v0 }
0x2ae6   :  { %2305 = vrot.lane.b32.xlu0 %v2296_v18, %s5659_s15  ;;  %v2298_v20 = vadd.f32 %v2296_v18, %v6092_v10 }
0x2ae8   :  { %v4561_v15 = vmul.f32 -1.442695, %v2298_v20 }
0x2aea   :  { %5324 = vpow2.f32 %v4561_v15 }
0x2af7   :  { %v5325_v21 = vpop.eup %5324 }
0x2af8   :  { %v2302_v23 = vadd.f32 1.0, %v5325_v21 }
0x2afa   :  { %5326 = vrcp.f32 %v2302_v23 }
0x2b07   :  { %v5327_v25 = vpop.eup %5326 }
0x2b08   :  { %v2323_v34 = vmul.f32 %v5327_v25, %v2321_v32 }
0x2b58   :  { %v2306_v52 = vpop.permute.xlu0 %2305 }
0x2b59   :  { %v2308_v26 = vmul.f32 %v5327_v25, %v2306_v52 }
0x2b5b   :  { %2310 = vrot.lane.b32.xlu1 %v2308_v26, %s5659_s15  ;;  %v6289_v26 = vld [vmem:[#allocation9 + $0x18] sm:$0xff] }
0x2b5f   :  { %1666 = vrot.lane.b32.xlu1 %v6121_v56, %s5660_s20 }
0x2b63   :  { %1886 = vrot.lane.b32.xlu1 %v6165_v51, %s5660_s20 }
0x2b67   :  { %2106 = vrot.lane.b32.xlu1 %v2104_v41, %s5660_s20 }
0x2bcd   :  { %v2311_v27 = vpop.permute.xlu1 %2310 }
0x2bce   :  { %v2313_v48 = vadd.f32 %v2311_v27, %v6092_v10  ;;  %v167_v10 = vld [vmem:[#allocation14 + $0x18] sm:$0xff]  ;;  %v6299_v27 = vld [vmem:[#allocation9 + $0x8] sm:$0xff] }
0x2bcf   :  { %5003 = vmatpush3.msra.mxu1 %v167_v10 }
0x2bd0   :  { %5328 = vtanh.f32 %v2313_v48  ;;  %5004 = vmatprep.subr.mxu1 %v5657_v0  ;;  %v6303_v48 = vld [vmem:[#allocation9] sm:$0xff] }
0x2bd1   :  { %v1667_v28 = vpop.permute.xlu1 %1666  ;;  %5005 = vmatpush3.msra.mxu1 %v166_v55 }
0x2bd2   :  { %1669 = vst.msk [vmem:[#allocation2] sm:$0x2] %vm714_vm6, %v1667_v28  ;;  %5006 = vmatprep.subr.mxu1 %v5657_v0 }
0x2bd3   :  { %5007 = vmatpush3.msra.mxu1 %v165_v30 }
0x2bd4   :  { %5008 = vmatprep.subr.mxu1 %v5657_v0 }
0x2bd5   :  { %v1887_v56 = vpop.permute.xlu1 %1886  ;;  %5009 = vmatpush3.msra.mxu1 %v164_v31 }
0x2bd6   :  { %1889 = vst.msk [vmem:[#allocation2] sm:$0x8] %vm936_vm7, %v1887_v56  ;;  %5020 = vmatprep.subr.mxu1 %v5657_v0 }
0x2bd9   :  { %v2107_v51 = vpop.permute.xlu1 %2106 }
0x2bda   :  { %2109 = vst.msk [vmem:[#allocation2] sm:$0x20] %vm1158_vm8, %v2107_v51 }
0x2bdd   :  { %v5329_v29 = vpop.eup %5328 }
0x2bde   :  { %2317 = vrot.lane.b32.xlu0 %v5329_v29, %s5660_s20  ;;  %v5439_v29 = vld [vmem:[%s6708_s5] ss:$0 sm:$0xff] }
0x2be2   :  { %1776 = vrot.lane.b32.xlu0 %v6143_v22, %s5660_s20  ;;  %v2315_v22 = vsub.f32 1.0, %v5327_v25 }
0x2be6   :  { %1996 = vrot.lane.b32.xlu0 %v6187_v16, %s5660_s20  ;;  %v2494_v16 = vpop.f32.mrf.mxu0 }
0x2be7   :  { %v2495_v24 = vadd.f32 %v5432_v61, %v2494_v16 }
0x2be8   :  { %v5019_v40 = vpop.f32.mrf.mxu0 }
0x2bea   :  { %2216 = vrot.lane.b32.xlu0 %v6219_v5, %s5660_s20 }
0x2c50   :  { %v2318_v33 = vpop.permute.xlu0 %2317 }
0x2c51   :  { %v2320_v35 = vmul.f32 %v2318_v33, %v2315_v22 }
0x2c53   :  { %v2324_v41 = vadd.f32 %v2323_v34, %v2320_v35 }
0x2c54   :  { %v1777_v45 = vpop.permute.xlu0 %1776 }
0x2c55   :  { %v2413_v47 = vrot.slane %v2324_v41, 6  ;;  %1779 = vst.msk [vmem:[#allocation2] sm:$0x4] %vm825_vm9, %v1777_v45  ;;  %2326 = vrot.lane.b32.xlu1 %v2324_v41, %s5660_s20 }
0x2c57   :  { %v6261_v36 = vsel %vm2415_vm13, %v2411_v46, %v2413_v47 }
0x2c58   :  { %v1997_v42 = vpop.permute.xlu0 %1996 }
0x2c59   :  { %1999 = vst.msk [vmem:[#allocation2] sm:$0x10] %vm1047_vm10, %v1997_v42 }
0x2c5c   :  { %v2217_v49 = vpop.permute.xlu0 %2216 }
0x2c5d   :  { %2219 = vst.msk [vmem:[#allocation2] sm:$0x40] %vm1269_vm11, %v2217_v49  ;;  %v6345_v49 = vld [vmem:[%s6709_s6] sm:$0x1] }
0x2cc7   :  { %v2327_v50 = vpop.permute.xlu1 %2326 }
0x2cc8   :  { %2329 = vst.msk [vmem:[#allocation2] sm:$0x80] %vm1380_vm12, %v2327_v50 }
0x2ccf   :  { %v2330_v37 = vld [vmem:[#allocation2] sm:$0xff] }
0x2cd0   :  { %5011 = vmatmul.mubr.msk.f32.vlgmr.msra.gmra.mxu1 %vm502_vm5, %v2330_v37 }
0x2cd1   :  { %5021 = vmatpush3.xpose.msk.msra.mxu1 %vm176_vm1, %v2424_v2  ;;  %5022 = vmatprep.mubr.msk.f32.mxu1 %vm5658_vm0, %v5657_v0  ;;  %v6295_v2 = vld [vmem:[#allocation9 + $0x10] sm:$0xff] }
0x2cd2   :  { %5030 = vmatprep.subr.mxu1 %v5657_v0 }
0x2cd4   :  { %5023 = vmatmul.mubr.msk.f32.vlgmr.msra.gmra.mxu1 %vm176_vm1, %v2495_v24 }
0x2cd5   :  { %5031 = vmatpush3.msra.mxu1 %v5433_v53  ;;  %5034 = vmatprep.mubr.msk.f32.mxu1 %vm5658_vm0, %v5657_v0 }
0x2cd6   :  { %5032 = vmatprep.subr.mxu1 %v5657_v0 }
0x2cd7   :  { %5033 = vmatpush3.msra.mxu1 %v5434_v43 }
0x2cd8   :  { %5048 = vmatprep.subr.mxu1 %v5657_v0 }
0x2d90   :  { %v2406_v57 = vpop.f32.mrf.mxu1 }
0x2d91   :  { %v2407_v39 = vadd.f32 %v4562_v38, %v2406_v57 }
0x2d92   :  { %v5012_v58 = vpop.f32.mrf.mxu1 }
0x2d93   :  { %2410 = vst.msk [vmem:[#allocation15] sm:$0xff] %vm502_vm5, %v2407_v39 }
0x2d94   :  { %v2567_v59 = vpop.f32.mrf.mxu1 }
0x2d95   :  { %v2571_v60 = vmul.f32 0.35355338, %v2567_v59 }
0x2d96   :  { %v5024_v62 = vpop.f32.mrf.mxu1 }
0x2d97   :  { %v2572_v63 = vsel %vm328_vm2, -1e+30, %v2571_v60 }
0x2d98   :  { %v2573_v1 = vsel %vm330_vm3, %v2572_v63, -inf }
0x2d99   :  { %v2574_v3 = vrot.slane %v2573_v1, 4 }
0x2d9b   :  { %v2575_v5 = vmax.f32 %v2573_v1, %v2574_v3 }
0x2d9d   :  { %v2576_v6 = vrot.slane %v2575_v5, 2 }
0x2d9f   :  { %v2577_v7 = vmax.f32 %v2575_v5, %v2576_v6 }
0x2da1   :  { %v2578_v8 = vrot.slane %v2577_v7, 1 }
0x2da3   :  { %v2579_v9 = vmax.f32 %v2577_v7, %v2578_v8 }
0x2da5   :  { %v2580_v13 = vsub.f32 %v2572_v63, %v2579_v9 }
0x2da7   :  { %v2581_v14 = vmul.f32 1.442695, %v2580_v13 }
0x2da9   :  { %5330 = vpow2.f32 %v2581_v14 }
0x2db6   :  { %v5331_v17 = vpop.eup %5330 }
0x2db7   :  { %v2583_v18 = vsel %vm330_vm3, %v5331_v17, 0.0 }
0x2db8   :  { %v2584_v20 = vrot.slane %v2583_v18, 4 }
0x2dba   :  { %v2585_v15 = vadd.f32 %v2584_v20, %v2583_v18 }
0x2dbc   :  { %v2586_v21 = vrot.slane %v2585_v15, 2 }
0x2dbe   :  { %v2587_v23 = vadd.f32 %v2586_v21, %v2585_v15 }
0x2dc0   :  { %v2588_v11 = vrot.slane %v2587_v23, 1 }
0x2dc2   :  { %v2589_v12 = vadd.f32 %v2588_v11, %v2587_v23 }
0x2dc4   :  { %5332 = vrcp.f32 %v2589_v12 }
0x2dd1   :  { %v5333_v25 = vpop.eup %5332 }
0x2dd2   :  { %v2591_v52 = vmul.f32 %v5333_v25, %v5331_v17 }
0x2dd4   :  { %5028 = vmatmul.mubr.msk.f32.vlgmr.msra.gmra.mxu0 %vm330_vm3, %v2591_v52 }
0x2dd5   :  { %5038 = vmatpush3.msra.mxu0 %v6289_v26  ;;  %5045 = vmatprep.mubr.msk.f32.mxu0 %vm5658_vm0, %v5657_v0 }
0x2dd6   :  { %5039 = vmatprep.subr.mxu0 %v5657_v0 }
0x2dd7   :  { %5040 = vmatpush3.msra.mxu0 %v6295_v2 }
0x2dd8   :  { %5041 = vmatprep.subr.mxu0 %v5657_v0 }
0x2dd9   :  { %5042 = vmatpush3.msra.mxu0 %v6299_v27 }
0x2dda   :  { %5043 = vmatprep.subr.mxu0 %v5657_v0 }
0x2ddb   :  { %5044 = vmatpush3.msra.mxu0 %v6303_v48 }
0x2ddc   :  { %5059 = vmatprep.subr.mxu0 %v5657_v0 }
0x2e94   :  { %v2661_v28 = vpop.f32.mrf.mxu0 }
0x2e95   :  { %5035 = vmatmul.mubr.msk.f32.vlgmr.msra.gmra.mxu1 %vm176_vm1, %v2661_v28 }
0x2e96   :  { %v5029_v56 = vpop.f32.mrf.mxu0  ;;  %5049 = vmatpush3.msra.mxu1 %v6289_v26  ;;  %5056 = vmatprep.mubr.msk.f32.mxu1 %vm5658_vm0, %v5657_v0 }
0x2e97   :  { %5050 = vmatprep.subr.mxu1 %v5657_v0 }
0x2e98   :  { %5051 = vmatpush3.msra.mxu1 %v6295_v2 }
0x2e99   :  { %5052 = vmatprep.subr.mxu1 %v5657_v0 }
0x2e9a   :  { %5053 = vmatpush3.msra.mxu1 %v6299_v27 }
0x2e9b   :  { %5054 = vmatprep.subr.mxu1 %v5657_v0 }
0x2e9c   :  { %5055 = vmatpush3.msra.mxu1 %v6303_v48 }
0x2e9d   :  { %5070 = vmatprep.subr.mxu1 %v5657_v0 }
0x2f55   :  { %v2734_v51 = vpop.f32.mrf.mxu1 }
0x2f56   :  { %v6321_v10 = vadd.f32 %v5439_v29, %v2734_v51 }
0x2f57   :  { %v5036_v55 = vpop.f32.mrf.mxu1 }
0x2f58   :  { %v2738_v30 = vadd.f32 %v6321_v10, %v5861_v44 }
0x2f5a   :  { %v4569_v31 = vmul.f32 -1.442695, %v2738_v30 }
0x2f5c   :  { %5334 = vpow2.f32 %v4569_v31 }
0x2f69   :  { %v5335_v22 = vpop.eup %5334 }
0x2f6a   :  { %v2742_v32 = vadd.f32 1.0, %v5335_v22 }
0x2f6c   :  { %5336 = vrcp.f32 %v2742_v32 }
0x2f79   :  { %v5337_v16 = vpop.eup %5336 }
0x2f7a   :  { %v2745_v33 = vmul.f32 %v5337_v16, %v5873_v54  ;;  %v2752_v41 = vsub.f32 1.0, %v5337_v16  ;;  %v2758_v44 = vmul.f32 0.0, %v5337_v16 }
0x2f7c   :  { %2747 = vrot.lane.b32.xlu0 %v2745_v33, %s5659_s15 }
0x2fee   :  { %v2748_v34 = vpop.permute.xlu0 %2747 }
0x2fef   :  { %v2750_v35 = vadd.f32 %v2748_v34, %v6321_v10 }
0x2ff1   :  { %5338 = vtanh.f32 %v2750_v35 }
0x2ffe   :  { %v5339_v40 = vpop.eup %5338 }
0x2fff   :  { %2754 = vrot.lane.b32.xlu1 %v5339_v40, %s5660_s20 }
0x3071   :  { %v2755_v45 = vpop.permute.xlu1 %2754 }
0x3072   :  { %v2757_v46 = vmul.f32 %v2755_v45, %v2752_v41 }
0x3074   :  { %v2759_v47 = vadd.f32 %v2758_v44, %v2757_v46 }
0x3076   :  { %2761 = vrot.lane.b32.xlu0 %v2759_v47, %s5660_s20  ;;  %v2863_v63 = vrot.slane %v2759_v47, 7 }
0x30e8   :  { %v2762_v42 = vpop.permute.xlu0 %2761 }
0x30e9   :  { %2764 = vst.msk [vmem:[#allocation2] sm:$0x1] %vm606_vm4, %v2762_v42  ;;  %5046 = vmatmul.mubr.msk.f32.vlgmr.msra.gmra.mxu0 %vm502_vm5, %v2762_v42 }
0x30ea   :  { %5060 = vmatpush3.msra.mxu0 %v6289_v26  ;;  %5067 = vmatprep.mubr.msk.f32.mxu0 %vm5658_vm0, %v5657_v0 }
0x30eb   :  { %5061 = vmatprep.subr.mxu0 %v5657_v0 }
0x30ec   :  { %5062 = vmatpush3.msra.mxu0 %v6295_v2 }
0x30ed   :  { %5063 = vmatprep.subr.mxu0 %v5657_v0 }
0x30ee   :  { %5064 = vmatpush3.msra.mxu0 %v6299_v27 }
0x30ef   :  { %5065 = vmatprep.subr.mxu0 %v5657_v0 }
0x30f0   :  { %5066 = vmatpush3.msra.mxu0 %v6303_v48 }
0x30f1   :  { %5081 = vmatprep.subr.mxu0 %v5657_v0 }
0x31a9   :  { %v2833_v54 = vpop.f32.mrf.mxu0 }
0x31aa   :  { %v2834_v50 = vadd.f32 %v6345_v49, %v2833_v54 }
0x31ab   :  { %v5047_v37 = vpop.f32.mrf.mxu0 }
0x31ac   :  { %v2838_v61 = vrot.slane %v2834_v50, 7 }
0x31ae   :  { %2847 = vrot.lane.b32.xlu1 %v2838_v61, %s5659_s15  ;;  %v2840_v24 = vadd.f32 %v2838_v61, %v6321_v10 }
0x31b0   :  { %v4571_v53 = vmul.f32 -1.442695, %v2840_v24 }
0x31b2   :  { %5340 = vpow2.f32 %v4571_v53 }
0x31bf   :  { %v5341_v43 = vpop.eup %5340 }
0x31c0   :  { %v2844_v38 = vadd.f32 1.0, %v5341_v43 }
0x31c2   :  { %5342 = vrcp.f32 %v2844_v38 }
0x31cf   :  { %v5343_v57 = vpop.eup %5342 }
0x31d0   :  { %v2857_v1 = vsub.f32 1.0, %v5343_v57  ;;  %v2865_v5 = vmul.f32 %v5343_v57, %v2863_v63 }
0x3220   :  { %v2848_v39 = vpop.permute.xlu1 %2847 }
0x3221   :  { %v2850_v58 = vmul.f32 %v5343_v57, %v2848_v39 }
0x3223   :  { %2852 = vrot.lane.b32.xlu0 %v2850_v58, %s5659_s15 }
0x3295   :  { %v2853_v59 = vpop.permute.xlu0 %2852 }
0x3296   :  { %v2855_v60 = vadd.f32 %v2853_v59, %v6321_v10 }
0x3298   :  { %5344 = vtanh.f32 %v2855_v60 }
0x32a5   :  { %v5345_v62 = vpop.eup %5344 }
0x32a6   :  { %2859 = vrot.lane.b32.xlu1 %v5345_v62, %s5660_s20 }
0x3318   :  { %v2860_v3 = vpop.permute.xlu1 %2859 }
0x3319   :  { %v2862_v6 = vmul.f32 %v2860_v3, %v2857_v1 }
0x331b   :  { %v6353_v7 = vadd.f32 %v2865_v5, %v2862_v6 }
0x331d   :  { %v2872_v8 = vrot.slane %v6353_v7, 1  ;;  %v2973_v29 = vrot.slane %v6353_v7, 7 }
0x331f   :  { %2873 = vrot.lane.b32.xlu0 %v2872_v8, %s5660_s20 }
0x3391   :  { %v2874_v9 = vpop.permute.xlu0 %2873 }
0x3392   :  { %5057 = vmatmul.mubr.msk.f32.vlgmr.msra.gmra.mxu1 %vm502_vm5, %v2874_v9 }
0x3393   :  { %5071 = vmatpush3.msra.mxu1 %v6289_v26  ;;  %5078 = vmatprep.mubr.msk.f32.mxu1 %vm5658_vm0, %v5657_v0 }
0x3394   :  { %5072 = vmatprep.subr.mxu1 %v5657_v0 }
0x3395   :  { %5073 = vmatpush3.msra.mxu1 %v6295_v2 }
0x3396   :  { %5074 = vmatprep.subr.mxu1 %v5657_v0 }
0x3397   :  { %5075 = vmatpush3.msra.mxu1 %v6299_v27 }
0x3398   :  { %5076 = vmatprep.subr.mxu1 %v5657_v0 }
0x3399   :  { %5077 = vmatpush3.msra.mxu1 %v6303_v48 }
0x339a   :  { %5092 = vmatprep.subr.mxu1 %v5657_v0 }
0x3452   :  { %v2943_v13 = vpop.f32.mrf.mxu1 }
0x3453   :  { %v2944_v14 = vadd.f32 %v6345_v49, %v2943_v13 }
0x3454   :  { %v5058_v17 = vpop.f32.mrf.mxu1 }
0x3455   :  { %v2948_v18 = vrot.slane %v2944_v14, 6 }
0x3457   :  { %2957 = vrot.lane.b32.xlu1 %v2948_v18, %s5659_s15  ;;  %v2950_v20 = vadd.f32 %v2948_v18, %v6321_v10 }
0x3459   :  { %v4573_v15 = vmul.f32 -1.442695, %v2950_v20 }
0x345b   :  { %5346 = vpow2.f32 %v4573_v15 }
0x3468   :  { %v5347_v21 = vpop.eup %5346 }
0x3469   :  { %v2954_v23 = vadd.f32 1.0, %v5347_v21 }
0x346b   :  { %5348 = vrcp.f32 %v2954_v23 }
0x3478   :  { %v5349_v11 = vpop.eup %5348 }
0x3479   :  { %v2967_v51 = vsub.f32 1.0, %v5349_v11  ;;  %v2975_v30 = vmul.f32 %v5349_v11, %v2973_v29 }
0x34c9   :  { %v2958_v12 = vpop.permute.xlu1 %2957 }
0x34ca   :  { %v2960_v25 = vmul.f32 %v5349_v11, %v2958_v12 }
0x34cc   :  { %2962 = vrot.lane.b32.xlu0 %v2960_v25, %s5659_s15 }
0x353e   :  { %v2963_v52 = vpop.permute.xlu0 %2962 }
0x353f   :  { %v2965_v28 = vadd.f32 %v2963_v52, %v6321_v10 }
0x3541   :  { %5350 = vtanh.f32 %v2965_v28 }
0x354e   :  { %v5351_v56 = vpop.eup %5350 }
0x354f   :  { %2969 = vrot.lane.b32.xlu1 %v5351_v56, %s5660_s20 }
0x35c1   :  { %v2970_v55 = vpop.permute.xlu1 %2969 }
0x35c2   :  { %v2972_v31 = vmul.f32 %v2970_v55, %v2967_v51 }
0x35c4   :  { %v6375_v22 = vadd.f32 %v2975_v30, %v2972_v31 }
0x35c6   :  { %v2982_v32 = vrot.slane %v6375_v22, 2  ;;  %v3083_v53 = vrot.slane %v6375_v22, 7 }
0x35c8   :  { %2983 = vrot.lane.b32.xlu0 %v2982_v32, %s5660_s20 }
0x363a   :  { %v2984_v16 = vpop.permute.xlu0 %2983 }
0x363b   :  { %5068 = vmatmul.mubr.msk.f32.vlgmr.msra.gmra.mxu0 %vm502_vm5, %v2984_v16 }
0x363c   :  { %5082 = vmatpush3.msra.mxu0 %v6289_v26  ;;  %5089 = vmatprep.mubr.msk.f32.mxu0 %vm5658_vm0, %v5657_v0 }
0x363d   :  { %5083 = vmatprep.subr.mxu0 %v5657_v0 }
0x363e   :  { %5084 = vmatpush3.msra.mxu0 %v6295_v2 }
0x363f   :  { %5085 = vmatprep.subr.mxu0 %v5657_v0 }
0x3640   :  { %5086 = vmatpush3.msra.mxu0 %v6299_v27 }
0x3641   :  { %5087 = vmatprep.subr.mxu0 %v5657_v0 }
0x3642   :  { %5088 = vmatpush3.msra.mxu0 %v6303_v48 }
0x3643   :  { %5103 = vmatprep.subr.mxu0 %v5657_v0 }
0x36fb   :  { %v3053_v33 = vpop.f32.mrf.mxu0 }
0x36fc   :  { %v3054_v34 = vadd.f32 %v6345_v49, %v3053_v33 }
0x36fd   :  { %v5069_v35 = vpop.f32.mrf.mxu0 }
0x36fe   :  { %v3058_v40 = vrot.slane %v3054_v34, 5 }
0x3700   :  { %3067 = vrot.lane.b32.xlu1 %v3058_v40, %s5659_s15  ;;  %v3060_v41 = vadd.f32 %v3058_v40, %v6321_v10 }
0x3702   :  { %v4575_v45 = vmul.f32 -1.442695, %v3060_v41 }
0x3704   :  { %5352 = vpow2.f32 %v4575_v45 }
0x3711   :  { %v5353_v44 = vpop.eup %5352 }
0x3712   :  { %v3064_v46 = vadd.f32 1.0, %v5353_v44 }
0x3714   :  { %5354 = vrcp.f32 %v3064_v46 }
0x3721   :  { %v5355_v47 = vpop.eup %5354 }
0x3722   :  { %v3077_v24 = vsub.f32 1.0, %v5355_v47  ;;  %v3085_v38 = vmul.f32 %v5355_v47, %v3083_v53 }
0x3772   :  { %v3068_v42 = vpop.permute.xlu1 %3067 }
0x3773   :  { %v3070_v54 = vmul.f32 %v5355_v47, %v3068_v42 }
0x3775   :  { %3072 = vrot.lane.b32.xlu0 %v3070_v54, %s5659_s15  ;;  %v5441_v54 = vld [vmem:[#allocation11 + $0x18] sm:$0xff] }
0x37e7   :  { %v3073_v50 = vpop.permute.xlu0 %3072 }
0x37e8   :  { %v3075_v37 = vadd.f32 %v3073_v50, %v6321_v10  ;;  %v5442_v50 = vld [vmem:[#allocation11 + $0x10] sm:$0xff] }
0x37ea   :  { %5356 = vtanh.f32 %v3075_v37  ;;  %v5443_v37 = vld [vmem:[#allocation11 + $0x8] sm:$0xff] }
0x37f7   :  { %v5357_v61 = vpop.eup %5356 }
0x37f8   :  { %3079 = vrot.lane.b32.xlu1 %v5357_v61, %s5660_s20  ;;  %v5444_v61 = vld [vmem:[#allocation11] sm:$0xff] }
0x386a   :  { %v3080_v43 = vpop.permute.xlu1 %3079 }
0x386b   :  { %v3082_v57 = vmul.f32 %v3080_v43, %v3077_v24 }
0x386d   :  { %v6397_v39 = vadd.f32 %v3085_v38, %v3082_v57 }
0x386f   :  { %v3092_v58 = vrot.slane %v6397_v39, 3  ;;  %v3193_v21 = vrot.slane %v6397_v39, 7 }
0x3871   :  { %3093 = vrot.lane.b32.xlu0 %v3092_v58, %s5660_s20 }
0x38e3   :  { %v3094_v59 = vpop.permute.xlu0 %3093 }
0x38e4   :  { %5079 = vmatmul.mubr.msk.f32.vlgmr.msra.gmra.mxu1 %vm502_vm5, %v3094_v59 }
0x38e5   :  { %5093 = vmatpush3.msra.mxu1 %v6289_v26  ;;  %5100 = vmatprep.mubr.msk.f32.mxu1 %vm5658_vm0, %v5657_v0 }
0x38e6   :  { %5094 = vmatprep.subr.mxu1 %v5657_v0 }
0x38e7   :  { %5095 = vmatpush3.msra.mxu1 %v6295_v2 }
0x38e8   :  { %5096 = vmatprep.subr.mxu1 %v5657_v0 }
0x38e9   :  { %5097 = vmatpush3.msra.mxu1 %v6299_v27 }
0x38ea   :  { %5098 = vmatprep.subr.mxu1 %v5657_v0 }
0x38eb   :  { %5099 = vmatpush3.msra.mxu1 %v6303_v48 }
0x38ec   :  { %5114 = vmatprep.subr.mxu1 %v5657_v0 }
0x39a4   :  { %v3163_v60 = vpop.f32.mrf.mxu1 }
0x39a5   :  { %v3164_v62 = vadd.f32 %v6345_v49, %v3163_v60 }
0x39a6   :  { %v5080_v63 = vpop.f32.mrf.mxu1 }
0x39a7   :  { %v3168_v1 = vrot.slane %v3164_v62, 4 }
0x39a9   :  { %3177 = vrot.lane.b32.xlu1 %v3168_v1, %s5659_s15  ;;  %v3170_v3 = vadd.f32 %v3168_v1, %v6321_v10 }
0x39ab   :  { %v4577_v5 = vmul.f32 -1.442695, %v3170_v3 }
0x39ad   :  { %5358 = vpow2.f32 %v4577_v5 }
0x39ba   :  { %v5359_v6 = vpop.eup %5358 }
0x39bb   :  { %v3174_v8 = vadd.f32 1.0, %v5359_v6 }
0x39bd   :  { %5360 = vrcp.f32 %v3174_v8 }
0x39ca   :  { %v5361_v9 = vpop.eup %5360 }
0x39cb   :  { %v3187_v15 = vsub.f32 1.0, %v5361_v9  ;;  %v3195_v11 = vmul.f32 %v5361_v9, %v3193_v21  ;;  %v6461_v21 = vld [vmem:[#allocation12 + $0x18] sm:$0xff] }
0x3a1b   :  { %v3178_v13 = vpop.permute.xlu1 %3177 }
0x3a1c   :  { %v3180_v14 = vmul.f32 %v5361_v9, %v3178_v13 }
0x3a1e   :  { %3182 = vrot.lane.b32.xlu0 %v3180_v14, %s5659_s15 }
0x3a90   :  { %v3183_v17 = vpop.permute.xlu0 %3182 }
0x3a91   :  { %v3185_v18 = vadd.f32 %v3183_v17, %v6321_v10 }
0x3a93   :  { %5362 = vtanh.f32 %v3185_v18 }
0x3aa0   :  { %v5363_v20 = vpop.eup %5362 }
0x3aa1   :  { %3189 = vrot.lane.b32.xlu1 %v5363_v20, %s5660_s20 }
0x3b13   :  { %v3190_v23 = vpop.permute.xlu1 %3189 }
0x3b14   :  { %v3192_v12 = vmul.f32 %v3190_v23, %v3187_v15  ;;  %v6467_v23 = vld [vmem:[#allocation12 + $0x10] sm:$0xff] }
0x3b16   :  { %v6419_v25 = vadd.f32 %v3195_v11, %v3192_v12  ;;  %v6471_v11 = vld [vmem:[#allocation12 + $0x8] sm:$0xff]  ;;  %v6475_v12 = vld [vmem:[#allocation12] sm:$0xff] }
0x3b18   :  { %v3202_v52 = vrot.slane %v6419_v25, 4  ;;  %v3303_v40 = vrot.slane %v6419_v25, 7 }
0x3b1a   :  { %3203 = vrot.lane.b32.xlu0 %v3202_v52, %s5660_s20 }
0x3b8c   :  { %v3204_v28 = vpop.permute.xlu0 %3203 }
0x3b8d   :  { %5090 = vmatmul.mubr.msk.f32.vlgmr.msra.gmra.mxu0 %vm502_vm5, %v3204_v28 }
0x3b8e   :  { %5104 = vmatpush3.msra.mxu0 %v6289_v26  ;;  %5111 = vmatprep.mubr.msk.f32.mxu0 %vm5658_vm0, %v5657_v0 }
0x3b8f   :  { %5105 = vmatprep.subr.mxu0 %v5657_v0 }
0x3b90   :  { %5106 = vmatpush3.msra.mxu0 %v6295_v2 }
0x3b91   :  { %5107 = vmatprep.subr.mxu0 %v5657_v0 }
0x3b92   :  { %5108 = vmatpush3.msra.mxu0 %v6299_v27 }
0x3b93   :  { %5109 = vmatprep.subr.mxu0 %v5657_v0 }
0x3b94   :  { %5110 = vmatpush3.msra.mxu0 %v6303_v48 }
0x3b95   :  { %5125 = vmatprep.subr.mxu0 %v5657_v0 }
0x3c4d   :  { %v3273_v56 = vpop.f32.mrf.mxu0 }
0x3c4e   :  { %v3274_v26 = vadd.f32 %v6345_v49, %v3273_v56 }
0x3c4f   :  { %v5091_v51 = vpop.f32.mrf.mxu0 }
0x3c50   :  { %v3278_v29 = vrot.slane %v3274_v26, 3 }
0x3c52   :  { %3287 = vrot.lane.b32.xlu1 %v3278_v29, %s5659_s15  ;;  %v3280_v55 = vadd.f32 %v3278_v29, %v6321_v10 }
0x3c54   :  { %v4579_v2 = vmul.f32 -1.442695, %v3280_v55 }
0x3c56   :  { %5364 = vpow2.f32 %v4579_v2 }
0x3c63   :  { %v5365_v30 = vpop.eup %5364 }
0x3c64   :  { %v3284_v31 = vadd.f32 1.0, %v5365_v30 }
0x3c66   :  { %5366 = vrcp.f32 %v3284_v31 }
0x3c73   :  { %v5367_v27 = vpop.eup %5366 }
0x3c74   :  { %v3297_v35 = vsub.f32 1.0, %v5367_v27  ;;  %v3305_v45 = vmul.f32 %v5367_v27, %v3303_v40 }
0x3cc4   :  { %v3288_v32 = vpop.permute.xlu1 %3287 }
0x3cc5   :  { %v3290_v16 = vmul.f32 %v5367_v27, %v3288_v32 }
0x3cc7   :  { %3292 = vrot.lane.b32.xlu0 %v3290_v16, %s5659_s15 }
0x3d39   :  { %v3293_v48 = vpop.permute.xlu0 %3292 }
0x3d3a   :  { %v3295_v33 = vadd.f32 %v3293_v48, %v6321_v10 }
0x3d3c   :  { %5368 = vtanh.f32 %v3295_v33 }
0x3d49   :  { %v5369_v34 = vpop.eup %5368 }
0x3d4a   :  { %3299 = vrot.lane.b32.xlu1 %v5369_v34, %s5660_s20 }
0x3dbc   :  { %v3300_v41 = vpop.permute.xlu1 %3299 }
0x3dbd   :  { %v3302_v44 = vmul.f32 %v3300_v41, %v3297_v35 }
0x3dbf   :  { %v6441_v46 = vadd.f32 %v3305_v45, %v3302_v44 }
0x3dc1   :  { %v3312_v47 = vrot.slane %v6441_v46, 5  ;;  %v3413_v9 = vrot.slane %v6441_v46, 7 }
0x3dc3   :  { %3313 = vrot.lane.b32.xlu0 %v3312_v47, %s5660_s20 }
0x3e35   :  { %v3314_v42 = vpop.permute.xlu0 %3313 }
0x3e36   :  { %5101 = vmatmul.mubr.msk.f32.vlgmr.msra.gmra.mxu1 %vm502_vm5, %v3314_v42  ;;  %v5449_v42 = vld [vmem:[%s6712_s9] ss:$0 sm:$0xff] }
0x3e37   :  { %5115 = vmatpush3.msra.mxu1 %v5441_v54  ;;  %5122 = vmatprep.mubr.msk.f32.mxu1 %vm5658_vm0, %v5657_v0 }
0x3e38   :  { %5116 = vmatprep.subr.mxu1 %v5657_v0 }
0x3e39   :  { %5117 = vmatpush3.msra.mxu1 %v5442_v50 }
0x3e3a   :  { %5118 = vmatprep.subr.mxu1 %v5657_v0 }
0x3e3b   :  { %5119 = vmatpush3.msra.mxu1 %v5443_v37 }
0x3e3c   :  { %5120 = vmatprep.subr.mxu1 %v5657_v0 }
0x3e3d   :  { %5121 = vmatpush3.msra.mxu1 %v5444_v61 }
0x3e3e   :  { %5136 = vmatprep.subr.mxu1 %v5657_v0 }
0x3ef6   :  { %v3383_v24 = vpop.f32.mrf.mxu1 }
0x3ef7   :  { %v3384_v53 = vadd.f32 %v6345_v49, %v3383_v24 }
0x3ef8   :  { %v5102_v43 = vpop.f32.mrf.mxu1 }
0x3ef9   :  { %v3388_v38 = vrot.slane %v3384_v53, 2 }
0x3efb   :  { %3397 = vrot.lane.b32.xlu1 %v3388_v38, %s5659_s15  ;;  %v3390_v57 = vadd.f32 %v3388_v38, %v6321_v10 }
0x3efd   :  { %v4581_v58 = vmul.f32 -1.442695, %v3390_v57 }
0x3eff   :  { %5370 = vpow2.f32 %v4581_v58 }
0x3f0c   :  { %v5371_v59 = vpop.eup %5370 }
0x3f0d   :  { %v3394_v60 = vadd.f32 1.0, %v5371_v59 }
0x3f0f   :  { %5372 = vrcp.f32 %v3394_v60 }
0x3f1c   :  { %v5373_v62 = vpop.eup %5372 }
0x3f1d   :  { %v3407_v8 = vsub.f32 1.0, %v5373_v62  ;;  %v3415_v14 = vmul.f32 %v5373_v62, %v3413_v9 }
0x3f6d   :  { %v3398_v63 = vpop.permute.xlu1 %3397 }
0x3f6e   :  { %v3400_v1 = vmul.f32 %v5373_v62, %v3398_v63 }
0x3f70   :  { %3402 = vrot.lane.b32.xlu0 %v3400_v1, %s5659_s15 }
0x3fe2   :  { %v3403_v3 = vpop.permute.xlu0 %3402 }
0x3fe3   :  { %v3405_v5 = vadd.f32 %v3403_v3, %v6321_v10 }
0x3fe5   :  { %5374 = vtanh.f32 %v3405_v5  ;;  %v6545_v5 = vld [vmem:[%s6713_s10] sm:$0x1]  ;;  %s5661_s10 = smov [#allocation16]  }
0x3fe6   :  { %s4504_s29 = sshll.u32 %s5661_s10, 4  ;;  %s4505_s29 = int_to_ptr.vmem [resolvable:$true] %s4504_s29 }
0x3fe7   :  { %s5596_s7 = scalar_lea.vmem %s4505_s29, 64  ;;  %p5601_p8 = scmp.lt.s32.totalorder %s4505_s29, %s4505_s29 }
0x3fe8   :  { %p5597_p7 = scmp.ne.s32.totalorder %s4505_s29, %s5596_s7  ;;  %p5602_p9 = scmp.lt.s32.totalorder %s5596_s7, %s5596_s7 }
0x3fea   :  { %p5603_p10 = por %p5602_p9, %p5601_p8 }
0x3fec   :  { %p5604_p11 = pnand %p5603_p10, %p5597_p7 }
0x3ff2   :  { %v5375_v6 = vpop.eup %5374 }
0x3ff3   :  { %3409 = vrot.lane.b32.xlu1 %v5375_v6, %s5660_s20 }
0x4065   :  { %v3410_v13 = vpop.permute.xlu1 %3409 }
0x4066   :  { %v3412_v17 = vmul.f32 %v3410_v13, %v3407_v8 }
0x4068   :  { %v3416_v18 = vadd.f32 %v3415_v14, %v3412_v17 }
0x406a   :  { %v3422_v20 = vrot.slane %v3416_v18, 6 }
0x406c   :  { %3423 = vrot.lane.b32.xlu0 %v3422_v20, %s5660_s20 }
0x40de   :  { %v3424_v15 = vpop.permute.xlu0 %3423 }
0x40df   :  { %5112 = vmatmul.mubr.msk.f32.vlgmr.msra.gmra.mxu0 %vm502_vm5, %v3424_v15 }
0x40e0   :  { %5126 = vmatpush3.msra.mxu0 %v6461_v21  ;;  %5133 = vmatprep.mubr.msk.f32.mxu0 %vm5658_vm0, %v5657_v0 }
0x40e1   :  { %5127 = vmatprep.subr.mxu0 %v5657_v0 }
0x40e2   :  { %5128 = vmatpush3.msra.mxu0 %v6467_v23 }
0x40e3   :  { %5129 = vmatprep.subr.mxu0 %v5657_v0 }
0x40e4   :  { %5130 = vmatpush3.msra.mxu0 %v6471_v11 }
0x40e5   :  { %5131 = vmatprep.subr.mxu0 %v5657_v0 }
0x40e6   :  { %5132 = vmatpush3.msra.mxu0 %v6475_v12 }
0x40e7   :  { %5147 = vmatprep.subr.mxu0 %v5657_v0 }
0x419f   :  { %v3493_v52 = vpop.f32.mrf.mxu0 }
0x41a0   :  { %v3494_v28 = vadd.f32 %v6345_v49, %v3493_v52 }
0x41a1   :  { %v5113_v56 = vpop.f32.mrf.mxu0 }
0x41a2   :  { %v3498_v26 = vrot.slane %v3494_v28, 1 }
0x41a4   :  { %3507 = vrot.lane.b32.xlu1 %v3498_v26, %s5659_s15  ;;  %v3500_v51 = vadd.f32 %v3498_v26, %v6321_v10 }
0x41a6   :  { %v4583_v29 = vmul.f32 -1.442695, %v3500_v51 }
0x41a8   :  { %5376 = vpow2.f32 %v4583_v29 }
0x41b5   :  { %v5377_v55 = vpop.eup %5376 }
0x41b6   :  { %v3504_v2 = vadd.f32 1.0, %v5377_v55 }
0x41b8   :  { %5378 = vrcp.f32 %v3504_v2 }
0x41c5   :  { %v5379_v30 = vpop.eup %5378 }
0x4216   :  { %v3508_v31 = vpop.permute.xlu1 %3507 }
0x4217   :  { %v3510_v27 = vmul.f32 %v5379_v30, %v3508_v31 }
0x4219   :  { %3512 = vrot.lane.b32.xlu0 %v3510_v27, %s5659_s15 }
0x421d   :  { %2868 = vrot.lane.b32.xlu0 %v6353_v7, %s5660_s20 }
0x4221   :  { %3088 = vrot.lane.b32.xlu0 %v6397_v39, %s5660_s20  ;;  %v3523_v39 = vrot.slane %v3416_v18, 7 }
0x4223   :  { %v3525_v35 = vmul.f32 %v5379_v30, %v3523_v39 }
0x4225   :  { %3308 = vrot.lane.b32.xlu0 %v6441_v46, %s5660_s20 }
0x428b   :  { %v3513_v49 = vpop.permute.xlu0 %3512 }
0x428c   :  { %v3515_v32 = vadd.f32 %v3513_v49, %v6321_v10  ;;  %v3517_v10 = vsub.f32 1.0, %v5379_v30 }
0x428e   :  { %5380 = vtanh.f32 %v3515_v32 }
0x428f   :  { %v2869_v16 = vpop.permute.xlu0 %2868 }
0x4290   :  { %2871 = vst.msk [vmem:[#allocation2] sm:$0x2] %vm714_vm6, %v2869_v16 }
0x4293   :  { %v3089_v48 = vpop.permute.xlu0 %3088 }
0x4294   :  { %3091 = vst.msk [vmem:[#allocation2] sm:$0x8] %vm936_vm7, %v3089_v48 }
0x4297   :  { %v3309_v33 = vpop.permute.xlu0 %3308 }
0x4298   :  { %3311 = vst.msk [vmem:[#allocation2] sm:$0x20] %vm1158_vm8, %v3309_v33 }
0x429b   :  { %v5381_v7 = vpop.eup %5380 }
0x429c   :  { %3519 = vrot.lane.b32.xlu1 %v5381_v7, %s5660_s20 }
0x42a0   :  { %2978 = vrot.lane.b32.xlu1 %v6375_v22, %s5660_s20 }
0x42a4   :  { %3198 = vrot.lane.b32.xlu1 %v6419_v25, %s5660_s20 }
0x42a8   :  { %3418 = vrot.lane.b32.xlu1 %v3416_v18, %s5660_s20 }
0x430e   :  { %v3520_v34 = vpop.permute.xlu1 %3519 }
0x430f   :  { %v3522_v40 = vmul.f32 %v3520_v34, %v3517_v10 }
0x4311   :  { %v6499_v41 = vadd.f32 %v3525_v35, %v3522_v40 }
0x4312   :  { %v2979_v45 = vpop.permute.xlu1 %2978 }
0x4313   :  { %2981 = vst.msk [vmem:[#allocation2] sm:$0x4] %vm825_vm9, %v2979_v45  ;;  %3528 = vrot.lane.b32.xlu0 %v6499_v41, %s5660_s20 }
0x4316   :  { %v3199_v44 = vpop.permute.xlu1 %3198 }
0x4317   :  { %3201 = vst.msk [vmem:[#allocation2] sm:$0x10] %vm1047_vm10, %v3199_v44 }
0x431a   :  { %v3419_v22 = vpop.permute.xlu1 %3418 }
0x431b   :  { %3421 = vst.msk [vmem:[#allocation2] sm:$0x40] %vm1269_vm11, %v3419_v22 }
0x4385   :  { %v3529_v25 = vpop.permute.xlu0 %3528 }
0x4386   :  { %3531 = vst.msk [vmem:[#allocation2] sm:$0x80] %vm1380_vm12, %v3529_v25 }
0x438d   :  { %v3532_v46 = vld [vmem:[#allocation2] sm:$0xff] }
0x438e   :  { %5123 = vmatmul.mubr.msk.f32.vlgmr.msra.gmra.mxu1 %vm502_vm5, %v3532_v46 }
0x438f   :  { %5137 = vmatpush3.msra.mxu1 %v6461_v21  ;;  %5144 = vmatprep.mubr.msk.f32.mxu1 %vm5658_vm0, %v5657_v0 }
0x4390   :  { %5138 = vmatprep.subr.mxu1 %v5657_v0 }
0x4391   :  { %5139 = vmatpush3.msra.mxu1 %v6467_v23 }
0x4392   :  { %5140 = vmatprep.subr.mxu1 %v5657_v0 }
0x4393   :  { %5141 = vmatpush3.msra.mxu1 %v6471_v11 }
0x4394   :  { %5142 = vmatprep.subr.mxu1 %v5657_v0 }
0x4395   :  { %5143 = vmatpush3.msra.mxu1 %v6475_v12 }
0x4396   :  { %5158 = vmatprep.subr.mxu1 %v5657_v0 }
0x444e   :  { %v3602_v47 = vpop.f32.mrf.mxu1 }
0x444f   :  { %v6521_v54 = vadd.f32 %v5449_v42, %v3602_v47 }
0x4450   :  { %v5124_v50 = vpop.f32.mrf.mxu1 }
0x4451   :  { %v3606_v37 = vadd.f32 %v6521_v54, %v6073_v4 }
0x4453   :  { %v4585_v61 = vmul.f32 -1.442695, %v3606_v37 }
0x4455   :  { %5382 = vpow2.f32 %v4585_v61 }
0x4462   :  { %v5383_v24 = vpop.eup %5382 }
0x4463   :  { %v3610_v53 = vadd.f32 1.0, %v5383_v24 }
0x4465   :  { %5384 = vrcp.f32 %v3610_v53 }
0x4472   :  { %v5385_v43 = vpop.eup %5384 }
0x4473   :  { %v3613_v38 = vmul.f32 %v5385_v43, %v6096_v19  ;;  %v3620_v60 = vsub.f32 1.0, %v5385_v43  ;;  %v3626_v4 = vmul.f32 0.0, %v5385_v43 }
0x4475   :  { %3615 = vrot.lane.b32.xlu1 %v3613_v38, %s5659_s15 }
0x44e7   :  { %v3616_v57 = vpop.permute.xlu1 %3615 }
0x44e8   :  { %v3618_v58 = vadd.f32 %v3616_v57, %v6521_v54 }
0x44ea   :  { %5386 = vtanh.f32 %v3618_v58 }
0x44f7   :  { %v5387_v59 = vpop.eup %5386 }
0x44f8   :  { %3622 = vrot.lane.b32.xlu0 %v5387_v59, %s5660_s20 }
0x456a   :  { %v3623_v62 = vpop.permute.xlu0 %3622 }
0x456b   :  { %v3625_v63 = vmul.f32 %v3623_v62, %v3620_v60 }
0x456d   :  { %v3627_v1 = vadd.f32 %v3626_v4, %v3625_v63 }
0x456f   :  { %3629 = vrot.lane.b32.xlu1 %v3627_v1, %s5660_s20  ;;  %v3731_v51 = vrot.slane %v3627_v1, 7 }
0x45e1   :  { %v3630_v3 = vpop.permute.xlu1 %3629 }
0x45e2   :  { %3632 = vst.msk [vmem:[#allocation2] sm:$0x1] %vm606_vm4, %v3630_v3  ;;  %5134 = vmatmul.mubr.msk.f32.vlgmr.msra.gmra.mxu0 %vm502_vm5, %v3630_v3 }
0x45e3   :  { %5148 = vmatpush3.msra.mxu0 %v6461_v21  ;;  %5155 = vmatprep.mubr.msk.f32.mxu0 %vm5658_vm0, %v5657_v0 }
0x45e4   :  { %5149 = vmatprep.subr.mxu0 %v5657_v0 }
0x45e5   :  { %5150 = vmatpush3.msra.mxu0 %v6467_v23 }
0x45e6   :  { %5151 = vmatprep.subr.mxu0 %v5657_v0 }
0x45e7   :  { %5152 = vmatpush3.msra.mxu0 %v6471_v11 }
0x45e8   :  { %5153 = vmatprep.subr.mxu0 %v5657_v0 }
0x45e9   :  { %5154 = vmatpush3.msra.mxu0 %v6475_v12 }
0x45ea   :  { %5169 = vmatprep.subr.mxu0 %v5657_v0 }
0x46a2   :  { %v3701_v19 = vpop.f32.mrf.mxu0 }
0x46a3   :  { %v3702_v6 = vadd.f32 %v6545_v5, %v3701_v19 }
0x46a4   :  { %v5135_v8 = vpop.f32.mrf.mxu0 }
0x46a5   :  { %v3706_v9 = vrot.slane %v3702_v6, 7 }
0x46a7   :  { %3715 = vrot.lane.b32.xlu0 %v3706_v9, %s5659_s15  ;;  %v3708_v13 = vadd.f32 %v3706_v9, %v6521_v54 }
0x46a9   :  { %v4587_v14 = vmul.f32 -1.442695, %v3708_v13 }
0x46ab   :  { %5388 = vpow2.f32 %v4587_v14 }
0x46b8   :  { %v5389_v17 = vpop.eup %5388 }
0x46b9   :  { %v3712_v18 = vadd.f32 1.0, %v5389_v17 }
0x46bb   :  { %5390 = vrcp.f32 %v3712_v18 }
0x46c8   :  { %v5391_v20 = vpop.eup %5390 }
0x46c9   :  { %v3725_v29 = vsub.f32 1.0, %v5391_v20  ;;  %v3733_v2 = vmul.f32 %v5391_v20, %v3731_v51 }
0x4719   :  { %v3716_v15 = vpop.permute.xlu0 %3715 }
0x471a   :  { %v3718_v52 = vmul.f32 %v5391_v20, %v3716_v15 }
0x471c   :  { %3720 = vrot.lane.b32.xlu1 %v3718_v52, %s5659_s15 }
0x478e   :  { %v3721_v28 = vpop.permute.xlu1 %3720 }
0x478f   :  { %v3723_v56 = vadd.f32 %v3721_v28, %v6521_v54 }
0x4791   :  { %5392 = vtanh.f32 %v3723_v56 }
0x479e   :  { %v5393_v26 = vpop.eup %5392 }
0x479f   :  { %3727 = vrot.lane.b32.xlu0 %v5393_v26, %s5660_s20 }
0x4811   :  { %v3728_v55 = vpop.permute.xlu0 %3727 }
0x4812   :  { %v3730_v30 = vmul.f32 %v3728_v55, %v3725_v29 }
0x4814   :  { %v6553_v31 = vadd.f32 %v3733_v2, %v3730_v30 }
0x4816   :  { %v3740_v27 = vrot.slane %v6553_v31, 1  ;;  %v3841_v47 = vrot.slane %v6553_v31, 7 }
0x4818   :  { %3741 = vrot.lane.b32.xlu1 %v3740_v27, %s5660_s20 }
0x488a   :  { %v3742_v49 = vpop.permute.xlu1 %3741 }
0x488b   :  { %5145 = vmatmul.mubr.msk.f32.vlgmr.msra.gmra.mxu1 %vm502_vm5, %v3742_v49 }
0x488c   :  { %5159 = vmatpush3.msra.mxu1 %v6461_v21  ;;  %5166 = vmatprep.mubr.msk.f32.mxu1 %vm5658_vm0, %v5657_v0 }
0x488d   :  { %5160 = vmatprep.subr.mxu1 %v5657_v0 }
0x488e   :  { %5161 = vmatpush3.msra.mxu1 %v6467_v23 }
0x488f   :  { %5162 = vmatprep.subr.mxu1 %v5657_v0 }
0x4890   :  { %5163 = vmatpush3.msra.mxu1 %v6471_v11 }
0x4891   :  { %5164 = vmatprep.subr.mxu1 %v5657_v0 }
0x4892   :  { %5165 = vmatpush3.msra.mxu1 %v6475_v12 }
0x4893   :  { %5180 = vmatprep.subr.mxu1 %v5657_v0 }
0x494b   :  { %v3811_v32 = vpop.f32.mrf.mxu1 }
0x494c   :  { %v3812_v16 = vadd.f32 %v6545_v5, %v3811_v32 }
0x494d   :  { %v5146_v48 = vpop.f32.mrf.mxu1 }
0x494e   :  { %v3816_v33 = vrot.slane %v3812_v16, 6 }
0x4950   :  { %3825 = vrot.lane.b32.xlu0 %v3816_v33, %s5659_s15  ;;  %v3818_v7 = vadd.f32 %v3816_v33, %v6521_v54 }
0x4952   :  { %v4589_v10 = vmul.f32 -1.442695, %v3818_v7 }
0x4954   :  { %5394 = vpow2.f32 %v4589_v10 }
0x4961   :  { %v5395_v39 = vpop.eup %5394 }
0x4962   :  { %v3822_v34 = vadd.f32 1.0, %v5395_v39 }
0x4964   :  { %5396 = vrcp.f32 %v3822_v34 }
0x4971   :  { %v5397_v35 = vpop.eup %5396 }
0x4972   :  { %v3835_v46 = vsub.f32 1.0, %v5397_v35  ;;  %v3843_v50 = vmul.f32 %v5397_v35, %v3841_v47 }
0x49c2   :  { %v3826_v40 = vpop.permute.xlu0 %3825 }
0x49c3   :  { %v3828_v45 = vmul.f32 %v5397_v35, %v3826_v40 }
0x49c5   :  { %3830 = vrot.lane.b32.xlu1 %v3828_v45, %s5659_s15 }
0x4a37   :  { %v3831_v44 = vpop.permute.xlu1 %3830 }
0x4a38   :  { %v3833_v22 = vadd.f32 %v3831_v44, %v6521_v54 }
0x4a3a   :  { %5398 = vtanh.f32 %v3833_v22 }
0x4a47   :  { %v5399_v25 = vpop.eup %5398 }
0x4a48   :  { %3837 = vrot.lane.b32.xlu0 %v5399_v25, %s5660_s20 }
0x4aba   :  { %v3838_v42 = vpop.permute.xlu0 %3837 }
0x4abb   :  { %v3840_v37 = vmul.f32 %v3838_v42, %v3835_v46 }
0x4abd   :  { %v6575_v61 = vadd.f32 %v3843_v50, %v3840_v37 }
0x4abf   :  { %v3850_v24 = vrot.slane %v6575_v61, 2  ;;  %v3951_v13 = vrot.slane %v6575_v61, 7 }
0x4ac1   :  { %3851 = vrot.lane.b32.xlu1 %v3850_v24, %s5660_s20 }
0x4b33   :  { %v3852_v53 = vpop.permute.xlu1 %3851 }
0x4b34   :  { %5156 = vmatmul.mubr.msk.f32.vlgmr.msra.gmra.mxu0 %vm502_vm5, %v3852_v53 }
0x4b35   :  { %5170 = vmatpush3.msra.mxu0 %v6461_v21  ;;  %5177 = vmatprep.mubr.msk.f32.mxu0 %vm5658_vm0, %v5657_v0 }
0x4b36   :  { %5171 = vmatprep.subr.mxu0 %v5657_v0 }
0x4b37   :  { %5172 = vmatpush3.msra.mxu0 %v6467_v23 }
0x4b38   :  { %5173 = vmatprep.subr.mxu0 %v5657_v0 }
0x4b39   :  { %5174 = vmatpush3.msra.mxu0 %v6471_v11 }
0x4b3a   :  { %5175 = vmatprep.subr.mxu0 %v5657_v0 }
0x4b3b   :  { %5176 = vmatpush3.msra.mxu0 %v6475_v12 }
0x4b3c   :  { %5191 = vmatprep.subr.mxu0 %v5657_v0 }
0x4bf4   :  { %v3921_v43 = vpop.f32.mrf.mxu0 }
0x4bf5   :  { %v3922_v38 = vadd.f32 %v6545_v5, %v3921_v43 }
0x4bf6   :  { %v5157_v57 = vpop.f32.mrf.mxu0 }
0x4bf7   :  { %v3926_v58 = vrot.slane %v3922_v38, 5 }
0x4bf9   :  { %3935 = vrot.lane.b32.xlu0 %v3926_v58, %s5659_s15  ;;  %v3928_v59 = vadd.f32 %v3926_v58, %v6521_v54 }
0x4bfb   :  { %v4591_v60 = vmul.f32 -1.442695, %v3928_v59 }
0x4bfd   :  { %5400 = vpow2.f32 %v4591_v60 }
0x4c0a   :  { %v5401_v62 = vpop.eup %5400 }
0x4c0b   :  { %v3932_v4 = vadd.f32 1.0, %v5401_v62 }
0x4c0d   :  { %5402 = vrcp.f32 %v3932_v4 }
0x4c1a   :  { %v5403_v63 = vpop.eup %5402 }
0x4c1b   :  { %v3945_v9 = vsub.f32 1.0, %v5403_v63  ;;  %v3953_v17 = vmul.f32 %v5403_v63, %v3951_v13 }
0x4c6b   :  { %v3936_v1 = vpop.permute.xlu0 %3935 }
0x4c6c   :  { %v3938_v3 = vmul.f32 %v5403_v63, %v3936_v1  ;;  %v5451_v1 = vld [vmem:[#allocation14 + $0x18] sm:$0xff] }
0x4c6e   :  { %3940 = vrot.lane.b32.xlu1 %v3938_v3, %s5659_s15  ;;  %v5452_v3 = vld [vmem:[#allocation14 + $0x10] sm:$0xff] }
0x4ce0   :  { %v3941_v19 = vpop.permute.xlu1 %3940 }
0x4ce1   :  { %v3943_v6 = vadd.f32 %v3941_v19, %v6521_v54  ;;  %v5453_v19 = vld [vmem:[#allocation14 + $0x8] sm:$0xff] }
0x4ce3   :  { %5404 = vtanh.f32 %v3943_v6  ;;  %v5454_v6 = vld [vmem:[#allocation14] sm:$0xff] }
0x4cf0   :  { %v5405_v8 = vpop.eup %5404 }
0x4cf1   :  { %3947 = vrot.lane.b32.xlu0 %v5405_v8, %s5660_s20 }
0x4d63   :  { %v3948_v14 = vpop.permute.xlu0 %3947 }
0x4d64   :  { %v3950_v18 = vmul.f32 %v3948_v14, %v3945_v9 }
0x4d66   :  { %v6597_v20 = vadd.f32 %v3953_v17, %v3950_v18 }
0x4d68   :  { %v3960_v15 = vrot.slane %v6597_v20, 3  ;;  %v4061_v10 = vrot.slane %v6597_v20, 7 }
0x4d6a   :  { %3961 = vrot.lane.b32.xlu1 %v3960_v15, %s5660_s20 }
0x4ddc   :  { %v3962_v52 = vpop.permute.xlu1 %3961 }
0x4ddd   :  { %5167 = vmatmul.mubr.msk.f32.vlgmr.msra.gmra.mxu1 %vm502_vm5, %v3962_v52 }
0x4dde   :  { %5181 = vmatpush3.msra.mxu1 %v6461_v21  ;;  %5188 = vmatprep.mubr.msk.f32.mxu1 %vm5658_vm0, %v5657_v0 }
0x4ddf   :  { %5182 = vmatprep.subr.mxu1 %v5657_v0 }
0x4de0   :  { %5183 = vmatpush3.msra.mxu1 %v6467_v23 }
0x4de1   :  { %5184 = vmatprep.subr.mxu1 %v5657_v0 }
0x4de2   :  { %5185 = vmatpush3.msra.mxu1 %v6471_v11 }
0x4de3   :  { %5186 = vmatprep.subr.mxu1 %v5657_v0 }
0x4de4   :  { %5187 = vmatpush3.msra.mxu1 %v6475_v12 }
0x4de5   :  { %5202 = vmatprep.subr.mxu1 %v5657_v0 }
0x4e9d   :  { %v4031_v28 = vpop.f32.mrf.mxu1 }
0x4e9e   :  { %v4032_v56 = vadd.f32 %v6545_v5, %v4031_v28 }
0x4e9f   :  { %v5168_v26 = vpop.f32.mrf.mxu1 }
0x4ea0   :  { %v4036_v51 = vrot.slane %v4032_v56, 4 }
0x4ea2   :  { %4045 = vrot.lane.b32.xlu0 %v4036_v51, %s5659_s15  ;;  %v4038_v29 = vadd.f32 %v4036_v51, %v6521_v54 }
0x4ea4   :  { %v4593_v55 = vmul.f32 -1.442695, %v4038_v29 }
0x4ea6   :  { %5406 = vpow2.f32 %v4593_v55 }
0x4eb3   :  { %v5407_v2 = vpop.eup %5406 }
0x4eb4   :  { %v4042_v30 = vadd.f32 1.0, %v5407_v2 }
0x4eb6   :  { %5408 = vrcp.f32 %v4042_v30 }
0x4ec3   :  { %v5409_v27 = vpop.eup %5408 }
0x4ec4   :  { %v4055_v7 = vsub.f32 1.0, %v5409_v27  ;;  %v4063_v34 = vmul.f32 %v5409_v27, %v4061_v10 }
0x4f14   :  { %v4046_v49 = vpop.permute.xlu0 %4045 }
0x4f15   :  { %v4048_v32 = vmul.f32 %v5409_v27, %v4046_v49 }
0x4f17   :  { %4050 = vrot.lane.b32.xlu1 %v4048_v32, %s5659_s15 }
0x4f89   :  { %v4051_v16 = vpop.permute.xlu1 %4050 }
0x4f8a   :  { %v4053_v48 = vadd.f32 %v4051_v16, %v6521_v54 }
0x4f8c   :  { %5410 = vtanh.f32 %v4053_v48 }
0x4f99   :  { %v5411_v33 = vpop.eup %5410 }
0x4f9a   :  { %4057 = vrot.lane.b32.xlu0 %v5411_v33, %s5660_s20 }
0x500c   :  { %v4058_v39 = vpop.permute.xlu0 %4057 }
0x500d   :  { %v4060_v35 = vmul.f32 %v4058_v39, %v4055_v7 }
0x500f   :  { %v6619_v40 = vadd.f32 %v4063_v34, %v4060_v35 }
0x5011   :  { %v4070_v45 = vrot.slane %v6619_v40, 4  ;;  %v4171_v57 = vrot.slane %v6619_v40, 7 }
0x5013   :  { %4071 = vrot.lane.b32.xlu1 %v4070_v45, %s5660_s20 }
0x5085   :  { %v4072_v44 = vpop.permute.xlu1 %4071 }
0x5086   :  { %5178 = vmatmul.mubr.msk.f32.vlgmr.msra.gmra.mxu0 %vm502_vm5, %v4072_v44 }
0x5087   :  { %5192 = vmatpush3.msra.mxu0 %v6461_v21  ;;  %5199 = vmatprep.mubr.msk.f32.mxu0 %vm5658_vm0, %v5657_v0 }
0x5088   :  { %5193 = vmatprep.subr.mxu0 %v5657_v0 }
0x5089   :  { %5194 = vmatpush3.msra.mxu0 %v6467_v23 }
0x508a   :  { %5195 = vmatprep.subr.mxu0 %v5657_v0 }
0x508b   :  { %5196 = vmatpush3.msra.mxu0 %v6471_v11 }
0x508c   :  { %5197 = vmatprep.subr.mxu0 %v5657_v0 }
0x508d   :  { %5198 = vmatpush3.msra.mxu0 %v6475_v12 }
0x5146   :  { %v4141_v22 = vpop.f32.mrf.mxu0 }
0x5147   :  { %v4142_v25 = vadd.f32 %v6545_v5, %v4141_v22 }
0x5148   :  { %v5179_v46 = vpop.f32.mrf.mxu0 }
0x5149   :  { %v4146_v21 = vrot.slane %v4142_v25, 3 }
0x514b   :  { %4155 = vrot.lane.b32.xlu0 %v4146_v21, %s5659_s15  ;;  %v4148_v47 = vadd.f32 %v4146_v21, %v6521_v54 }
0x514d   :  { %v4595_v42 = vmul.f32 -1.442695, %v4148_v47 }
0x514f   :  { %5412 = vpow2.f32 %v4595_v42 }
0x515c   :  { %v5413_v23 = vpop.eup %5412 }
0x515d   :  { %v4152_v50 = vadd.f32 1.0, %v5413_v23 }
0x515f   :  { %5414 = vrcp.f32 %v4152_v50 }
0x516c   :  { %v5415_v37 = vpop.eup %5414 }
0x516d   :  { %v4165_v38 = vsub.f32 1.0, %v5415_v37  ;;  %v4173_v59 = vmul.f32 %v5415_v37, %v4171_v57 }
0x51bd   :  { %v4156_v11 = vpop.permute.xlu0 %4155 }
0x51be   :  { %v4158_v24 = vmul.f32 %v5415_v37, %v4156_v11 }
0x51c0   :  { %4160 = vrot.lane.b32.xlu1 %v4158_v24, %s5659_s15 }
0x5232   :  { %v4161_v12 = vpop.permute.xlu1 %4160 }
0x5233   :  { %v4163_v53 = vadd.f32 %v4161_v12, %v6521_v54 }
0x5235   :  { %5416 = vtanh.f32 %v4163_v53  ;;  %v4476_v53 = vrot.slane %v6499_v41, 7 }
0x5242   :  { %v5417_v43 = vpop.eup %5416 }
0x5243   :  { %4167 = vrot.lane.b32.xlu0 %v5417_v43, %s5660_s20 }
0x52b5   :  { %v4168_v58 = vpop.permute.xlu0 %4167 }
0x52b6   :  { %v4170_v60 = vmul.f32 %v4168_v58, %v4165_v38 }
0x52b8   :  { %v6640_v62 = vadd.f32 %v4173_v59, %v4170_v60 }
0x52ba   :  { %v4180_v4 = vrot.slane %v6640_v62, 5  ;;  %v4281_v2 = vrot.slane %v6640_v62, 7 }
0x52bc   :  { %4181 = vrot.lane.b32.xlu1 %v4180_v4, %s5660_s20 }
0x532e   :  { %v4182_v63 = vpop.permute.xlu1 %4181 }
0x532f   :  { %5189 = vmatmul.mubr.msk.f32.vlgmr.msra.gmra.mxu1 %vm502_vm5, %v4182_v63 }
0x5330   :  { %5203 = vmatpush3.msra.mxu1 %v5451_v1  ;;  %5210 = vmatprep.mubr.msk.f32.mxu1 %vm5658_vm0, %v5657_v0 }
0x5331   :  { %5204 = vmatprep.subr.mxu1 %v5657_v0 }
0x5332   :  { %5205 = vmatpush3.msra.mxu1 %v5452_v3 }
0x5333   :  { %5206 = vmatprep.subr.mxu1 %v5657_v0 }
0x5334   :  { %5207 = vmatpush3.msra.mxu1 %v5453_v19 }
0x5335   :  { %5208 = vmatprep.subr.mxu1 %v5657_v0 }
0x5336   :  { %5209 = vmatpush3.msra.mxu1 %v5454_v6 }
0x53ef   :  { %v4251_v8 = vpop.f32.mrf.mxu1 }
0x53f0   :  { %v4252_v9 = vadd.f32 %v6545_v5, %v4251_v8 }
0x53f1   :  { %v5190_v13 = vpop.f32.mrf.mxu1 }
0x53f2   :  { %v4256_v14 = vrot.slane %v4252_v9, 2 }
0x53f4   :  { %4265 = vrot.lane.b32.xlu0 %v4256_v14, %s5659_s15  ;;  %v4258_v17 = vadd.f32 %v4256_v14, %v6521_v54 }
0x53f6   :  { %v4597_v18 = vmul.f32 -1.442695, %v4258_v17 }
0x53f8   :  { %5418 = vpow2.f32 %v4597_v18 }
0x5405   :  { %v5419_v15 = vpop.eup %5418 }
0x5406   :  { %v4262_v52 = vadd.f32 1.0, %v5419_v15 }
0x5408   :  { %5420 = vrcp.f32 %v4262_v52 }
0x5415   :  { %v5421_v28 = vpop.eup %5420 }
0x5416   :  { %v4275_v55 = vsub.f32 1.0, %v5421_v28  ;;  %v4283_v27 = vmul.f32 %v5421_v28, %v4281_v2 }
0x5466   :  { %v4266_v56 = vpop.permute.xlu0 %4265 }
0x5467   :  { %v4268_v26 = vmul.f32 %v5421_v28, %v4266_v56 }
0x5469   :  { %4270 = vrot.lane.b32.xlu1 %v4268_v26, %s5659_s15 }
0x54db   :  { %v4271_v0 = vpop.permute.xlu1 %4270 }
0x54dc   :  { %v4273_v51 = vadd.f32 %v4271_v0, %v6521_v54 }
0x54de   :  { %5422 = vtanh.f32 %v4273_v51 }
0x54eb   :  { %v5423_v29 = vpop.eup %5422 }
0x54ec   :  { %4277 = vrot.lane.b32.xlu0 %v5423_v29, %s5660_s20 }
0x555e   :  { %v4278_v30 = vpop.permute.xlu0 %4277 }
0x555f   :  { %v4280_v49 = vmul.f32 %v4278_v30, %v4275_v55 }
0x5561   :  { %v4284_v32 = vadd.f32 %v4283_v27, %v4280_v49 }
0x5563   :  { %v4290_v16 = vrot.slane %v4284_v32, 6 }
0x5565   :  { %4291 = vrot.lane.b32.xlu1 %v4290_v16, %s5660_s20 }
0x55d7   :  { %v4292_v48 = vpop.permute.xlu1 %4291 }
0x55d8   :  { %5200 = vmatmul.mubr.msk.f32.vlgmr.msra.gmra.mxu0 %vm502_vm5, %v4292_v48 }
0x5698   :  { %v4361_v33 = vpop.f32.mrf.mxu0 }
0x5699   :  { %v4362_v7 = vadd.f32 %v6545_v5, %v4361_v33 }
0x569a   :  { %v5201_v10 = vpop.f32.mrf.mxu0 }
0x569b   :  { %v4366_v39 = vrot.slane %v4362_v7, 1 }
0x569d   :  { %4375 = vrot.lane.b32.xlu0 %v4366_v39, %s5659_s15  ;;  %v4368_v34 = vadd.f32 %v4366_v39, %v6521_v54 }
0x569f   :  { %v4599_v35 = vmul.f32 -1.442695, %v4368_v34 }
0x56a1   :  { %5424 = vpow2.f32 %v4599_v35 }
0x56ae   :  { %v5425_v45 = vpop.eup %5424 }
0x56af   :  { %v4372_v44 = vadd.f32 1.0, %v5425_v45 }
0x56b1   :  { %5426 = vrcp.f32 %v4372_v44 }
0x56be   :  { %v5427_v22 = vpop.eup %5426 }
0x570f   :  { %v4376_v25 = vpop.permute.xlu0 %4375 }
0x5710   :  { %v4378_v46 = vmul.f32 %v5427_v22, %v4376_v25 }
0x5712   :  { %4380 = vrot.lane.b32.xlu1 %v4378_v46, %s5659_s15 }
0x5716   :  { %3736 = vrot.lane.b32.xlu1 %v6553_v31, %s5660_s20 }
0x571a   :  { %3956 = vrot.lane.b32.xlu1 %v6597_v20, %s5660_s20  ;;  %v4391_v20 = vrot.slane %v4284_v32, 7 }
0x571c   :  { %v4393_v37 = vmul.f32 %v5427_v22, %v4391_v20 }
0x571e   :  { %4176 = vrot.lane.b32.xlu1 %v6640_v62, %s5660_s20 }
0x5784   :  { %v4381_v5 = vpop.permute.xlu1 %4380 }
0x5785   :  { %v4383_v21 = vadd.f32 %v4381_v5, %v6521_v54  ;;  %v4385_v54 = vsub.f32 1.0, %v5427_v22 }
0x5787   :  { %5428 = vtanh.f32 %v4383_v21 }
0x5788   :  { %v3737_v47 = vpop.permute.xlu1 %3736 }
0x5789   :  { %3739 = vst.msk [vmem:[#allocation2] sm:$0x2] %vm714_vm6, %v3737_v47 }
0x578c   :  { %v3957_v42 = vpop.permute.xlu1 %3956 }
0x578d   :  { %3959 = vst.msk [vmem:[#allocation2] sm:$0x8] %vm936_vm7, %v3957_v42 }
0x5790   :  { %v4177_v23 = vpop.permute.xlu1 %4176 }
0x5791   :  { %4179 = vst.msk [vmem:[#allocation2] sm:$0x20] %vm1158_vm8, %v4177_v23 }
0x5794   :  { %v5429_v31 = vpop.eup %5428 }
0x5795   :  { %4387 = vrot.lane.b32.xlu0 %v5429_v31, %s5660_s20 }
0x5799   :  { %3846 = vrot.lane.b32.xlu0 %v6575_v61, %s5660_s20 }
0x579d   :  { %4066 = vrot.lane.b32.xlu0 %v6619_v40, %s5660_s20 }
0x57a1   :  { %4286 = vrot.lane.b32.xlu0 %v4284_v32, %s5660_s20 }
0x57a5   :  { %2418 = vrot.lane.b32.xlu0 %v6261_v36, %s5660_s20 }
0x5807   :  { %v4388_v50 = vpop.permute.xlu0 %4387 }
0x5808   :  { %v4390_v11 = vmul.f32 %v4388_v50, %v4385_v54 }
0x580a   :  { %v4394_v24 = vadd.f32 %v4393_v37, %v4390_v11 }
0x580b   :  { %v3847_v12 = vpop.permute.xlu0 %3846 }
0x580c   :  { %v4478_v43 = vrot.slane %v4394_v24, 6  ;;  %3849 = vst.msk [vmem:[#allocation2] sm:$0x4] %vm825_vm9, %v3847_v12  ;;  %4396 = vrot.lane.b32.xlu1 %v4394_v24, %s5660_s20 }
0x580e   :  { %v4480_v61 = vsel %vm2415_vm13, %v4476_v53, %v4478_v43 }
0x580f   :  { %v4067_v40 = vpop.permute.xlu0 %4066 }
0x5810   :  { %4069 = vst.msk [vmem:[#allocation2] sm:$0x10] %vm1047_vm10, %v4067_v40  ;;  %4482 = vrot.lane.b32.xlu1 %v4480_v61, %s5660_s20 }
0x5813   :  { %v4287_v36 = vpop.permute.xlu0 %4286 }
0x5814   :  { %4289 = vst.msk [vmem:[#allocation2] sm:$0x40] %vm1269_vm11, %v4287_v36 }
0x5817   :  { %v2419_v38 = vpop.permute.xlu0 %2418 }
0x5818   :  { %2422 = vst.msk [vmem:[#allocation16] sm:$0x3] %vm2421_vm14, %v2419_v38 }
0x587e   :  { %v4397_v57 = vpop.permute.xlu1 %4396 }
0x587f   :  { %4399 = vst.msk [vmem:[#allocation2] sm:$0x80] %vm1380_vm12, %v4397_v57 }
0x5882   :  { %v4483_v41 = vpop.permute.xlu1 %4482 }
0x5883   :  { %4486 = vst.msk [vmem:[#allocation16 + $0x2] sm:$0x3] %vm2421_vm14, %v4483_v41 }
0x5886   :  { %v4400_v58 = vld [vmem:[#allocation2] sm:$0xff] }
0x5887   :  { %5211 = vmatmul.mubr.msk.f32.vlgmr.msra.gmra.mxu1 %vm502_vm5, %v4400_v58 }
0x5888   :  { %5607 = shalt.err (!%p5604_p11)
}
0x5889   :  { %s5662_s11 = smov 32   ;;  %s5663_s30 = smov 2   ;;  %v5455_v60 = vld [vmem:[%s6715_s12] ss:$0 sm:$0xff] }
0x588a   :  { %4510 = dma.vmem_to_hbm [thread:$0]  %s4505_s29, 64, %s6717_s14, [#allocation17], %s5662_s11, %s5662_s11, %s5663_s30  }
0x588b   :  { %s5664_s16 = smov [#allocation15]  }
0x588c   :  { %s4492_s17 = sshll.u32 %s5664_s16, 4  ;;  %s4493_s17 = int_to_ptr.vmem [resolvable:$true] %s4492_s17 }
0x588d   :  { %s5616_s22 = scalar_lea.vmem %s4493_s17, 256  ;;  %p5621_p13 = scmp.lt.s32.totalorder %s4493_s17, %s4493_s17 }
0x588e   :  { %p5617_p12 = scmp.ne.s32.totalorder %s4493_s17, %s5616_s22  ;;  %p5622_p0 = scmp.lt.s32.totalorder %s5616_s22, %s5616_s22 }
0x5890   :  { %p5623_p1 = por %p5622_p0, %p5621_p13 }
0x5892   :  { %p5624_p2 = pnand %p5623_p1, %p5617_p12 }
0x5947   :  { %v4470_v59 = vpop.f32.mrf.mxu1 }
0x5948   :  { %v4471_v62 = vadd.f32 %v5455_v60, %v4470_v59 }
0x5949   :  { %v5212_v4 = vpop.f32.mrf.mxu1 }
0x594a   :  { %4475 = vst.msk [vmem:[#allocation15 + $0x8] sm:$0xff] %vm502_vm5, %v4471_v62 }
0x594b   :  { %5627 = shalt.err (!%p5624_p2)
}
0x594c   :  { %4498 = dma.vmem_to_hbm [thread:$0]  %s4493_s17, 256, %s6716_s13, [#allocation5], %s5650_s18, %s5650_s18, %s5651_s19  }
0x594d   :  { %5644 = dma.done.wait [#allocation5], 256  }
0x594e   :  { %5645 = vsyncadd [#allocation5], 4294967040 }
0x594f   :  { %5646 = dma.done.wait [#allocation17], 64  }
0x5950   :  { %5647 = vsyncadd [#allocation17], 4294967232 }
0x5951   :  { %4517 = vsyncpa [#allocation4], 1 }
0x5952   :  { %4518 = vsyncpa [#allocation7], 1 }
0x5953   :  { %4519 = vsyncpa [#allocation10], 1 }
0x5954   :  { %4520 = vsyncpa [#allocation13], 1 }
0x5955   :  { %4521 = vsyncpa [#allocation5], 1 }
0x5956   :  { %4522 = vsyncpa [#allocation17], 1 }

</bundles_post_ra>
